<compile_context>
chip_gen: v7x
topology: tpu7x:2x2x1
jax: 0.10.0
libtpu: 0.0.40
codegen_flags: <defaults>
</compile_context>

<pallas_src>
import functools

import numpy as np

import jax
import jax.numpy as jnp
from jax.experimental import pallas as pl
from jax.experimental.pallas import tpu as pltpu


def cbam_kernel(x_ref, w1t_ref, b1_ref, w2t_ref, b2_ref, tapw_ref, bs_ref,
                o_ref, *, K, H, W):
    Bt, C, HW = x_ref.shape
    PAD = K // 2

    x = x_ref[...].astype(jnp.float32)                      # (Bt, C, HW) lane-dense

    # ---------------- Channel attention (batched over the tile) -------------
    avg = jnp.mean(x, axis=2)                                # (Bt, C)
    mx = jnp.max(x, axis=2)                                  # (Bt, C)
    pooled = jnp.concatenate([avg, mx], axis=0)              # (2*Bt, C)

    h = jnp.dot(pooled, w1t_ref[...],
                preferred_element_type=jnp.float32) + b1_ref[...]
    h = jnp.maximum(h, 0.0)                                  # (2*Bt, Cr)
    o2 = jnp.dot(h, w2t_ref[...],
                 preferred_element_type=jnp.float32) + b2_ref[...]   # (2*Bt, C)
    ca = jax.nn.sigmoid(o2[:Bt] + o2[Bt:])                   # (Bt, C)

    out1 = x * ca[:, :, None]                                # (Bt, C, HW), reused below

    # ---------------- Spatial attention (flat lane-dense conv) --------------
    avg_map = jnp.mean(out1, axis=1)                         # (Bt, HW)
    max_map = jnp.max(out1, axis=1)                          # (Bt, HW)

    # 7x7 conv on the 2-channel map, done directly in the flat layout: each
    # tap (c, kh, kw) is one lane-roll of the flat map plus an FMA with the
    # precomputed masked-weight row tapw[c*K*K + kh*K + kw]; the zero padding
    # is already folded into those rows, so no padded scratch map is needed.
    maps = (avg_map, max_map)
    accs = [jnp.zeros((Bt, HW), jnp.float32) for _ in range(4)]
    for c in range(2):
        m = maps[c]
        for kh in range(K):
            dh = kh - PAD
            a = 2 * c + (kh & 1)          # break the serial FMA chain
            for kw in range(K):
                dw = kw - PAD
                off = dh * W + dw
                shifted = m if off == 0 else pltpu.roll(m, (-off) % HW, axis=1)
                idx = c * K * K + kh * K + kw
                w_row = tapw_ref[idx:idx + 1, :]             # (1, HW)
                accs[a] = accs[a] + shifted * w_row
    conv = (accs[0] + accs[1]) + (accs[2] + accs[3]) + bs_ref[0]
    sa = jax.nn.sigmoid(conv)                                # (Bt, HW) lane-dense

    # Single unmasked, lane-dense store of the final output.
    o_ref[...] = (out1 * sa[:, None, :]).astype(o_ref.dtype)


def cbam_pallas(x, params, reduction_ratio=4, kernel_size=7, max_bt=128):
    N, C, H, W = x.shape
    Cr = C // reduction_ratio
    K = kernel_size
    PAD = K // 2
    HW = H * W
    w1, b1, w2, b2, ws, bs = params

    # Batch tile: largest divisor of N not exceeding max_bt.  (On v7x, when N
    # is large, the resulting grid length is >= 2, so the "parallel" grid axis
    # feeds both TensorCores; at the tiny demo N this is moot.)
    bt = 1
    for d in range(1, min(N, max_bt) + 1):
        if N % d == 0:
            bt = d

    xf = x.reshape(N, C, HW)                 # lane-dense view of the input

    # ---- trace-time constants (weights reorganized once, outside the kernel)
    w1t = jnp.asarray(w1, jnp.float32).T                    # (C, Cr)
    w2t = jnp.asarray(w2, jnp.float32).T                    # (Cr, C)
    b1r = jnp.asarray(b1, jnp.float32).reshape(1, Cr)
    b2r = jnp.asarray(b2, jnp.float32).reshape(1, C)
    bs1 = jnp.reshape(bs, (1,)).astype(jnp.float32)

    # Per-tap masked conv-weight rows: tapw[c*K*K + kh*K + kw, i] equals
    # ws[c, kh, kw] if applying tap (kh, kw) at flat position i stays inside
    # the H x W map (zero padding), else 0.
    rows = np.arange(HW) // W
    cols = np.arange(HW) % W
    dhs = np.arange(K) - PAD
    dws = np.arange(K) - PAD
    mh = ((rows[None, :] + dhs[:, None]) >= 0) & ((rows[None, :] + dhs[:, None]) < H)
    mw = ((cols[None, :] + dws[:, None]) >= 0) & ((cols[None, :] + dws[:, None]) < W)
    mask = (mh[:, None, :] & mw[None, :, :]).astype(np.float32)          # (K, K, HW)
    tapw = (jnp.asarray(ws, jnp.float32)[:, :, :, None]
            * jnp.asarray(mask)[None, :, :, :]).reshape(2 * K * K, HW)   # (2*K*K, HW)

    kernel = functools.partial(cbam_kernel, K=K, H=H, W=W)

    out_flat = pl.pallas_call(
        kernel,
        out_shape=jax.ShapeDtypeStruct((N, C, HW), x.dtype),
        grid_spec=pltpu.PrefetchScalarGridSpec(
            num_scalar_prefetch=0,
            grid=(N // bt,),
            in_specs=[
                pl.BlockSpec((bt, C, HW), lambda n: (n, 0, 0)),      # x (flat)
                pl.BlockSpec((C, Cr), lambda n: (0, 0)),             # fc1 weight^T
                pl.BlockSpec((1, Cr), lambda n: (0, 0)),             # fc1 bias row
                pl.BlockSpec((Cr, C), lambda n: (0, 0)),             # fc2 weight^T
                pl.BlockSpec((1, C), lambda n: (0, 0)),              # fc2 bias row
                pl.BlockSpec((2 * K * K, HW), lambda n: (0, 0)),     # masked tap weights
                pl.BlockSpec(memory_space=pltpu.MemorySpace.SMEM),   # conv bias
            ],
            out_specs=pl.BlockSpec((bt, C, HW), lambda n: (n, 0, 0)),
        ),
        compiler_params=pltpu.CompilerParams(
            dimension_semantics=("parallel",),   # disjoint output blocks per tile
            vmem_limit_bytes=32 * 1024 * 1024,   # safe on v5e/v6e/v7x, ample headroom
        ),
    )(xf, w1t, b1r, w2t, b2r, tapw, bs1)
    return out_flat.reshape(N, C, H, W)


def cbam_ref(x, params, kernel_size=7):
    """Pure-JAX reference matching the PyTorch CBAM forward."""
    w1, b1, w2, b2, ws, bs = params
    PAD = kernel_size // 2
    xf = x.astype(jnp.float32)
    avg = jnp.mean(xf, axis=(2, 3), keepdims=True)
    mx = jnp.max(xf, axis=(2, 3), keepdims=True)

    def mlp(v):
        h = jnp.einsum('rc,ncij->nrij', w1, v) + b1[None, :, None, None]
        h = jnp.maximum(h, 0.0)
        return jnp.einsum('cr,nrij->ncij', w2, h) + b2[None, :, None, None]

    ca = jax.nn.sigmoid(mlp(avg) + mlp(mx))
    out1 = ca * xf
    maps = jnp.concatenate([jnp.mean(out1, axis=1, keepdims=True),
                            jnp.max(out1, axis=1, keepdims=True)], axis=1)
    conv = jax.lax.conv_general_dilated(
        maps, ws[None], window_strides=(1, 1),
        padding=((PAD, PAD), (PAD, PAD)),
        dimension_numbers=('NCHW', 'OIHW', 'NCHW')) + bs
    sa = jax.nn.sigmoid(conv)
    return (sa * out1).astype(x.dtype)


if __name__ == "__main__":
    N, C, H, W = 2, 16, 16, 16
    reduction_ratio, K = 4, 7          # C // reduction_ratio = 4 hidden channels
    Cr = C // reduction_ratio

    key = jax.random.PRNGKey(0)
    k = jax.random.split(key, 7)
    x = jax.random.normal(k[0], (N, C, H, W), jnp.float32)
    # Deterministic synthetic parameters (shapes from the module's __init__).
    w1 = jax.random.normal(k[1], (Cr, C), jnp.float32) * 0.2      # fc1 (1x1 conv)
    b1 = jax.random.normal(k[2], (Cr,), jnp.float32) * 0.1
    w2 = jax.random.normal(k[3], (C, Cr), jnp.float32) * 0.2      # fc2 (1x1 conv)
    b2 = jax.random.normal(k[4], (C,), jnp.float32) * 0.1
    ws = jax.random.normal(k[5], (2, K, K), jnp.float32) * 0.1    # spatial 7x7 conv
    bs = jax.random.normal(k[6], (), jnp.float32) * 0.1
    params = (w1, b1, w2, b2, ws, bs)

    out = cbam_pallas(x, params, reduction_ratio=reduction_ratio, kernel_size=K)
    out = jax.block_until_ready(out)

    ref = cbam_ref(x, params, kernel_size=K)
    assert out.shape == x.shape
    if not jnp.allclose(out, ref, atol=1e-4, rtol=1e-4):
        raise AssertionError("Pallas CBAM output mismatch vs JAX reference")
    print("KERNEL_OK")
</pallas_src>

<mosaic_0001>
module attributes {stable_mosaic.version = 11 : i64} {
  func.func @cbam_kernel(%arg0: i32, %arg1: memref<2x16x256xf32, #tpu.memory_space<vmem>>, %arg2: memref<16x4xf32, #tpu.memory_space<vmem>>, %arg3: memref<1x4xf32, #tpu.memory_space<vmem>>, %arg4: memref<4x16xf32, #tpu.memory_space<vmem>>, %arg5: memref<1x16xf32, #tpu.memory_space<vmem>>, %arg6: memref<98x256xf32, #tpu.memory_space<vmem>>, %arg7: memref<1xf32, #tpu.memory_space<smem>>, %arg8: memref<2x16x256xf32, #tpu.memory_space<vmem>>) attributes {dimension_semantics = [#tpu.dimension_semantics<parallel>], iteration_bounds = array<i64: 1>, scalar_prefetch = 0 : i64, scratch_operands = 0 : i64, tpu.core_type = #tpu.core_type<tc>, window_params = [{transform_indices = @transform_0, window_bounds = array<i64: 2, 16, 256>}, {pipeline_mode = #tpu.pipeline_mode<synchronous>, transform_indices = @transform_1, window_bounds = array<i64: 16, 4>}, {pipeline_mode = #tpu.pipeline_mode<synchronous>, transform_indices = @transform_2, window_bounds = array<i64: 1, 4>}, {pipeline_mode = #tpu.pipeline_mode<synchronous>, transform_indices = @transform_3, window_bounds = array<i64: 4, 16>}, {pipeline_mode = #tpu.pipeline_mode<synchronous>, transform_indices = @transform_4, window_bounds = array<i64: 1, 16>}, {pipeline_mode = #tpu.pipeline_mode<synchronous>, transform_indices = @transform_5, window_bounds = array<i64: 98, 256>}, {transform_indices = @transform_6, window_bounds = array<i64: 1>}, {transform_indices = @transform_7, window_bounds = array<i64: 2, 16, 256>}]} {
    %c0 = arith.constant 0 : index
    %c0_0 = arith.constant 0 : index
    %c0_1 = arith.constant 0 : index
    %0 = vector.load %arg1[%c0, %c0_0, %c0_1] : memref<2x16x256xf32, #tpu.memory_space<vmem>>, vector<2x16x256xf32>
    %cst = arith.constant dense<0.000000e+00> : vector<2x16xf32>
    %1 = vector.multi_reduction <add>, %0, %cst [2] : vector<2x16x256xf32> to vector<2x16xf32>
    %cst_2 = arith.constant 2.560000e+02 : f32
    %2 = vector.broadcast %cst_2 : f32 to vector<2x16xf32>
    %3 = arith.divf %1, %2 : vector<2x16xf32>
    %cst_3 = arith.constant dense<0xFF800000> : vector<2x16xf32>
    %4 = vector.multi_reduction <maximumf>, %0, %cst_3 [2] : vector<2x16x256xf32> to vector<2x16xf32>
    %5 = tpu.concatenate %3, %4 in 0 : vector<2x16xf32>, vector<2x16xf32> -> vector<4x16xf32>
    %c0_4 = arith.constant 0 : index
    %c0_5 = arith.constant 0 : index
    %6 = vector.load %arg2[%c0_4, %c0_5] : memref<16x4xf32, #tpu.memory_space<vmem>>, vector<16x4xf32>
    %cst_6 = arith.constant dense<0.000000e+00> : vector<4x4xf32>
    %7 = tpu.matmul %5, %6, %cst_6 {dimension_numbers = #tpu.dot_dimension_numbers<[1], [0], [0], [1], [0, 0, 1, 1], [], []>} : vector<4x16xf32>, vector<16x4xf32>, vector<4x4xf32> -> vector<4x4xf32>
    %c0_7 = arith.constant 0 : index
    %c0_8 = arith.constant 0 : index
    %8 = vector.load %arg3[%c0_7, %c0_8] : memref<1x4xf32, #tpu.memory_space<vmem>>, vector<1x4xf32>
    %9 = vector.broadcast %8 : vector<1x4xf32> to vector<4x4xf32>
    %10 = arith.addf %7, %9 : vector<4x4xf32>
    %cst_9 = arith.constant 0.000000e+00 : f32
    %11 = vector.broadcast %cst_9 : f32 to vector<4x4xf32>
    %12 = arith.maximumf %10, %11 : vector<4x4xf32>
    %c0_10 = arith.constant 0 : index
    %c0_11 = arith.constant 0 : index
    %13 = vector.load %arg4[%c0_10, %c0_11] : memref<4x16xf32, #tpu.memory_space<vmem>>, vector<4x16xf32>
    %cst_12 = arith.constant dense<0.000000e+00> : vector<4x16xf32>
    %14 = tpu.matmul %12, %13, %cst_12 {dimension_numbers = #tpu.dot_dimension_numbers<[1], [0], [0], [1], [0, 0, 1, 1], [], []>} : vector<4x4xf32>, vector<4x16xf32>, vector<4x16xf32> -> vector<4x16xf32>
    %c0_13 = arith.constant 0 : index
    %c0_14 = arith.constant 0 : index
    %15 = vector.load %arg5[%c0_13, %c0_14] : memref<1x16xf32, #tpu.memory_space<vmem>>, vector<1x16xf32>
    %16 = vector.broadcast %15 : vector<1x16xf32> to vector<4x16xf32>
    %17 = arith.addf %14, %16 : vector<4x16xf32>
    %18 = vector.extract_strided_slice %17 {offsets = [0, 0], sizes = [2, 16], strides = [1, 1]} : vector<4x16xf32> to vector<2x16xf32>
    %19 = vector.extract_strided_slice %17 {offsets = [2, 0], sizes = [2, 16], strides = [1, 1]} : vector<4x16xf32> to vector<2x16xf32>
    %20 = arith.addf %18, %19 : vector<2x16xf32>
    %21 = arith.negf %20 : vector<2x16xf32>
    %22 = math.exp %21 : vector<2x16xf32>
    %cst_15 = arith.constant 1.000000e+00 : f32
    %23 = vector.broadcast %cst_15 : f32 to vector<2x16xf32>
    %24 = arith.addf %23, %22 : vector<2x16xf32>
    %25 = arith.divf %23, %24 : vector<2x16xf32>
    %26 = vector.shape_cast %25 : vector<2x16xf32> to vector<2x16x1xf32>
    %27 = vector.broadcast %26 : vector<2x16x1xf32> to vector<2x16x256xf32>
    %28 = arith.mulf %0, %27 : vector<2x16x256xf32>
    %cst_16 = arith.constant dense<0.000000e+00> : vector<2x256xf32>
    %29 = vector.multi_reduction <add>, %28, %cst_16 [1] : vector<2x16x256xf32> to vector<2x256xf32>
    %cst_17 = arith.constant 1.600000e+01 : f32
    %30 = vector.broadcast %cst_17 : f32 to vector<2x256xf32>
    %31 = arith.divf %29, %30 : vector<2x256xf32>
    %cst_18 = arith.constant dense<0xFF800000> : vector<2x256xf32>
    %32 = vector.multi_reduction <maximumf>, %28, %cst_18 [1] : vector<2x16x256xf32> to vector<2x256xf32>
    %cst_19 = arith.constant 0.000000e+00 : f32
    %33 = vector.broadcast %cst_19 : f32 to vector<2x256xf32>
    %cst_20 = arith.constant 0.000000e+00 : f32
    %34 = vector.broadcast %cst_20 : f32 to vector<2x256xf32>
    %cst_21 = arith.constant 0.000000e+00 : f32
    %35 = vector.broadcast %cst_21 : f32 to vector<2x256xf32>
    %cst_22 = arith.constant 0.000000e+00 : f32
    %36 = vector.broadcast %cst_22 : f32 to vector<2x256xf32>
    %c51_i32 = arith.constant 51 : i32
    %37 = tpu.dynamic_rotate %31 by %c51_i32 dim 1 : vector<2x256xf32>, i32 -> vector<2x256xf32>
    %c0_23 = arith.constant 0 : index
    %c0_24 = arith.constant 0 : index
    %38 = vector.load %arg6[%c0_23, %c0_24] : memref<98x256xf32, #tpu.memory_space<vmem>>, vector<1x256xf32>
    %39 = vector.broadcast %38 : vector<1x256xf32> to vector<2x256xf32>
    %40 = arith.mulf %37, %39 : vector<2x256xf32>
    %41 = arith.addf %33, %40 : vector<2x256xf32>
    %c50_i32 = arith.constant 50 : i32
    %42 = tpu.dynamic_rotate %31 by %c50_i32 dim 1 : vector<2x256xf32>, i32 -> vector<2x256xf32>
    %c1 = arith.constant 1 : index
    %c0_25 = arith.constant 0 : index
    %43 = vector.load %arg6[%c1, %c0_25] : memref<98x256xf32, #tpu.memory_space<vmem>>, vector<1x256xf32>
    %44 = vector.broadcast %43 : vector<1x256xf32> to vector<2x256xf32>
    %45 = arith.mulf %42, %44 : vector<2x256xf32>
    %46 = arith.addf %41, %45 : vector<2x256xf32>
    %c49_i32 = arith.constant 49 : i32
    %47 = tpu.dynamic_rotate %31 by %c49_i32 dim 1 : vector<2x256xf32>, i32 -> vector<2x256xf32>
    %c2 = arith.constant 2 : index
    %c0_26 = arith.constant 0 : index
    %48 = vector.load %arg6[%c2, %c0_26] : memref<98x256xf32, #tpu.memory_space<vmem>>, vector<1x256xf32>
    %49 = vector.broadcast %48 : vector<1x256xf32> to vector<2x256xf32>
    %50 = arith.mulf %47, %49 : vector<2x256xf32>
    %51 = arith.addf %46, %50 : vector<2x256xf32>
    %c48_i32 = arith.constant 48 : i32
    %52 = tpu.dynamic_rotate %31 by %c48_i32 dim 1 : vector<2x256xf32>, i32 -> vector<2x256xf32>
    %c3 = arith.constant 3 : index
    %c0_27 = arith.constant 0 : index
    %53 = vector.load %arg6[%c3, %c0_27] : memref<98x256xf32, #tpu.memory_space<vmem>>, vector<1x256xf32>
    %54 = vector.broadcast %53 : vector<1x256xf32> to vector<2x256xf32>
    %55 = arith.mulf %52, %54 : vector<2x256xf32>
    %56 = arith.addf %51, %55 : vector<2x256xf32>
    %c47_i32 = arith.constant 47 : i32
    %57 = tpu.dynamic_rotate %31 by %c47_i32 dim 1 : vector<2x256xf32>, i32 -> vector<2x256xf32>
    %c4 = arith.constant 4 : index
    %c0_28 = arith.constant 0 : index
    %58 = vector.load %arg6[%c4, %c0_28] : memref<98x256xf32, #tpu.memory_space<vmem>>, vector<1x256xf32>
    %59 = vector.broadcast %58 : vector<1x256xf32> to vector<2x256xf32>
    %60 = arith.mulf %57, %59 : vector<2x256xf32>
    %61 = arith.addf %56, %60 : vector<2x256xf32>
    %c46_i32 = arith.constant 46 : i32
    %62 = tpu.dynamic_rotate %31 by %c46_i32 dim 1 : vector<2x256xf32>, i32 -> vector<2x256xf32>
    %c5 = arith.constant 5 : index
    %c0_29 = arith.constant 0 : index
    %63 = vector.load %arg6[%c5, %c0_29] : memref<98x256xf32, #tpu.memory_space<vmem>>, vector<1x256xf32>
    %64 = vector.broadcast %63 : vector<1x256xf32> to vector<2x256xf32>
    %65 = arith.mulf %62, %64 : vector<2x256xf32>
    %66 = arith.addf %61, %65 : vector<2x256xf32>
    %c45_i32 = arith.constant 45 : i32
    %67 = tpu.dynamic_rotate %31 by %c45_i32 dim 1 : vector<2x256xf32>, i32 -> vector<2x256xf32>
    %c6 = arith.constant 6 : index
    %c0_30 = arith.constant 0 : index
    %68 = vector.load %arg6[%c6, %c0_30] : memref<98x256xf32, #tpu.memory_space<vmem>>, vector<1x256xf32>
    %69 = vector.broadcast %68 : vector<1x256xf32> to vector<2x256xf32>
    %70 = arith.mulf %67, %69 : vector<2x256xf32>
    %71 = arith.addf %66, %70 : vector<2x256xf32>
    %c35_i32 = arith.constant 35 : i32
    %72 = tpu.dynamic_rotate %31 by %c35_i32 dim 1 : vector<2x256xf32>, i32 -> vector<2x256xf32>
    %c7 = arith.constant 7 : index
    %c0_31 = arith.constant 0 : index
    %73 = vector.load %arg6[%c7, %c0_31] : memref<98x256xf32, #tpu.memory_space<vmem>>, vector<1x256xf32>
    %74 = vector.broadcast %73 : vector<1x256xf32> to vector<2x256xf32>
    %75 = arith.mulf %72, %74 : vector<2x256xf32>
    %76 = arith.addf %34, %75 : vector<2x256xf32>
    %c34_i32 = arith.constant 34 : i32
    %77 = tpu.dynamic_rotate %31 by %c34_i32 dim 1 : vector<2x256xf32>, i32 -> vector<2x256xf32>
    %c8 = arith.constant 8 : index
    %c0_32 = arith.constant 0 : index
    %78 = vector.load %arg6[%c8, %c0_32] : memref<98x256xf32, #tpu.memory_space<vmem>>, vector<1x256xf32>
    %79 = vector.broadcast %78 : vector<1x256xf32> to vector<2x256xf32>
    %80 = arith.mulf %77, %79 : vector<2x256xf32>
    %81 = arith.addf %76, %80 : vector<2x256xf32>
    %c33_i32 = arith.constant 33 : i32
    %82 = tpu.dynamic_rotate %31 by %c33_i32 dim 1 : vector<2x256xf32>, i32 -> vector<2x256xf32>
    %c9 = arith.constant 9 : index
    %c0_33 = arith.constant 0 : index
    %83 = vector.load %arg6[%c9, %c0_33] : memref<98x256xf32, #tpu.memory_space<vmem>>, vector<1x256xf32>
    %84 = vector.broadcast %83 : vector<1x256xf32> to vector<2x256xf32>
    %85 = arith.mulf %82, %84 : vector<2x256xf32>
    %86 = arith.addf %81, %85 : vector<2x256xf32>
    %c32_i32 = arith.constant 32 : i32
    %87 = tpu.dynamic_rotate %31 by %c32_i32 dim 1 : vector<2x256xf32>, i32 -> vector<2x256xf32>
    %c10 = arith.constant 10 : index
    %c0_34 = arith.constant 0 : index
    %88 = vector.load %arg6[%c10, %c0_34] : memref<98x256xf32, #tpu.memory_space<vmem>>, vector<1x256xf32>
    %89 = vector.broadcast %88 : vector<1x256xf32> to vector<2x256xf32>
    %90 = arith.mulf %87, %89 : vector<2x256xf32>
    %91 = arith.addf %86, %90 : vector<2x256xf32>
    %c31_i32 = arith.constant 31 : i32
    %92 = tpu.dynamic_rotate %31 by %c31_i32 dim 1 : vector<2x256xf32>, i32 -> vector<2x256xf32>
    %c11 = arith.constant 11 : index
    %c0_35 = arith.constant 0 : index
    %93 = vector.load %arg6[%c11, %c0_35] : memref<98x256xf32, #tpu.memory_space<vmem>>, vector<1x256xf32>
    %94 = vector.broadcast %93 : vector<1x256xf32> to vector<2x256xf32>
    %95 = arith.mulf %92, %94 : vector<2x256xf32>
    %96 = arith.addf %91, %95 : vector<2x256xf32>
    %c30_i32 = arith.constant 30 : i32
    %97 = tpu.dynamic_rotate %31 by %c30_i32 dim 1 : vector<2x256xf32>, i32 -> vector<2x256xf32>
    %c12 = arith.constant 12 : index
    %c0_36 = arith.constant 0 : index
    %98 = vector.load %arg6[%c12, %c0_36] : memref<98x256xf32, #tpu.memory_space<vmem>>, vector<1x256xf32>
    %99 = vector.broadcast %98 : vector<1x256xf32> to vector<2x256xf32>
    %100 = arith.mulf %97, %99 : vector<2x256xf32>
    %101 = arith.addf %96, %100 : vector<2x256xf32>
    %c29_i32 = arith.constant 29 : i32
    %102 = tpu.dynamic_rotate %31 by %c29_i32 dim 1 : vector<2x256xf32>, i32 -> vector<2x256xf32>
    %c13 = arith.constant 13 : index
    %c0_37 = arith.constant 0 : index
    %103 = vector.load %arg6[%c13, %c0_37] : memref<98x256xf32, #tpu.memory_space<vmem>>, vector<1x256xf32>
    %104 = vector.broadcast %103 : vector<1x256xf32> to vector<2x256xf32>
    %105 = arith.mulf %102, %104 : vector<2x256xf32>
    %106 = arith.addf %101, %105 : vector<2x256xf32>
    %c19_i32 = arith.constant 19 : i32
    %107 = tpu.dynamic_rotate %31 by %c19_i32 dim 1 : vector<2x256xf32>, i32 -> vector<2x256xf32>
    %c14 = arith.constant 14 : index
    %c0_38 = arith.constant 0 : index
    %108 = vector.load %arg6[%c14, %c0_38] : memref<98x256xf32, #tpu.memory_space<vmem>>, vector<1x256xf32>
    %109 = vector.broadcast %108 : vector<1x256xf32> to vector<2x256xf32>
    %110 = arith.mulf %107, %109 : vector<2x256xf32>
    %111 = arith.addf %71, %110 : vector<2x256xf32>
    %c18_i32 = arith.constant 18 : i32
    %112 = tpu.dynamic_rotate %31 by %c18_i32 dim 1 : vector<2x256xf32>, i32 -> vector<2x256xf32>
    %c15 = arith.constant 15 : index
    %c0_39 = arith.constant 0 : index
    %113 = vector.load %arg6[%c15, %c0_39] : memref<98x256xf32, #tpu.memory_space<vmem>>, vector<1x256xf32>
    %114 = vector.broadcast %113 : vector<1x256xf32> to vector<2x256xf32>
    %115 = arith.mulf %112, %114 : vector<2x256xf32>
    %116 = arith.addf %111, %115 : vector<2x256xf32>
    %c17_i32 = arith.constant 17 : i32
    %117 = tpu.dynamic_rotate %31 by %c17_i32 dim 1 : vector<2x256xf32>, i32 -> vector<2x256xf32>
    %c16 = arith.constant 16 : index
    %c0_40 = arith.constant 0 : index
    %118 = vector.load %arg6[%c16, %c0_40] : memref<98x256xf32, #tpu.memory_space<vmem>>, vector<1x256xf32>
    %119 = vector.broadcast %118 : vector<1x256xf32> to vector<2x256xf32>
    %120 = arith.mulf %117, %119 : vector<2x256xf32>
    %121 = arith.addf %116, %120 : vector<2x256xf32>
    %c16_i32 = arith.constant 16 : i32
    %122 = tpu.dynamic_rotate %31 by %c16_i32 dim 1 : vector<2x256xf32>, i32 -> vector<2x256xf32>
    %c17 = arith.constant 17 : index
    %c0_41 = arith.constant 0 : index
    %123 = vector.load %arg6[%c17, %c0_41] : memref<98x256xf32, #tpu.memory_space<vmem>>, vector<1x256xf32>
    %124 = vector.broadcast %123 : vector<1x256xf32> to vector<2x256xf32>
    %125 = arith.mulf %122, %124 : vector<2x256xf32>
    %126 = arith.addf %121, %125 : vector<2x256xf32>
    %c15_i32 = arith.constant 15 : i32
    %127 = tpu.dynamic_rotate %31 by %c15_i32 dim 1 : vector<2x256xf32>, i32 -> vector<2x256xf32>
    %c18 = arith.constant 18 : index
    %c0_42 = arith.constant 0 : index
    %128 = vector.load %arg6[%c18, %c0_42] : memref<98x256xf32, #tpu.memory_space<vmem>>, vector<1x256xf32>
    %129 = vector.broadcast %128 : vector<1x256xf32> to vector<2x256xf32>
    %130 = arith.mulf %127, %129 : vector<2x256xf32>
    %131 = arith.addf %126, %130 : vector<2x256xf32>
    %c14_i32 = arith.constant 14 : i32
    %132 = tpu.dynamic_rotate %31 by %c14_i32 dim 1 : vector<2x256xf32>, i32 -> vector<2x256xf32>
    %c19 = arith.constant 19 : index
    %c0_43 = arith.constant 0 : index
    %133 = vector.load %arg6[%c19, %c0_43] : memref<98x256xf32, #tpu.memory_space<vmem>>, vector<1x256xf32>
    %134 = vector.broadcast %133 : vector<1x256xf32> to vector<2x256xf32>
    %135 = arith.mulf %132, %134 : vector<2x256xf32>
    %136 = arith.addf %131, %135 : vector<2x256xf32>
    %c13_i32 = arith.constant 13 : i32
    %137 = tpu.dynamic_rotate %31 by %c13_i32 dim 1 : vector<2x256xf32>, i32 -> vector<2x256xf32>
    %c20 = arith.constant 20 : index
    %c0_44 = arith.constant 0 : index
    %138 = vector.load %arg6[%c20, %c0_44] : memref<98x256xf32, #tpu.memory_space<vmem>>, vector<1x256xf32>
    %139 = vector.broadcast %138 : vector<1x256xf32> to vector<2x256xf32>
    %140 = arith.mulf %137, %139 : vector<2x256xf32>
    %141 = arith.addf %136, %140 : vector<2x256xf32>
    %c3_i32 = arith.constant 3 : i32
    %142 = tpu.dynamic_rotate %31 by %c3_i32 dim 1 : vector<2x256xf32>, i32 -> vector<2x256xf32>
    %c21 = arith.constant 21 : index
    %c0_45 = arith.constant 0 : index
    %143 = vector.load %arg6[%c21, %c0_45] : memref<98x256xf32, #tpu.memory_space<vmem>>, vector<1x256xf32>
    %144 = vector.broadcast %143 : vector<1x256xf32> to vector<2x256xf32>
    %145 = arith.mulf %142, %144 : vector<2x256xf32>
    %146 = arith.addf %106, %145 : vector<2x256xf32>
    %c2_i32 = arith.constant 2 : i32
    %147 = tpu.dynamic_rotate %31 by %c2_i32 dim 1 : vector<2x256xf32>, i32 -> vector<2x256xf32>
    %c22 = arith.constant 22 : index
    %c0_46 = arith.constant 0 : index
    %148 = vector.load %arg6[%c22, %c0_46] : memref<98x256xf32, #tpu.memory_space<vmem>>, vector<1x256xf32>
    %149 = vector.broadcast %148 : vector<1x256xf32> to vector<2x256xf32>
    %150 = arith.mulf %147, %149 : vector<2x256xf32>
    %151 = arith.addf %146, %150 : vector<2x256xf32>
    %c1_i32 = arith.constant 1 : i32
    %152 = tpu.dynamic_rotate %31 by %c1_i32 dim 1 : vector<2x256xf32>, i32 -> vector<2x256xf32>
    %c23 = arith.constant 23 : index
    %c0_47 = arith.constant 0 : index
    %153 = vector.load %arg6[%c23, %c0_47] : memref<98x256xf32, #tpu.memory_space<vmem>>, vector<1x256xf32>
    %154 = vector.broadcast %153 : vector<1x256xf32> to vector<2x256xf32>
    %155 = arith.mulf %152, %154 : vector<2x256xf32>
    %156 = arith.addf %151, %155 : vector<2x256xf32>
    %c24 = arith.constant 24 : index
    %c0_48 = arith.constant 0 : index
    %157 = vector.load %arg6[%c24, %c0_48] : memref<98x256xf32, #tpu.memory_space<vmem>>, vector<1x256xf32>
    %158 = vector.broadcast %157 : vector<1x256xf32> to vector<2x256xf32>
    %159 = arith.mulf %31, %158 : vector<2x256xf32>
    %160 = arith.addf %156, %159 : vector<2x256xf32>
    %c255_i32 = arith.constant 255 : i32
    %161 = tpu.dynamic_rotate %31 by %c255_i32 dim 1 : vector<2x256xf32>, i32 -> vector<2x256xf32>
    %c25 = arith.constant 25 : index
    %c0_49 = arith.constant 0 : index
    %162 = vector.load %arg6[%c25, %c0_49] : memref<98x256xf32, #tpu.memory_space<vmem>>, vector<1x256xf32>
    %163 = vector.broadcast %162 : vector<1x256xf32> to vector<2x256xf32>
    %164 = arith.mulf %161, %163 : vector<2x256xf32>
    %165 = arith.addf %160, %164 : vector<2x256xf32>
    %c254_i32 = arith.constant 254 : i32
    %166 = tpu.dynamic_rotate %31 by %c254_i32 dim 1 : vector<2x256xf32>, i32 -> vector<2x256xf32>
    %c26 = arith.constant 26 : index
    %c0_50 = arith.constant 0 : index
    %167 = vector.load %arg6[%c26, %c0_50] : memref<98x256xf32, #tpu.memory_space<vmem>>, vector<1x256xf32>
    %168 = vector.broadcast %167 : vector<1x256xf32> to vector<2x256xf32>
    %169 = arith.mulf %166, %168 : vector<2x256xf32>
    %170 = arith.addf %165, %169 : vector<2x256xf32>
    %c253_i32 = arith.constant 253 : i32
    %171 = tpu.dynamic_rotate %31 by %c253_i32 dim 1 : vector<2x256xf32>, i32 -> vector<2x256xf32>
    %c27 = arith.constant 27 : index
    %c0_51 = arith.constant 0 : index
    %172 = vector.load %arg6[%c27, %c0_51] : memref<98x256xf32, #tpu.memory_space<vmem>>, vector<1x256xf32>
    %173 = vector.broadcast %172 : vector<1x256xf32> to vector<2x256xf32>
    %174 = arith.mulf %171, %173 : vector<2x256xf32>
    %175 = arith.addf %170, %174 : vector<2x256xf32>
    %c243_i32 = arith.constant 243 : i32
    %176 = tpu.dynamic_rotate %31 by %c243_i32 dim 1 : vector<2x256xf32>, i32 -> vector<2x256xf32>
    %c28 = arith.constant 28 : index
    %c0_52 = arith.constant 0 : index
    %177 = vector.load %arg6[%c28, %c0_52] : memref<98x256xf32, #tpu.memory_space<vmem>>, vector<1x256xf32>
    %178 = vector.broadcast %177 : vector<1x256xf32> to vector<2x256xf32>
    %179 = arith.mulf %176, %178 : vector<2x256xf32>
    %180 = arith.addf %141, %179 : vector<2x256xf32>
    %c242_i32 = arith.constant 242 : i32
    %181 = tpu.dynamic_rotate %31 by %c242_i32 dim 1 : vector<2x256xf32>, i32 -> vector<2x256xf32>
    %c29 = arith.constant 29 : index
    %c0_53 = arith.constant 0 : index
    %182 = vector.load %arg6[%c29, %c0_53] : memref<98x256xf32, #tpu.memory_space<vmem>>, vector<1x256xf32>
    %183 = vector.broadcast %182 : vector<1x256xf32> to vector<2x256xf32>
    %184 = arith.mulf %181, %183 : vector<2x256xf32>
    %185 = arith.addf %180, %184 : vector<2x256xf32>
    %c241_i32 = arith.constant 241 : i32
    %186 = tpu.dynamic_rotate %31 by %c241_i32 dim 1 : vector<2x256xf32>, i32 -> vector<2x256xf32>
    %c30 = arith.constant 30 : index
    %c0_54 = arith.constant 0 : index
    %187 = vector.load %arg6[%c30, %c0_54] : memref<98x256xf32, #tpu.memory_space<vmem>>, vector<1x256xf32>
    %188 = vector.broadcast %187 : vector<1x256xf32> to vector<2x256xf32>
    %189 = arith.mulf %186, %188 : vector<2x256xf32>
    %190 = arith.addf %185, %189 : vector<2x256xf32>
    %c240_i32 = arith.constant 240 : i32
    %191 = tpu.dynamic_rotate %31 by %c240_i32 dim 1 : vector<2x256xf32>, i32 -> vector<2x256xf32>
    %c31 = arith.constant 31 : index
    %c0_55 = arith.constant 0 : index
    %192 = vector.load %arg6[%c31, %c0_55] : memref<98x256xf32, #tpu.memory_space<vmem>>, vector<1x256xf32>
    %193 = vector.broadcast %192 : vector<1x256xf32> to vector<2x256xf32>
    %194 = arith.mulf %191, %193 : vector<2x256xf32>
    %195 = arith.addf %190, %194 : vector<2x256xf32>
    %c239_i32 = arith.constant 239 : i32
    %196 = tpu.dynamic_rotate %31 by %c239_i32 dim 1 : vector<2x256xf32>, i32 -> vector<2x256xf32>
    %c32 = arith.constant 32 : index
    %c0_56 = arith.constant 0 : index
    %197 = vector.load %arg6[%c32, %c0_56] : memref<98x256xf32, #tpu.memory_space<vmem>>, vector<1x256xf32>
    %198 = vector.broadcast %197 : vector<1x256xf32> to vector<2x256xf32>
    %199 = arith.mulf %196, %198 : vector<2x256xf32>
    %200 = arith.addf %195, %199 : vector<2x256xf32>
    %c238_i32 = arith.constant 238 : i32
    %201 = tpu.dynamic_rotate %31 by %c238_i32 dim 1 : vector<2x256xf32>, i32 -> vector<2x256xf32>
    %c33 = arith.constant 33 : index
    %c0_57 = arith.constant 0 : index
    %202 = vector.load %arg6[%c33, %c0_57] : memref<98x256xf32, #tpu.memory_space<vmem>>, vector<1x256xf32>
    %203 = vector.broadcast %202 : vector<1x256xf32> to vector<2x256xf32>
    %204 = arith.mulf %201, %203 : vector<2x256xf32>
    %205 = arith.addf %200, %204 : vector<2x256xf32>
    %c237_i32 = arith.constant 237 : i32
    %206 = tpu.dynamic_rotate %31 by %c237_i32 dim 1 : vector<2x256xf32>, i32 -> vector<2x256xf32>
    %c34 = arith.constant 34 : index
    %c0_58 = arith.constant 0 : index
    %207 = vector.load %arg6[%c34, %c0_58] : memref<98x256xf32, #tpu.memory_space<vmem>>, vector<1x256xf32>
    %208 = vector.broadcast %207 : vector<1x256xf32> to vector<2x256xf32>
    %209 = arith.mulf %206, %208 : vector<2x256xf32>
    %210 = arith.addf %205, %209 : vector<2x256xf32>
    %c227_i32 = arith.constant 227 : i32
    %211 = tpu.dynamic_rotate %31 by %c227_i32 dim 1 : vector<2x256xf32>, i32 -> vector<2x256xf32>
    %c35 = arith.constant 35 : index
    %c0_59 = arith.constant 0 : index
    %212 = vector.load %arg6[%c35, %c0_59] : memref<98x256xf32, #tpu.memory_space<vmem>>, vector<1x256xf32>
    %213 = vector.broadcast %212 : vector<1x256xf32> to vector<2x256xf32>
    %214 = arith.mulf %211, %213 : vector<2x256xf32>
    %215 = arith.addf %175, %214 : vector<2x256xf32>
    %c226_i32 = arith.constant 226 : i32
    %216 = tpu.dynamic_rotate %31 by %c226_i32 dim 1 : vector<2x256xf32>, i32 -> vector<2x256xf32>
    %c36 = arith.constant 36 : index
    %c0_60 = arith.constant 0 : index
    %217 = vector.load %arg6[%c36, %c0_60] : memref<98x256xf32, #tpu.memory_space<vmem>>, vector<1x256xf32>
    %218 = vector.broadcast %217 : vector<1x256xf32> to vector<2x256xf32>
    %219 = arith.mulf %216, %218 : vector<2x256xf32>
    %220 = arith.addf %215, %219 : vector<2x256xf32>
    %c225_i32 = arith.constant 225 : i32
    %221 = tpu.dynamic_rotate %31 by %c225_i32 dim 1 : vector<2x256xf32>, i32 -> vector<2x256xf32>
    %c37 = arith.constant 37 : index
    %c0_61 = arith.constant 0 : index
    %222 = vector.load %arg6[%c37, %c0_61] : memref<98x256xf32, #tpu.memory_space<vmem>>, vector<1x256xf32>
    %223 = vector.broadcast %222 : vector<1x256xf32> to vector<2x256xf32>
    %224 = arith.mulf %221, %223 : vector<2x256xf32>
    %225 = arith.addf %220, %224 : vector<2x256xf32>
    %c224_i32 = arith.constant 224 : i32
    %226 = tpu.dynamic_rotate %31 by %c224_i32 dim 1 : vector<2x256xf32>, i32 -> vector<2x256xf32>
    %c38 = arith.constant 38 : index
    %c0_62 = arith.constant 0 : index
    %227 = vector.load %arg6[%c38, %c0_62] : memref<98x256xf32, #tpu.memory_space<vmem>>, vector<1x256xf32>
    %228 = vector.broadcast %227 : vector<1x256xf32> to vector<2x256xf32>
    %229 = arith.mulf %226, %228 : vector<2x256xf32>
    %230 = arith.addf %225, %229 : vector<2x256xf32>
    %c223_i32 = arith.constant 223 : i32
    %231 = tpu.dynamic_rotate %31 by %c223_i32 dim 1 : vector<2x256xf32>, i32 -> vector<2x256xf32>
    %c39 = arith.constant 39 : index
    %c0_63 = arith.constant 0 : index
    %232 = vector.load %arg6[%c39, %c0_63] : memref<98x256xf32, #tpu.memory_space<vmem>>, vector<1x256xf32>
    %233 = vector.broadcast %232 : vector<1x256xf32> to vector<2x256xf32>
    %234 = arith.mulf %231, %233 : vector<2x256xf32>
    %235 = arith.addf %230, %234 : vector<2x256xf32>
    %c222_i32 = arith.constant 222 : i32
    %236 = tpu.dynamic_rotate %31 by %c222_i32 dim 1 : vector<2x256xf32>, i32 -> vector<2x256xf32>
    %c40 = arith.constant 40 : index
    %c0_64 = arith.constant 0 : index
    %237 = vector.load %arg6[%c40, %c0_64] : memref<98x256xf32, #tpu.memory_space<vmem>>, vector<1x256xf32>
    %238 = vector.broadcast %237 : vector<1x256xf32> to vector<2x256xf32>
    %239 = arith.mulf %236, %238 : vector<2x256xf32>
    %240 = arith.addf %235, %239 : vector<2x256xf32>
    %c221_i32 = arith.constant 221 : i32
    %241 = tpu.dynamic_rotate %31 by %c221_i32 dim 1 : vector<2x256xf32>, i32 -> vector<2x256xf32>
    %c41 = arith.constant 41 : index
    %c0_65 = arith.constant 0 : index
    %242 = vector.load %arg6[%c41, %c0_65] : memref<98x256xf32, #tpu.memory_space<vmem>>, vector<1x256xf32>
    %243 = vector.broadcast %242 : vector<1x256xf32> to vector<2x256xf32>
    %244 = arith.mulf %241, %243 : vector<2x256xf32>
    %245 = arith.addf %240, %244 : vector<2x256xf32>
    %c211_i32 = arith.constant 211 : i32
    %246 = tpu.dynamic_rotate %31 by %c211_i32 dim 1 : vector<2x256xf32>, i32 -> vector<2x256xf32>
    %c42 = arith.constant 42 : index
    %c0_66 = arith.constant 0 : index
    %247 = vector.load %arg6[%c42, %c0_66] : memref<98x256xf32, #tpu.memory_space<vmem>>, vector<1x256xf32>
    %248 = vector.broadcast %247 : vector<1x256xf32> to vector<2x256xf32>
    %249 = arith.mulf %246, %248 : vector<2x256xf32>
    %250 = arith.addf %210, %249 : vector<2x256xf32>
    %c210_i32 = arith.constant 210 : i32
    %251 = tpu.dynamic_rotate %31 by %c210_i32 dim 1 : vector<2x256xf32>, i32 -> vector<2x256xf32>
    %c43 = arith.constant 43 : index
    %c0_67 = arith.constant 0 : index
    %252 = vector.load %arg6[%c43, %c0_67] : memref<98x256xf32, #tpu.memory_space<vmem>>, vector<1x256xf32>
    %253 = vector.broadcast %252 : vector<1x256xf32> to vector<2x256xf32>
    %254 = arith.mulf %251, %253 : vector<2x256xf32>
    %255 = arith.addf %250, %254 : vector<2x256xf32>
    %c209_i32 = arith.constant 209 : i32
    %256 = tpu.dynamic_rotate %31 by %c209_i32 dim 1 : vector<2x256xf32>, i32 -> vector<2x256xf32>
    %c44 = arith.constant 44 : index
    %c0_68 = arith.constant 0 : index
    %257 = vector.load %arg6[%c44, %c0_68] : memref<98x256xf32, #tpu.memory_space<vmem>>, vector<1x256xf32>
    %258 = vector.broadcast %257 : vector<1x256xf32> to vector<2x256xf32>
    %259 = arith.mulf %256, %258 : vector<2x256xf32>
    %260 = arith.addf %255, %259 : vector<2x256xf32>
    %c208_i32 = arith.constant 208 : i32
    %261 = tpu.dynamic_rotate %31 by %c208_i32 dim 1 : vector<2x256xf32>, i32 -> vector<2x256xf32>
    %c45 = arith.constant 45 : index
    %c0_69 = arith.constant 0 : index
    %262 = vector.load %arg6[%c45, %c0_69] : memref<98x256xf32, #tpu.memory_space<vmem>>, vector<1x256xf32>
    %263 = vector.broadcast %262 : vector<1x256xf32> to vector<2x256xf32>
    %264 = arith.mulf %261, %263 : vector<2x256xf32>
    %265 = arith.addf %260, %264 : vector<2x256xf32>
    %c207_i32 = arith.constant 207 : i32
    %266 = tpu.dynamic_rotate %31 by %c207_i32 dim 1 : vector<2x256xf32>, i32 -> vector<2x256xf32>
    %c46 = arith.constant 46 : index
    %c0_70 = arith.constant 0 : index
    %267 = vector.load %arg6[%c46, %c0_70] : memref<98x256xf32, #tpu.memory_space<vmem>>, vector<1x256xf32>
    %268 = vector.broadcast %267 : vector<1x256xf32> to vector<2x256xf32>
    %269 = arith.mulf %266, %268 : vector<2x256xf32>
    %270 = arith.addf %265, %269 : vector<2x256xf32>
    %c206_i32 = arith.constant 206 : i32
    %271 = tpu.dynamic_rotate %31 by %c206_i32 dim 1 : vector<2x256xf32>, i32 -> vector<2x256xf32>
    %c47 = arith.constant 47 : index
    %c0_71 = arith.constant 0 : index
    %272 = vector.load %arg6[%c47, %c0_71] : memref<98x256xf32, #tpu.memory_space<vmem>>, vector<1x256xf32>
    %273 = vector.broadcast %272 : vector<1x256xf32> to vector<2x256xf32>
    %274 = arith.mulf %271, %273 : vector<2x256xf32>
    %275 = arith.addf %270, %274 : vector<2x256xf32>
    %c205_i32 = arith.constant 205 : i32
    %276 = tpu.dynamic_rotate %31 by %c205_i32 dim 1 : vector<2x256xf32>, i32 -> vector<2x256xf32>
    %c48 = arith.constant 48 : index
    %c0_72 = arith.constant 0 : index
    %277 = vector.load %arg6[%c48, %c0_72] : memref<98x256xf32, #tpu.memory_space<vmem>>, vector<1x256xf32>
    %278 = vector.broadcast %277 : vector<1x256xf32> to vector<2x256xf32>
    %279 = arith.mulf %276, %278 : vector<2x256xf32>
    %280 = arith.addf %275, %279 : vector<2x256xf32>
    %c51_i32_73 = arith.constant 51 : i32
    %281 = tpu.dynamic_rotate %32 by %c51_i32_73 dim 1 : vector<2x256xf32>, i32 -> vector<2x256xf32>
    %c49 = arith.constant 49 : index
    %c0_74 = arith.constant 0 : index
    %282 = vector.load %arg6[%c49, %c0_74] : memref<98x256xf32, #tpu.memory_space<vmem>>, vector<1x256xf32>
    %283 = vector.broadcast %282 : vector<1x256xf32> to vector<2x256xf32>
    %284 = arith.mulf %281, %283 : vector<2x256xf32>
    %285 = arith.addf %35, %284 : vector<2x256xf32>
    %c50_i32_75 = arith.constant 50 : i32
    %286 = tpu.dynamic_rotate %32 by %c50_i32_75 dim 1 : vector<2x256xf32>, i32 -> vector<2x256xf32>
    %c50 = arith.constant 50 : index
    %c0_76 = arith.constant 0 : index
    %287 = vector.load %arg6[%c50, %c0_76] : memref<98x256xf32, #tpu.memory_space<vmem>>, vector<1x256xf32>
    %288 = vector.broadcast %287 : vector<1x256xf32> to vector<2x256xf32>
    %289 = arith.mulf %286, %288 : vector<2x256xf32>
    %290 = arith.addf %285, %289 : vector<2x256xf32>
    %c49_i32_77 = arith.constant 49 : i32
    %291 = tpu.dynamic_rotate %32 by %c49_i32_77 dim 1 : vector<2x256xf32>, i32 -> vector<2x256xf32>
    %c51 = arith.constant 51 : index
    %c0_78 = arith.constant 0 : index
    %292 = vector.load %arg6[%c51, %c0_78] : memref<98x256xf32, #tpu.memory_space<vmem>>, vector<1x256xf32>
    %293 = vector.broadcast %292 : vector<1x256xf32> to vector<2x256xf32>
    %294 = arith.mulf %291, %293 : vector<2x256xf32>
    %295 = arith.addf %290, %294 : vector<2x256xf32>
    %c48_i32_79 = arith.constant 48 : i32
    %296 = tpu.dynamic_rotate %32 by %c48_i32_79 dim 1 : vector<2x256xf32>, i32 -> vector<2x256xf32>
    %c52 = arith.constant 52 : index
    %c0_80 = arith.constant 0 : index
    %297 = vector.load %arg6[%c52, %c0_80] : memref<98x256xf32, #tpu.memory_space<vmem>>, vector<1x256xf32>
    %298 = vector.broadcast %297 : vector<1x256xf32> to vector<2x256xf32>
    %299 = arith.mulf %296, %298 : vector<2x256xf32>
    %300 = arith.addf %295, %299 : vector<2x256xf32>
    %c47_i32_81 = arith.constant 47 : i32
    %301 = tpu.dynamic_rotate %32 by %c47_i32_81 dim 1 : vector<2x256xf32>, i32 -> vector<2x256xf32>
    %c53 = arith.constant 53 : index
    %c0_82 = arith.constant 0 : index
    %302 = vector.load %arg6[%c53, %c0_82] : memref<98x256xf32, #tpu.memory_space<vmem>>, vector<1x256xf32>
    %303 = vector.broadcast %302 : vector<1x256xf32> to vector<2x256xf32>
    %304 = arith.mulf %301, %303 : vector<2x256xf32>
    %305 = arith.addf %300, %304 : vector<2x256xf32>
    %c46_i32_83 = arith.constant 46 : i32
    %306 = tpu.dynamic_rotate %32 by %c46_i32_83 dim 1 : vector<2x256xf32>, i32 -> vector<2x256xf32>
    %c54 = arith.constant 54 : index
    %c0_84 = arith.constant 0 : index
    %307 = vector.load %arg6[%c54, %c0_84] : memref<98x256xf32, #tpu.memory_space<vmem>>, vector<1x256xf32>
    %308 = vector.broadcast %307 : vector<1x256xf32> to vector<2x256xf32>
    %309 = arith.mulf %306, %308 : vector<2x256xf32>
    %310 = arith.addf %305, %309 : vector<2x256xf32>
    %c45_i32_85 = arith.constant 45 : i32
    %311 = tpu.dynamic_rotate %32 by %c45_i32_85 dim 1 : vector<2x256xf32>, i32 -> vector<2x256xf32>
    %c55 = arith.constant 55 : index
    %c0_86 = arith.constant 0 : index
    %312 = vector.load %arg6[%c55, %c0_86] : memref<98x256xf32, #tpu.memory_space<vmem>>, vector<1x256xf32>
    %313 = vector.broadcast %312 : vector<1x256xf32> to vector<2x256xf32>
    %314 = arith.mulf %311, %313 : vector<2x256xf32>
    %315 = arith.addf %310, %314 : vector<2x256xf32>
    %c35_i32_87 = arith.constant 35 : i32
    %316 = tpu.dynamic_rotate %32 by %c35_i32_87 dim 1 : vector<2x256xf32>, i32 -> vector<2x256xf32>
    %c56 = arith.constant 56 : index
    %c0_88 = arith.constant 0 : index
    %317 = vector.load %arg6[%c56, %c0_88] : memref<98x256xf32, #tpu.memory_space<vmem>>, vector<1x256xf32>
    %318 = vector.broadcast %317 : vector<1x256xf32> to vector<2x256xf32>
    %319 = arith.mulf %316, %318 : vector<2x256xf32>
    %320 = arith.addf %36, %319 : vector<2x256xf32>
    %c34_i32_89 = arith.constant 34 : i32
    %321 = tpu.dynamic_rotate %32 by %c34_i32_89 dim 1 : vector<2x256xf32>, i32 -> vector<2x256xf32>
    %c57 = arith.constant 57 : index
    %c0_90 = arith.constant 0 : index
    %322 = vector.load %arg6[%c57, %c0_90] : memref<98x256xf32, #tpu.memory_space<vmem>>, vector<1x256xf32>
    %323 = vector.broadcast %322 : vector<1x256xf32> to vector<2x256xf32>
    %324 = arith.mulf %321, %323 : vector<2x256xf32>
    %325 = arith.addf %320, %324 : vector<2x256xf32>
    %c33_i32_91 = arith.constant 33 : i32
    %326 = tpu.dynamic_rotate %32 by %c33_i32_91 dim 1 : vector<2x256xf32>, i32 -> vector<2x256xf32>
    %c58 = arith.constant 58 : index
    %c0_92 = arith.constant 0 : index
    %327 = vector.load %arg6[%c58, %c0_92] : memref<98x256xf32, #tpu.memory_space<vmem>>, vector<1x256xf32>
    %328 = vector.broadcast %327 : vector<1x256xf32> to vector<2x256xf32>
    %329 = arith.mulf %326, %328 : vector<2x256xf32>
    %330 = arith.addf %325, %329 : vector<2x256xf32>
    %c32_i32_93 = arith.constant 32 : i32
    %331 = tpu.dynamic_rotate %32 by %c32_i32_93 dim 1 : vector<2x256xf32>, i32 -> vector<2x256xf32>
    %c59 = arith.constant 59 : index
    %c0_94 = arith.constant 0 : index
    %332 = vector.load %arg6[%c59, %c0_94] : memref<98x256xf32, #tpu.memory_space<vmem>>, vector<1x256xf32>
    %333 = vector.broadcast %332 : vector<1x256xf32> to vector<2x256xf32>
    %334 = arith.mulf %331, %333 : vector<2x256xf32>
    %335 = arith.addf %330, %334 : vector<2x256xf32>
    %c31_i32_95 = arith.constant 31 : i32
    %336 = tpu.dynamic_rotate %32 by %c31_i32_95 dim 1 : vector<2x256xf32>, i32 -> vector<2x256xf32>
    %c60 = arith.constant 60 : index
    %c0_96 = arith.constant 0 : index
    %337 = vector.load %arg6[%c60, %c0_96] : memref<98x256xf32, #tpu.memory_space<vmem>>, vector<1x256xf32>
    %338 = vector.broadcast %337 : vector<1x256xf32> to vector<2x256xf32>
    %339 = arith.mulf %336, %338 : vector<2x256xf32>
    %340 = arith.addf %335, %339 : vector<2x256xf32>
    %c30_i32_97 = arith.constant 30 : i32
    %341 = tpu.dynamic_rotate %32 by %c30_i32_97 dim 1 : vector<2x256xf32>, i32 -> vector<2x256xf32>
    %c61 = arith.constant 61 : index
    %c0_98 = arith.constant 0 : index
    %342 = vector.load %arg6[%c61, %c0_98] : memref<98x256xf32, #tpu.memory_space<vmem>>, vector<1x256xf32>
    %343 = vector.broadcast %342 : vector<1x256xf32> to vector<2x256xf32>
    %344 = arith.mulf %341, %343 : vector<2x256xf32>
    %345 = arith.addf %340, %344 : vector<2x256xf32>
    %c29_i32_99 = arith.constant 29 : i32
    %346 = tpu.dynamic_rotate %32 by %c29_i32_99 dim 1 : vector<2x256xf32>, i32 -> vector<2x256xf32>
    %c62 = arith.constant 62 : index
    %c0_100 = arith.constant 0 : index
    %347 = vector.load %arg6[%c62, %c0_100] : memref<98x256xf32, #tpu.memory_space<vmem>>, vector<1x256xf32>
    %348 = vector.broadcast %347 : vector<1x256xf32> to vector<2x256xf32>
    %349 = arith.mulf %346, %348 : vector<2x256xf32>
    %350 = arith.addf %345, %349 : vector<2x256xf32>
    %c19_i32_101 = arith.constant 19 : i32
    %351 = tpu.dynamic_rotate %32 by %c19_i32_101 dim 1 : vector<2x256xf32>, i32 -> vector<2x256xf32>
    %c63 = arith.constant 63 : index
    %c0_102 = arith.constant 0 : index
    %352 = vector.load %arg6[%c63, %c0_102] : memref<98x256xf32, #tpu.memory_space<vmem>>, vector<1x256xf32>
    %353 = vector.broadcast %352 : vector<1x256xf32> to vector<2x256xf32>
    %354 = arith.mulf %351, %353 : vector<2x256xf32>
    %355 = arith.addf %315, %354 : vector<2x256xf32>
    %c18_i32_103 = arith.constant 18 : i32
    %356 = tpu.dynamic_rotate %32 by %c18_i32_103 dim 1 : vector<2x256xf32>, i32 -> vector<2x256xf32>
    %c64 = arith.constant 64 : index
    %c0_104 = arith.constant 0 : index
    %357 = vector.load %arg6[%c64, %c0_104] : memref<98x256xf32, #tpu.memory_space<vmem>>, vector<1x256xf32>
    %358 = vector.broadcast %357 : vector<1x256xf32> to vector<2x256xf32>
    %359 = arith.mulf %356, %358 : vector<2x256xf32>
    %360 = arith.addf %355, %359 : vector<2x256xf32>
    %c17_i32_105 = arith.constant 17 : i32
    %361 = tpu.dynamic_rotate %32 by %c17_i32_105 dim 1 : vector<2x256xf32>, i32 -> vector<2x256xf32>
    %c65 = arith.constant 65 : index
    %c0_106 = arith.constant 0 : index
    %362 = vector.load %arg6[%c65, %c0_106] : memref<98x256xf32, #tpu.memory_space<vmem>>, vector<1x256xf32>
    %363 = vector.broadcast %362 : vector<1x256xf32> to vector<2x256xf32>
    %364 = arith.mulf %361, %363 : vector<2x256xf32>
    %365 = arith.addf %360, %364 : vector<2x256xf32>
    %c16_i32_107 = arith.constant 16 : i32
    %366 = tpu.dynamic_rotate %32 by %c16_i32_107 dim 1 : vector<2x256xf32>, i32 -> vector<2x256xf32>
    %c66 = arith.constant 66 : index
    %c0_108 = arith.constant 0 : index
    %367 = vector.load %arg6[%c66, %c0_108] : memref<98x256xf32, #tpu.memory_space<vmem>>, vector<1x256xf32>
    %368 = vector.broadcast %367 : vector<1x256xf32> to vector<2x256xf32>
    %369 = arith.mulf %366, %368 : vector<2x256xf32>
    %370 = arith.addf %365, %369 : vector<2x256xf32>
    %c15_i32_109 = arith.constant 15 : i32
    %371 = tpu.dynamic_rotate %32 by %c15_i32_109 dim 1 : vector<2x256xf32>, i32 -> vector<2x256xf32>
    %c67 = arith.constant 67 : index
    %c0_110 = arith.constant 0 : index
    %372 = vector.load %arg6[%c67, %c0_110] : memref<98x256xf32, #tpu.memory_space<vmem>>, vector<1x256xf32>
    %373 = vector.broadcast %372 : vector<1x256xf32> to vector<2x256xf32>
    %374 = arith.mulf %371, %373 : vector<2x256xf32>
    %375 = arith.addf %370, %374 : vector<2x256xf32>
    %c14_i32_111 = arith.constant 14 : i32
    %376 = tpu.dynamic_rotate %32 by %c14_i32_111 dim 1 : vector<2x256xf32>, i32 -> vector<2x256xf32>
    %c68 = arith.constant 68 : index
    %c0_112 = arith.constant 0 : index
    %377 = vector.load %arg6[%c68, %c0_112] : memref<98x256xf32, #tpu.memory_space<vmem>>, vector<1x256xf32>
    %378 = vector.broadcast %377 : vector<1x256xf32> to vector<2x256xf32>
    %379 = arith.mulf %376, %378 : vector<2x256xf32>
    %380 = arith.addf %375, %379 : vector<2x256xf32>
    %c13_i32_113 = arith.constant 13 : i32
    %381 = tpu.dynamic_rotate %32 by %c13_i32_113 dim 1 : vector<2x256xf32>, i32 -> vector<2x256xf32>
    %c69 = arith.constant 69 : index
    %c0_114 = arith.constant 0 : index
    %382 = vector.load %arg6[%c69, %c0_114] : memref<98x256xf32, #tpu.memory_space<vmem>>, vector<1x256xf32>
    %383 = vector.broadcast %382 : vector<1x256xf32> to vector<2x256xf32>
    %384 = arith.mulf %381, %383 : vector<2x256xf32>
    %385 = arith.addf %380, %384 : vector<2x256xf32>
    %c3_i32_115 = arith.constant 3 : i32
    %386 = tpu.dynamic_rotate %32 by %c3_i32_115 dim 1 : vector<2x256xf32>, i32 -> vector<2x256xf32>
    %c70 = arith.constant 70 : index
    %c0_116 = arith.constant 0 : index
    %387 = vector.load %arg6[%c70, %c0_116] : memref<98x256xf32, #tpu.memory_space<vmem>>, vector<1x256xf32>
    %388 = vector.broadcast %387 : vector<1x256xf32> to vector<2x256xf32>
    %389 = arith.mulf %386, %388 : vector<2x256xf32>
    %390 = arith.addf %350, %389 : vector<2x256xf32>
    %c2_i32_117 = arith.constant 2 : i32
    %391 = tpu.dynamic_rotate %32 by %c2_i32_117 dim 1 : vector<2x256xf32>, i32 -> vector<2x256xf32>
    %c71 = arith.constant 71 : index
    %c0_118 = arith.constant 0 : index
    %392 = vector.load %arg6[%c71, %c0_118] : memref<98x256xf32, #tpu.memory_space<vmem>>, vector<1x256xf32>
    %393 = vector.broadcast %392 : vector<1x256xf32> to vector<2x256xf32>
    %394 = arith.mulf %391, %393 : vector<2x256xf32>
    %395 = arith.addf %390, %394 : vector<2x256xf32>
    %c1_i32_119 = arith.constant 1 : i32
    %396 = tpu.dynamic_rotate %32 by %c1_i32_119 dim 1 : vector<2x256xf32>, i32 -> vector<2x256xf32>
    %c72 = arith.constant 72 : index
    %c0_120 = arith.constant 0 : index
    %397 = vector.load %arg6[%c72, %c0_120] : memref<98x256xf32, #tpu.memory_space<vmem>>, vector<1x256xf32>
    %398 = vector.broadcast %397 : vector<1x256xf32> to vector<2x256xf32>
    %399 = arith.mulf %396, %398 : vector<2x256xf32>
    %400 = arith.addf %395, %399 : vector<2x256xf32>
    %c73 = arith.constant 73 : index
    %c0_121 = arith.constant 0 : index
    %401 = vector.load %arg6[%c73, %c0_121] : memref<98x256xf32, #tpu.memory_space<vmem>>, vector<1x256xf32>
    %402 = vector.broadcast %401 : vector<1x256xf32> to vector<2x256xf32>
    %403 = arith.mulf %32, %402 : vector<2x256xf32>
    %404 = arith.addf %400, %403 : vector<2x256xf32>
    %c255_i32_122 = arith.constant 255 : i32
    %405 = tpu.dynamic_rotate %32 by %c255_i32_122 dim 1 : vector<2x256xf32>, i32 -> vector<2x256xf32>
    %c74 = arith.constant 74 : index
    %c0_123 = arith.constant 0 : index
    %406 = vector.load %arg6[%c74, %c0_123] : memref<98x256xf32, #tpu.memory_space<vmem>>, vector<1x256xf32>
    %407 = vector.broadcast %406 : vector<1x256xf32> to vector<2x256xf32>
    %408 = arith.mulf %405, %407 : vector<2x256xf32>
    %409 = arith.addf %404, %408 : vector<2x256xf32>
    %c254_i32_124 = arith.constant 254 : i32
    %410 = tpu.dynamic_rotate %32 by %c254_i32_124 dim 1 : vector<2x256xf32>, i32 -> vector<2x256xf32>
    %c75 = arith.constant 75 : index
    %c0_125 = arith.constant 0 : index
    %411 = vector.load %arg6[%c75, %c0_125] : memref<98x256xf32, #tpu.memory_space<vmem>>, vector<1x256xf32>
    %412 = vector.broadcast %411 : vector<1x256xf32> to vector<2x256xf32>
    %413 = arith.mulf %410, %412 : vector<2x256xf32>
    %414 = arith.addf %409, %413 : vector<2x256xf32>
    %c253_i32_126 = arith.constant 253 : i32
    %415 = tpu.dynamic_rotate %32 by %c253_i32_126 dim 1 : vector<2x256xf32>, i32 -> vector<2x256xf32>
    %c76 = arith.constant 76 : index
    %c0_127 = arith.constant 0 : index
    %416 = vector.load %arg6[%c76, %c0_127] : memref<98x256xf32, #tpu.memory_space<vmem>>, vector<1x256xf32>
    %417 = vector.broadcast %416 : vector<1x256xf32> to vector<2x256xf32>
    %418 = arith.mulf %415, %417 : vector<2x256xf32>
    %419 = arith.addf %414, %418 : vector<2x256xf32>
    %c243_i32_128 = arith.constant 243 : i32
    %420 = tpu.dynamic_rotate %32 by %c243_i32_128 dim 1 : vector<2x256xf32>, i32 -> vector<2x256xf32>
    %c77 = arith.constant 77 : index
    %c0_129 = arith.constant 0 : index
    %421 = vector.load %arg6[%c77, %c0_129] : memref<98x256xf32, #tpu.memory_space<vmem>>, vector<1x256xf32>
    %422 = vector.broadcast %421 : vector<1x256xf32> to vector<2x256xf32>
    %423 = arith.mulf %420, %422 : vector<2x256xf32>
    %424 = arith.addf %385, %423 : vector<2x256xf32>
    %c242_i32_130 = arith.constant 242 : i32
    %425 = tpu.dynamic_rotate %32 by %c242_i32_130 dim 1 : vector<2x256xf32>, i32 -> vector<2x256xf32>
    %c78 = arith.constant 78 : index
    %c0_131 = arith.constant 0 : index
    %426 = vector.load %arg6[%c78, %c0_131] : memref<98x256xf32, #tpu.memory_space<vmem>>, vector<1x256xf32>
    %427 = vector.broadcast %426 : vector<1x256xf32> to vector<2x256xf32>
    %428 = arith.mulf %425, %427 : vector<2x256xf32>
    %429 = arith.addf %424, %428 : vector<2x256xf32>
    %c241_i32_132 = arith.constant 241 : i32
    %430 = tpu.dynamic_rotate %32 by %c241_i32_132 dim 1 : vector<2x256xf32>, i32 -> vector<2x256xf32>
    %c79 = arith.constant 79 : index
    %c0_133 = arith.constant 0 : index
    %431 = vector.load %arg6[%c79, %c0_133] : memref<98x256xf32, #tpu.memory_space<vmem>>, vector<1x256xf32>
    %432 = vector.broadcast %431 : vector<1x256xf32> to vector<2x256xf32>
    %433 = arith.mulf %430, %432 : vector<2x256xf32>
    %434 = arith.addf %429, %433 : vector<2x256xf32>
    %c240_i32_134 = arith.constant 240 : i32
    %435 = tpu.dynamic_rotate %32 by %c240_i32_134 dim 1 : vector<2x256xf32>, i32 -> vector<2x256xf32>
    %c80 = arith.constant 80 : index
    %c0_135 = arith.constant 0 : index
    %436 = vector.load %arg6[%c80, %c0_135] : memref<98x256xf32, #tpu.memory_space<vmem>>, vector<1x256xf32>
    %437 = vector.broadcast %436 : vector<1x256xf32> to vector<2x256xf32>
    %438 = arith.mulf %435, %437 : vector<2x256xf32>
    %439 = arith.addf %434, %438 : vector<2x256xf32>
    %c239_i32_136 = arith.constant 239 : i32
    %440 = tpu.dynamic_rotate %32 by %c239_i32_136 dim 1 : vector<2x256xf32>, i32 -> vector<2x256xf32>
    %c81 = arith.constant 81 : index
    %c0_137 = arith.constant 0 : index
    %441 = vector.load %arg6[%c81, %c0_137] : memref<98x256xf32, #tpu.memory_space<vmem>>, vector<1x256xf32>
    %442 = vector.broadcast %441 : vector<1x256xf32> to vector<2x256xf32>
    %443 = arith.mulf %440, %442 : vector<2x256xf32>
    %444 = arith.addf %439, %443 : vector<2x256xf32>
    %c238_i32_138 = arith.constant 238 : i32
    %445 = tpu.dynamic_rotate %32 by %c238_i32_138 dim 1 : vector<2x256xf32>, i32 -> vector<2x256xf32>
    %c82 = arith.constant 82 : index
    %c0_139 = arith.constant 0 : index
    %446 = vector.load %arg6[%c82, %c0_139] : memref<98x256xf32, #tpu.memory_space<vmem>>, vector<1x256xf32>
    %447 = vector.broadcast %446 : vector<1x256xf32> to vector<2x256xf32>
    %448 = arith.mulf %445, %447 : vector<2x256xf32>
    %449 = arith.addf %444, %448 : vector<2x256xf32>
    %c237_i32_140 = arith.constant 237 : i32
    %450 = tpu.dynamic_rotate %32 by %c237_i32_140 dim 1 : vector<2x256xf32>, i32 -> vector<2x256xf32>
    %c83 = arith.constant 83 : index
    %c0_141 = arith.constant 0 : index
    %451 = vector.load %arg6[%c83, %c0_141] : memref<98x256xf32, #tpu.memory_space<vmem>>, vector<1x256xf32>
    %452 = vector.broadcast %451 : vector<1x256xf32> to vector<2x256xf32>
    %453 = arith.mulf %450, %452 : vector<2x256xf32>
    %454 = arith.addf %449, %453 : vector<2x256xf32>
    %c227_i32_142 = arith.constant 227 : i32
    %455 = tpu.dynamic_rotate %32 by %c227_i32_142 dim 1 : vector<2x256xf32>, i32 -> vector<2x256xf32>
    %c84 = arith.constant 84 : index
    %c0_143 = arith.constant 0 : index
    %456 = vector.load %arg6[%c84, %c0_143] : memref<98x256xf32, #tpu.memory_space<vmem>>, vector<1x256xf32>
    %457 = vector.broadcast %456 : vector<1x256xf32> to vector<2x256xf32>
    %458 = arith.mulf %455, %457 : vector<2x256xf32>
    %459 = arith.addf %419, %458 : vector<2x256xf32>
    %c226_i32_144 = arith.constant 226 : i32
    %460 = tpu.dynamic_rotate %32 by %c226_i32_144 dim 1 : vector<2x256xf32>, i32 -> vector<2x256xf32>
    %c85 = arith.constant 85 : index
    %c0_145 = arith.constant 0 : index
    %461 = vector.load %arg6[%c85, %c0_145] : memref<98x256xf32, #tpu.memory_space<vmem>>, vector<1x256xf32>
    %462 = vector.broadcast %461 : vector<1x256xf32> to vector<2x256xf32>
    %463 = arith.mulf %460, %462 : vector<2x256xf32>
    %464 = arith.addf %459, %463 : vector<2x256xf32>
    %c225_i32_146 = arith.constant 225 : i32
    %465 = tpu.dynamic_rotate %32 by %c225_i32_146 dim 1 : vector<2x256xf32>, i32 -> vector<2x256xf32>
    %c86 = arith.constant 86 : index
    %c0_147 = arith.constant 0 : index
    %466 = vector.load %arg6[%c86, %c0_147] : memref<98x256xf32, #tpu.memory_space<vmem>>, vector<1x256xf32>
    %467 = vector.broadcast %466 : vector<1x256xf32> to vector<2x256xf32>
    %468 = arith.mulf %465, %467 : vector<2x256xf32>
    %469 = arith.addf %464, %468 : vector<2x256xf32>
    %c224_i32_148 = arith.constant 224 : i32
    %470 = tpu.dynamic_rotate %32 by %c224_i32_148 dim 1 : vector<2x256xf32>, i32 -> vector<2x256xf32>
    %c87 = arith.constant 87 : index
    %c0_149 = arith.constant 0 : index
    %471 = vector.load %arg6[%c87, %c0_149] : memref<98x256xf32, #tpu.memory_space<vmem>>, vector<1x256xf32>
    %472 = vector.broadcast %471 : vector<1x256xf32> to vector<2x256xf32>
    %473 = arith.mulf %470, %472 : vector<2x256xf32>
    %474 = arith.addf %469, %473 : vector<2x256xf32>
    %c223_i32_150 = arith.constant 223 : i32
    %475 = tpu.dynamic_rotate %32 by %c223_i32_150 dim 1 : vector<2x256xf32>, i32 -> vector<2x256xf32>
    %c88 = arith.constant 88 : index
    %c0_151 = arith.constant 0 : index
    %476 = vector.load %arg6[%c88, %c0_151] : memref<98x256xf32, #tpu.memory_space<vmem>>, vector<1x256xf32>
    %477 = vector.broadcast %476 : vector<1x256xf32> to vector<2x256xf32>
    %478 = arith.mulf %475, %477 : vector<2x256xf32>
    %479 = arith.addf %474, %478 : vector<2x256xf32>
    %c222_i32_152 = arith.constant 222 : i32
    %480 = tpu.dynamic_rotate %32 by %c222_i32_152 dim 1 : vector<2x256xf32>, i32 -> vector<2x256xf32>
    %c89 = arith.constant 89 : index
    %c0_153 = arith.constant 0 : index
    %481 = vector.load %arg6[%c89, %c0_153] : memref<98x256xf32, #tpu.memory_space<vmem>>, vector<1x256xf32>
    %482 = vector.broadcast %481 : vector<1x256xf32> to vector<2x256xf32>
    %483 = arith.mulf %480, %482 : vector<2x256xf32>
    %484 = arith.addf %479, %483 : vector<2x256xf32>
    %c221_i32_154 = arith.constant 221 : i32
    %485 = tpu.dynamic_rotate %32 by %c221_i32_154 dim 1 : vector<2x256xf32>, i32 -> vector<2x256xf32>
    %c90 = arith.constant 90 : index
    %c0_155 = arith.constant 0 : index
    %486 = vector.load %arg6[%c90, %c0_155] : memref<98x256xf32, #tpu.memory_space<vmem>>, vector<1x256xf32>
    %487 = vector.broadcast %486 : vector<1x256xf32> to vector<2x256xf32>
    %488 = arith.mulf %485, %487 : vector<2x256xf32>
    %489 = arith.addf %484, %488 : vector<2x256xf32>
    %c211_i32_156 = arith.constant 211 : i32
    %490 = tpu.dynamic_rotate %32 by %c211_i32_156 dim 1 : vector<2x256xf32>, i32 -> vector<2x256xf32>
    %c91 = arith.constant 91 : index
    %c0_157 = arith.constant 0 : index
    %491 = vector.load %arg6[%c91, %c0_157] : memref<98x256xf32, #tpu.memory_space<vmem>>, vector<1x256xf32>
    %492 = vector.broadcast %491 : vector<1x256xf32> to vector<2x256xf32>
    %493 = arith.mulf %490, %492 : vector<2x256xf32>
    %494 = arith.addf %454, %493 : vector<2x256xf32>
    %c210_i32_158 = arith.constant 210 : i32
    %495 = tpu.dynamic_rotate %32 by %c210_i32_158 dim 1 : vector<2x256xf32>, i32 -> vector<2x256xf32>
    %c92 = arith.constant 92 : index
    %c0_159 = arith.constant 0 : index
    %496 = vector.load %arg6[%c92, %c0_159] : memref<98x256xf32, #tpu.memory_space<vmem>>, vector<1x256xf32>
    %497 = vector.broadcast %496 : vector<1x256xf32> to vector<2x256xf32>
    %498 = arith.mulf %495, %497 : vector<2x256xf32>
    %499 = arith.addf %494, %498 : vector<2x256xf32>
    %c209_i32_160 = arith.constant 209 : i32
    %500 = tpu.dynamic_rotate %32 by %c209_i32_160 dim 1 : vector<2x256xf32>, i32 -> vector<2x256xf32>
    %c93 = arith.constant 93 : index
    %c0_161 = arith.constant 0 : index
    %501 = vector.load %arg6[%c93, %c0_161] : memref<98x256xf32, #tpu.memory_space<vmem>>, vector<1x256xf32>
    %502 = vector.broadcast %501 : vector<1x256xf32> to vector<2x256xf32>
    %503 = arith.mulf %500, %502 : vector<2x256xf32>
    %504 = arith.addf %499, %503 : vector<2x256xf32>
    %c208_i32_162 = arith.constant 208 : i32
    %505 = tpu.dynamic_rotate %32 by %c208_i32_162 dim 1 : vector<2x256xf32>, i32 -> vector<2x256xf32>
    %c94 = arith.constant 94 : index
    %c0_163 = arith.constant 0 : index
    %506 = vector.load %arg6[%c94, %c0_163] : memref<98x256xf32, #tpu.memory_space<vmem>>, vector<1x256xf32>
    %507 = vector.broadcast %506 : vector<1x256xf32> to vector<2x256xf32>
    %508 = arith.mulf %505, %507 : vector<2x256xf32>
    %509 = arith.addf %504, %508 : vector<2x256xf32>
    %c207_i32_164 = arith.constant 207 : i32
    %510 = tpu.dynamic_rotate %32 by %c207_i32_164 dim 1 : vector<2x256xf32>, i32 -> vector<2x256xf32>
    %c95 = arith.constant 95 : index
    %c0_165 = arith.constant 0 : index
    %511 = vector.load %arg6[%c95, %c0_165] : memref<98x256xf32, #tpu.memory_space<vmem>>, vector<1x256xf32>
    %512 = vector.broadcast %511 : vector<1x256xf32> to vector<2x256xf32>
    %513 = arith.mulf %510, %512 : vector<2x256xf32>
    %514 = arith.addf %509, %513 : vector<2x256xf32>
    %c206_i32_166 = arith.constant 206 : i32
    %515 = tpu.dynamic_rotate %32 by %c206_i32_166 dim 1 : vector<2x256xf32>, i32 -> vector<2x256xf32>
    %c96 = arith.constant 96 : index
    %c0_167 = arith.constant 0 : index
    %516 = vector.load %arg6[%c96, %c0_167] : memref<98x256xf32, #tpu.memory_space<vmem>>, vector<1x256xf32>
    %517 = vector.broadcast %516 : vector<1x256xf32> to vector<2x256xf32>
    %518 = arith.mulf %515, %517 : vector<2x256xf32>
    %519 = arith.addf %514, %518 : vector<2x256xf32>
    %c205_i32_168 = arith.constant 205 : i32
    %520 = tpu.dynamic_rotate %32 by %c205_i32_168 dim 1 : vector<2x256xf32>, i32 -> vector<2x256xf32>
    %c97 = arith.constant 97 : index
    %c0_169 = arith.constant 0 : index
    %521 = vector.load %arg6[%c97, %c0_169] : memref<98x256xf32, #tpu.memory_space<vmem>>, vector<1x256xf32>
    %522 = vector.broadcast %521 : vector<1x256xf32> to vector<2x256xf32>
    %523 = arith.mulf %520, %522 : vector<2x256xf32>
    %524 = arith.addf %519, %523 : vector<2x256xf32>
    %525 = arith.addf %280, %245 : vector<2x256xf32>
    %526 = arith.addf %524, %489 : vector<2x256xf32>
    %527 = arith.addf %525, %526 : vector<2x256xf32>
    %c0_170 = arith.constant 0 : index
    %528 = memref.load %arg7[%c0_170] : memref<1xf32, #tpu.memory_space<smem>>
    %529 = vector.broadcast %528 : f32 to vector<2x256xf32>
    %530 = arith.addf %527, %529 : vector<2x256xf32>
    %531 = arith.negf %530 : vector<2x256xf32>
    %532 = math.exp %531 : vector<2x256xf32>
    %cst_171 = arith.constant 1.000000e+00 : f32
    %533 = vector.broadcast %cst_171 : f32 to vector<2x256xf32>
    %534 = arith.addf %533, %532 : vector<2x256xf32>
    %535 = arith.divf %533, %534 : vector<2x256xf32>
    %536 = vector.shape_cast %535 : vector<2x256xf32> to vector<2x1x256xf32>
    %537 = vector.broadcast %536 : vector<2x1x256xf32> to vector<2x16x256xf32>
    %538 = arith.mulf %28, %537 : vector<2x16x256xf32>
    %c0_172 = arith.constant 0 : index
    %c0_173 = arith.constant 0 : index
    %c0_174 = arith.constant 0 : index
    %539 = vector.load %arg8[%c0_172, %c0_173, %c0_174] : memref<2x16x256xf32, #tpu.memory_space<vmem>>, vector<2x16x256xf32>
    tpu.vector_store %arg8[%c0_172, %c0_173, %c0_174], %538 {strides = array<i32>} : memref<2x16x256xf32, #tpu.memory_space<vmem>>, vector<2x16x256xf32>,
    return
  }
  func.func @transform_0(%arg0: i32) -> (i32, i32, i32) {
    %c0_i32 = arith.constant 0 : i32
    %c0_i32_0 = arith.constant 0 : i32
    %c0_i32_1 = arith.constant 0 : i32
    return %arg0, %c0_i32, %c0_i32_0 : i32, i32, i32
  }
  func.func @transform_1(%arg0: i32) -> (i32, i32) {
    %c0_i32 = arith.constant 0 : i32
    %c0_i32_0 = arith.constant 0 : i32
    %c0_i32_1 = arith.constant 0 : i32
    return %c0_i32, %c0_i32_0 : i32, i32
  }
  func.func @transform_2(%arg0: i32) -> (i32, i32) {
    %c0_i32 = arith.constant 0 : i32
    %c0_i32_0 = arith.constant 0 : i32
    %c0_i32_1 = arith.constant 0 : i32
    return %c0_i32, %c0_i32_0 : i32, i32
  }
  func.func @transform_3(%arg0: i32) -> (i32, i32) {
    %c0_i32 = arith.constant 0 : i32
    %c0_i32_0 = arith.constant 0 : i32
    %c0_i32_1 = arith.constant 0 : i32
    return %c0_i32, %c0_i32_0 : i32, i32
  }
  func.func @transform_4(%arg0: i32) -> (i32, i32) {
    %c0_i32 = arith.constant 0 : i32
    %c0_i32_0 = arith.constant 0 : i32
    %c0_i32_1 = arith.constant 0 : i32
    return %c0_i32, %c0_i32_0 : i32, i32
  }
  func.func @transform_5(%arg0: i32) -> (i32, i32) {
    %c0_i32 = arith.constant 0 : i32
    %c0_i32_0 = arith.constant 0 : i32
    %c0_i32_1 = arith.constant 0 : i32
    return %c0_i32, %c0_i32_0 : i32, i32
  }
  func.func @transform_6(%arg0: i32) -> i32 {
    %c0_i32 = arith.constant 0 : i32
    %c0_i32_0 = arith.constant 0 : i32
    return %c0_i32 : i32
  }
  func.func @transform_7(%arg0: i32) -> (i32, i32, i32) {
    %c0_i32 = arith.constant 0 : i32
    %c0_i32_0 = arith.constant 0 : i32
    %c0_i32_1 = arith.constant 0 : i32
    return %arg0, %c0_i32, %c0_i32_0 : i32, i32, i32
  }
}

</mosaic_0001>

<bundles_post_ra>
// kernel: tpu_custom_call.1
= control target key start
LH: loop header
LB: loop body
LE: loop exit
PB: predicated region body
PF: predicated region fallthrough
CT: control target
= control target key end

     0   :  { %13 = vsyncpa [#allocation4], 0  ;;  %s5544_s0 = inlined_call_operand.hbm [shape: f32[2,16,256], index: 0, kind: input, shape index: {}]   ;;  %s5545_s1 = inlined_call_operand.vmem [shape: f32[16,4], index: 1, kind: input, shape index: {}]   ;;  %s5546_s2 = inlined_call_operand.vmem [shape: f32[1,4], index: 2, kind: input, shape index: {}]   ;;  %s5547_s3 = inlined_call_operand.vmem [shape: f32[4,16], index: 3, kind: input, shape index: {}]   ;;  %s5548_s4 = inlined_call_operand.vmem [shape: f32[1,16], index: 4, kind: input, shape index: {}]   ;;  %s5549_s5 = inlined_call_operand.hbm [shape: f32[98,256], index: 5, kind: input, shape index: {}]   ;;  %s5550_s6 = inlined_call_operand.<no memory space> [shape: f32[1], index: 6, kind: input, shape index: {}]   ;;  %s5551_s7 = inlined_call_operand.hbm [shape: f32[2,16,256], index: 7, kind: output, shape index: {}]  }
   0x1   :  { %14 = vsyncpa [#allocation7], 0 }
   0x2   :  { %15 = vsyncpa [#allocation5], 0  ;;  %s3018_s24 = smov [#allocation3]   ;;  %s2946_s28 = scalar_lea.hbm %s5544_s0, 1024 }
   0x3   :  { %s21_s25 = sshll.u32 %s3018_s24, 4  ;;  %p2947_p0 = scmp.ne.s32.totalorder %s5544_s0, %s2946_s28  ;;  %s22_s25 = int_to_ptr.vmem [resolvable:$true] %s21_s25 }
   0x4   :  { %p2950_p1 = scmp.lt.u32.totalorder %s2946_s28, %s5544_s0 }
   0x6   :  { %p2952_p2 = pnand %p2950_p1, %p2947_p0 }
   0x8   :  { %2955 = shalt.err (!%p2952_p2)
}
   0x9   :  { %s2956_s10 = scalar_lea.vmem %s22_s25, 1024  ;;  %p2961_p4 = scmp.lt.s32.totalorder %s22_s25, %s22_s25 }
   0xa   :  { %p2957_p3 = scmp.ne.s32.totalorder %s22_s25, %s2956_s10  ;;  %p2962_p5 = scmp.lt.s32.totalorder %s2956_s10, %s2956_s10 }
   0xc   :  { %p2963_p6 = por %p2962_p5, %p2961_p4 }
   0xe   :  { %p2964_p7 = pnand %p2963_p6, %p2957_p3 }
  0x10   :  { %2967 = shalt.err (!%p2964_p7)
}
  0x11   :  { %s5552_s11 = smov 256   ;;  %s3020_s12 = smov 16  }
  0x12   :  { %27 = dma.hbm_to_vmem [thread:$0]  %s5544_s0, 1024, %s22_s25, [#allocation4], %s5552_s11, %s5552_s11, %s3020_s12  }
  0x13   :  { %s3021_s15 = smov [#allocation6]   ;;  %s2968_s19 = scalar_lea.hbm %s5549_s5, 3328 }
  0x14   :  { %s41_s16 = sshll.u32 %s3021_s15, 4  ;;  %p2969_p8 = scmp.ne.s32.totalorder %s5549_s5, %s2968_s19  ;;  %s42_s16 = int_to_ptr.vmem [resolvable:$true] %s41_s16 }
  0x15   :  { %p2972_p9 = scmp.lt.u32.totalorder %s2968_s19, %s5549_s5 }
  0x17   :  { %p2974_p10 = pnand %p2972_p9, %p2969_p8 }
  0x19   :  { %2977 = shalt.err (!%p2974_p10)
}
  0x1a   :  { %s2978_s24 = scalar_lea.vmem %s42_s16, 3328  ;;  %p2983_p12 = scmp.lt.s32.totalorder %s42_s16, %s42_s16 }
  0x1b   :  { %p2979_p11 = scmp.ne.s32.totalorder %s42_s16, %s2978_s24  ;;  %p2984_p13 = scmp.lt.s32.totalorder %s2978_s24, %s2978_s24 }
  0x1d   :  { %p2985_p0 = por %p2984_p13, %p2983_p12 }
  0x1f   :  { %p2986_p1 = pnand %p2985_p0, %p2979_p11 }
  0x21   :  { %2989 = shalt.err (!%p2986_p1)
}
  0x22   :  { %47 = dma.hbm_to_vmem [thread:$0]  %s5549_s5, 3328, %s42_s16, [#allocation7], %s5552_s11, %s5552_s11, %s3020_s12  }
  0x23   :  { %3012 = dma.done.wait [#allocation4], 1024  }
  0x24   :  { %3013 = vsyncadd [#allocation4], 4294966272 }
  0x25   :  { %3014 = dma.done.wait [#allocation7], 3328  }
  0x26   :  { %3015 = vsyncadd [#allocation7], 4294963968  ;;  %v3144_v0 = vld [vmem:[#allocation3 + $0x20] sm:$0xff]  ;;  %v3146_v1 = vld [vmem:[#allocation3 + $0x28] sm:$0xff]  ;;  %v3022_v19 = vmov 0.0|0.0   ;;  %vm3023_vm0 = vmmov 0   ;;  %v97_v21 = vlaneseq }
  0x27   :  { %v3148_v2 = vld [vmem:[#allocation3] sm:$0xff]  ;;  %v70_v3 = vadd.f32 %v3146_v1, %v3144_v0  ;;  %v3152_v4 = vld [vmem:[#allocation3 + $0x8] sm:$0xff]  ;;  %v3154_v5 = vld [vmem:[#allocation3 + $0x30] sm:$0xff]  ;;  %v87_v15 = vmax.f32 %v3144_v0, %v3146_v1  ;;  %2875 = vmatprep.subr.bf16.mxu0 %v3022_v19  ;;  %v3024_v20 = vmov 0.0   ;;  %vm108_vm1 = vcmask 130112   ;;  %s3028_s13 = smov 48  }
  0x28   :  { %v3156_v6 = vld [vmem:[#allocation3 + $0x38] sm:$0xff]  ;;  %v64_v7 = vadd.f32 %v3152_v4, %v3148_v2  ;;  %v3160_v8 = vld [vmem:[#allocation3 + $0x10] sm:$0xff]  ;;  %v81_v13 = vmax.f32 %v3148_v2, %v3152_v4  ;;  %v149_v16 = vld [vmem:[%s5545_s1] sm:$0xff]  ;;  %2867 = vmatprep.mubr.msk.f32.mxu0 %vm3023_vm0, %v3024_v20  ;;  %2870 = vmatprep.subr.mxu1 %v3024_v20  ;;  %v3182_v22 = vand.u32 127, %v97_v21  ;;  %v3185_v26 = vshrl.u32 %v97_v21, 7  ;;  %s3029_s14 = smov 47  }
  0x29   :  { %v3162_v9 = vld [vmem:[#allocation3 + $0x18] sm:$0xff]  ;;  %71 = vadd.xlane.f32.xlu1 %v70_v3  ;;  %v73_v10 = vadd.f32 %v3156_v6, %v3154_v5  ;;  %v90_v14 = vmax.f32 %v3154_v5, %v3156_v6  ;;  %v150_v17 = vld [vmem:[%s5545_s1 + $0x8] sm:$0xff]  ;;  %2872 = vmatprep.mubr.msk.f32.mxu1 %vm3023_vm0, %v3024_v20  ;;  %vm119_vm2 = vcmask 1041409   ;;  %vm144_vm3 = vcmask 1043459   ;;  %v233_v54 = vld [vmem:[%s5547_s3] sm:$0xf] }
  0x2a   :  { %65 = vadd.xlane.f32.xlu0 %v64_v7  ;;  %v67_v11 = vadd.f32 %v3162_v9, %v3160_v8  ;;  %v84_v12 = vmax.f32 %v3160_v8, %v3162_v9  ;;  %v2876_v18 = vpack.c.bf16 %v150_v17, %v149_v16  ;;  %v103_v25 = vadd.s32 4294967288, %v3182_v22  ;;  %5715 = vst [vmem:[#allocation12_spill] sm:$0xff] %v3185_v26  ;;  %v2850_v55 = vld [vmem:[%s5546_s2] ss:$0 sm:$0xff]  ;;  %s3025_s2 = smov 51   ;;  %s3026_s3 = smov 50  }
  0x2b   :  { %v101_v32 = vsub.s32 %v3182_v22, %v3185_v26  ;;  %vm147_vm4 = vcmask 1041408   ;;  %vm158_vm5 = vcmask 130048   ;;  %vm245_vm6 = vcmask 1043456   ;;  %v2852_v60 = vld [vmem:[%s5548_s4] ss:$0 sm:$0xff]  ;;  %s3027_s4 = smov 49  }
  0x2c   :  { %2877 = vmatpush3.bf16.msra.mxu0 %v2876_v18  ;;  %v106_v29 = vsub.s32 %v103_v25, %v3185_v26  ;;  %2871 = vmatpush3.msk.msra.mxu1 %vm245_vm6, %v233_v54  ;;  %vm241_vm7 = vcmask 31744   ;;  %s3030_s15 = smov 46   ;;  %s3031_s16 = smov 45   ;;  %vm432_vm8 = vcmp.lt.s32.totalorder %v3182_v22, 51  ;;  %vm455_vm9 = vcmp.lt.s32.totalorder %v3182_v22, 50 }
  0x2d   :  { %74 = vadd.xlane.f32.xlu1 %v73_v10  ;;  %s3032_s17 = smov 35   ;;  %s3033_s18 = smov 34   ;;  %vm479_vm10 = vcmp.lt.s32.totalorder %v3182_v22, 49  ;;  %vm503_vm11 = vcmp.lt.s32.totalorder %v3182_v22, 48  ;;  %vm527_vm12 = vcmp.lt.s32.totalorder %v3182_v22, 47  ;;  %vm551_vm13 = vcmp.lt.s32.totalorder %v3182_v22, 46 }
  0x2e   :  { %68 = vadd.xlane.f32.xlu0 %v67_v11  ;;  %s3034_s19 = smov 33   ;;  %s3035_s20 = smov 32   ;;  %vm575_vm14 = vcmp.lt.s32.totalorder %v3182_v22, 45  ;;  %vm599_vm15 = vcmp.lt.s32.totalorder %v3182_v22, 35  ;;  %vm623_vm0 = vcmp.lt.s32.totalorder %v3182_v22, 34  ;;  %vm743_vm6 = vcmp.lt.s32.totalorder %v3182_v22, 29 }
  0x2f   :  { %s3036_s21 = smov 19   ;;  %s3037_s22 = smov 18  }
  0x30   :  { %s3038_s23 = smov 17   ;;  %s3039_s24 = smov 31  }
  0x31   :  { %85 = vmax.xlane.f32.xlu1 %v84_v12  ;;  %s3040_s0 = smov 15   ;;  %s3041_s25 = smov 30  }
  0x32   :  { %82 = vmax.xlane.f32.xlu0 %v81_v13  ;;  %v3201_v13 = vsub.s32 0, %v3185_v26  ;;  %s3042_s5 = smov 14   ;;  %s3043_s26 = smov 29  }
  0x33   :  { %s3044_s27 = smov 13   ;;  %s3045_s28 = smov 3  }
  0x34   :  { %s5561_s1 = smov 115   ;;  %s3047_s29 = smov 2  }
  0x35   :  { %91 = vmax.xlane.f32.xlu1 %v90_v14  ;;  %s5553_s30 = smov 114   ;;  %s3049_s8 = smov 1  }
  0x36   :  { %88 = vmax.xlane.f32.xlu0 %v87_v15  ;;  %v3204_v15 = vsub.s32 1, %v3185_v26  ;;  %s5557_s9 = smov 113   ;;  %s5555_s10 = smov 112  }
  0x37   :  { %s3052_s11 = smov 127  }
  0xb6   :  { %v72_v23 = vpop.xlane.xlu1 %71 }
  0xb7   :  { %v66_v24 = vpop.xlane.xlu0 %65  ;;  %v79_v33 = vmul.f32 0.00390625, %v72_v23 }
  0xb8   :  { %v77_v34 = vmul.f32 0.00390625, %v66_v24 }
  0xb9   :  { %v113_v39 = vrot.slane %v79_v33, %v101_v32 }
  0xba   :  { %v75_v27 = vpop.xlane.xlu1 %74  ;;  %v102_v40 = vrot.slane %v77_v34, %v101_v32 }
  0xbb   :  { %v69_v28 = vpop.xlane.xlu0 %68  ;;  %v80_v30 = vmul.f32 0.00390625, %v75_v27 }
  0xbc   :  { %v78_v31 = vmul.f32 0.00390625, %v69_v28 }
  0xbd   :  { %v117_v37 = vrot.slane %v80_v30, %v106_v29 }
  0xbe   :  { %v86_v35 = vpop.xlane.xlu1 %85  ;;  %v107_v38 = vrot.slane %v78_v31, %v106_v29 }
  0xbf   :  { %v83_v36 = vpop.xlane.xlu0 %82  ;;  %v133_v41 = vrot.slane %v86_v35, %v106_v29  ;;  %v118_v48 = vsel %vm108_vm1, %v117_v37, %v113_v39 }
  0xc0   :  { %v129_v42 = vrot.slane %v83_v36, %v101_v32  ;;  %v109_v47 = vsel %vm108_vm1, %v107_v38, %v102_v40 }
  0xc1   :  { %v120_v51 = vsel %vm119_vm2, %v118_v48, %v109_v47 }
  0xc2   :  { %v92_v43 = vpop.xlane.xlu1 %91  ;;  %v134_v49 = vsel %vm108_vm1, %v133_v41, %v129_v42 }
  0xc3   :  { %v142_v44 = vrot.slane %v92_v43, %v106_v29  ;;  %v89_v45 = vpop.xlane.xlu0 %88 }
  0xc4   :  { %v138_v46 = vrot.slane %v89_v45, %v101_v32 }
  0xc6   :  { %v143_v50 = vsel %vm108_vm1, %v142_v44, %v138_v46  ;;  %vm647_vm1 = vcmp.lt.s32.totalorder %v3182_v22, 33 }
  0xc7   :  { %v145_v52 = vsel %vm144_vm3, %v143_v50, %v134_v49  ;;  %vm695_vm3 = vcmp.lt.s32.totalorder %v3182_v22, 31 }
  0xc8   :  { %v148_v53 = vsel %vm147_vm4, %v120_v51, %v145_v52  ;;  %vm719_vm4 = vcmp.lt.s32.totalorder %v3182_v22, 30 }
  0xc9   :  { %2868 = vmatmul.mubr.msk.f32.vlgmr.msra.gmra.mrb[0].mxu0 %vm158_vm5, %v148_v53  ;;  %vm767_vm5 = vcmp.lt.s32.totalorder %v3182_v22, 19 }
 0x19c   :  { %v228_v56 = vpop.f32.mrb[0].mxu0 }
 0x19d   :  { %v229_v57 = vadd.f32 %v2850_v55, %v228_v56  ;;  %v2869_v58 = vpop.f32.mrb[1].mxu0 }
 0x19f   :  { %v232_v59 = vmax.f32 %v229_v57, 0.0 }
 0x1a1   :  { %2873 = vmatmul.mubr.msk.f32.vlgmr.msra.gmra.mrb[0].mxu1 %vm241_vm7, %v232_v59  ;;  %vm791_vm7 = vcmp.lt.s32.totalorder %v3182_v22, 18 }
 0x274   :  { %v315_v61 = vpop.f32.mrb[0].mxu1 }
 0x275   :  { %v316_v62 = vadd.f32 %v2852_v60, %v315_v61  ;;  %v2874_v63 = vpop.f32.mrb[1].mxu1 }
 0x277   :  { %v320_v3 = vrot.slane %v316_v62, 2 }
 0x279   :  { %v322_v7 = vadd.f32 %v320_v3, %v316_v62 }
 0x27b   :  { %v2855_v10 = vmul.f32 -1.442695, %v322_v7 }
 0x27d   :  { %2934 = vpow2.f32 %v2855_v10 }
 0x287   :  { %v2935_v11 = vpop.eup %2934 }
 0x288   :  { %v326_v12 = vadd.f32 1.0, %v2935_v11 }
 0x28a   :  { %2936 = vrcp.f32 %v326_v12  ;;  %v2169_v12 = vld [vmem:[#allocation6 + $0x91] ss:$8 sm:$0x3] }
 0x294   :  { %v2937_v14 = vpop.eup %2936 }
 0x295   :  { %v332_v16 = vrot.slane %v2937_v14, %v3201_v13  ;;  %v343_v17 = vrot.slane %v2937_v14, %v3204_v15 }
 0x297   :  { %338 = vbcast.lane.b32.xlu1 %v332_v16, 264  ;;  %334 = vbcast.lane.b32.xlu0 %v332_v16, 256 }
 0x29b   :  { %345 = vbcast.lane.b32.xlu1 %v343_v17, 256 }
 0x29f   :  { %349 = vbcast.lane.b32.xlu1 %v343_v17, 264  ;;  %v1004_v17 = vld [vmem:[#allocation6 + $0x30] ss:$8 sm:$0x3] }
 0x309   :  { %v339_v18 = vpop.permute.xlu1 %338  ;;  %v335_v19 = vpop.permute.xlu0 %334 }
 0x30a   :  { %v3209_v20 = vmul.f32 %v339_v18, %v3160_v8  ;;  %v3212_v21 = vmul.f32 %v339_v18, %v3162_v9  ;;  %v3215_v23 = vmul.f32 %v335_v19, %v3148_v2  ;;  %v3218_v24 = vmul.f32 %v335_v19, %v3152_v4 }
 0x30c   :  { %5716 = vst [vmem:[#allocation13_spill] sm:$0xff] %v3209_v20  ;;  %5717 = vst [vmem:[#allocation14_spill] sm:$0xff] %v3212_v21  ;;  %v359_v25 = vadd.f32 %v3209_v20, %v3215_v23  ;;  %v366_v27 = vadd.f32 %v3212_v21, %v3218_v24  ;;  %v392_v28 = vmax.f32 %v3215_v23, %v3209_v20 }
 0x30d   :  { %5718 = vst [vmem:[#allocation15_spill] sm:$0xff] %v3215_v23  ;;  %5719 = vst [vmem:[#allocation16_spill] sm:$0xff] %v3218_v24  ;;  %v399_v8 = vmax.f32 %v3218_v24, %v3212_v21  ;;  %v346_v9 = vpop.permute.xlu1 %345 }
 0x30e   :  { %v360_v29 = vrot.slane %v359_v25, 4  ;;  %v367_v30 = vrot.slane %v366_v27, 4  ;;  %v393_v2 = vrot.slane %v392_v28, 4  ;;  %v3229_v38 = vmul.f32 %v346_v9, %v3144_v0 }
 0x30f   :  { %v400_v31 = vrot.slane %v399_v8, 4  ;;  %v3232_v39 = vmul.f32 %v346_v9, %v3146_v1  ;;  %v2174_v9 = vrot.slane %v2169_v12, %v3201_v13 }
 0x310   :  { %v361_v32 = vadd.f32 %v360_v29, %v359_v25  ;;  %v368_v4 = vadd.f32 %v367_v30, %v366_v27  ;;  %v394_v33 = vmax.f32 %v392_v28, %v393_v2  ;;  %5720 = vst [vmem:[#allocation17_spill] sm:$0xff] %v3229_v38  ;;  %v2178_v29 = vrot.slane %v2169_v12, %v3204_v15 }
 0x311   :  { %v401_v34 = vmax.f32 %v399_v8, %v400_v31  ;;  %v350_v35 = vpop.permute.xlu1 %349  ;;  %5721 = vst [vmem:[#allocation18_spill] sm:$0xff] %v3232_v39 }
 0x312   :  { %v362_v36 = vrot.slane %v361_v32, 2  ;;  %v369_v37 = vrot.slane %v368_v4, 2  ;;  %v3235_v40 = vmul.f32 %v350_v35, %v3154_v5  ;;  %v3238_v41 = vmul.f32 %v350_v35, %v3156_v6 }
 0x313   :  { %v395_v42 = vrot.slane %v394_v33, 2  ;;  %v402_v43 = vrot.slane %v401_v34, 2  ;;  %v1013_v35 = vrot.slane %v1004_v17, %v3204_v15 }
 0x314   :  { %5722 = vst [vmem:[#allocation19_spill] sm:$0xff] %v3235_v40  ;;  %5723 = vst [vmem:[#allocation20_spill] sm:$0xff] %v3238_v41  ;;  %v373_v44 = vadd.f32 %v3235_v40, %v3229_v38  ;;  %v380_v45 = vadd.f32 %v3238_v41, %v3232_v39  ;;  %v406_v0 = vmax.f32 %v3229_v38, %v3235_v40 }
 0x315   :  { %v413_v1 = vmax.f32 %v3232_v39, %v3238_v41  ;;  %v363_v46 = vadd.f32 %v362_v36, %v361_v32  ;;  %v370_v5 = vadd.f32 %v369_v37, %v368_v4  ;;  %v396_v50 = vmax.f32 %v394_v33, %v395_v42 }
 0x316   :  { %v374_v47 = vrot.slane %v373_v44, 4  ;;  %v381_v48 = vrot.slane %v380_v45, 4  ;;  %v407_v6 = vrot.slane %v406_v0, 4  ;;  %v403_v51 = vmax.f32 %v401_v34, %v402_v43 }
 0x317   :  { %v414_v49 = vrot.slane %v413_v1, 4  ;;  %v364_v56 = vrot.slane %v363_v46, 1  ;;  %v371_v57 = vrot.slane %v370_v5, 1  ;;  %v397_v62 = vrot.slane %v396_v50, 1 }
 0x318   :  { %v375_v52 = vadd.f32 %v374_v47, %v373_v44  ;;  %v382_v53 = vadd.f32 %v381_v48, %v380_v45  ;;  %v408_v54 = vmax.f32 %v406_v0, %v407_v6  ;;  %v404_v63 = vrot.slane %v403_v51, 1 }
 0x319   :  { %v415_v55 = vmax.f32 %v413_v1, %v414_v49  ;;  %v365_v14 = vadd.f32 %v364_v56, %v363_v46  ;;  %v372_v16 = vadd.f32 %v371_v57, %v370_v5  ;;  %v398_v28 = vmax.f32 %v396_v50, %v397_v62 }
 0x31a   :  { %v376_v58 = vrot.slane %v375_v52, 2  ;;  %v383_v59 = vrot.slane %v382_v53, 2  ;;  %v409_v60 = vrot.slane %v408_v54, 2  ;;  %v405_v8 = vmax.f32 %v403_v51, %v404_v63 }
 0x31b   :  { %v416_v61 = vrot.slane %v415_v55, 2  ;;  %v3250_v4 = vmul.f32 0.0625, %v365_v14  ;;  %v3252_v33 = vmul.f32 0.0625, %v372_v16  ;;  %v1009_v34 = vrot.slane %v1004_v17, %v3201_v13 }
 0x31c   :  { %v377_v3 = vadd.f32 %v376_v58, %v375_v52  ;;  %v384_v7 = vadd.f32 %v383_v59, %v382_v53  ;;  %v410_v10 = vmax.f32 %v408_v54, %v409_v60  ;;  %v2181_v46 = vmul.f32 %v2174_v9, %v398_v28 }
 0x31d   :  { %v417_v11 = vmax.f32 %v415_v55, %v416_v61  ;;  %v2182_v5 = vmul.f32 %v2178_v29, %v405_v8  ;;  %v1016_v48 = vmul.f32 %v1009_v34, %v3250_v4  ;;  %v1017_v49 = vmul.f32 %v1013_v35, %v3252_v33 }
 0x31e   :  { %v378_v18 = vrot.slane %v377_v3, 1  ;;  %v385_v19 = vrot.slane %v384_v7, 1  ;;  %v411_v25 = vrot.slane %v410_v10, 1 }
 0x31f   :  { %v418_v27 = vrot.slane %v417_v11, 1 }
 0x320   :  { %v379_v30 = vadd.f32 %v378_v18, %v377_v3  ;;  %v386_v2 = vadd.f32 %v385_v19, %v384_v7  ;;  %v412_v31 = vmax.f32 %v410_v10, %v411_v25 }
 0x321   :  { %v419_v32 = vmax.f32 %v417_v11, %v418_v27 }
 0x322   :  { %v3256_v36 = vmul.f32 0.0625, %v379_v30  ;;  %v3258_v37 = vmul.f32 0.0625, %v386_v2  ;;  %v3261_v42 = vsel %vm119_vm2, %v412_v31, %v398_v28  ;;  %v2183_v44 = vmul.f32 %v2174_v9, %v412_v31 }
 0x323   :  { %5724 = vst [vmem:[#allocation21_spill] sm:$0xff] %v3261_v42  ;;  %v3264_v43 = vsel %vm119_vm2, %v419_v32, %v405_v8  ;;  %1616 = vrot.lane.b32.xlu0 %v3261_v42, %s3025_s2  ;;  %v2184_v45 = vmul.f32 %v2178_v29, %v419_v32 }
 0x324   :  { %1618 = vrot.lane.b32.xlu1 %v3264_v43, %s3025_s2  ;;  %v1018_v0 = vmul.f32 %v1009_v34, %v3256_v36  ;;  %v1019_v1 = vmul.f32 %v1013_v35, %v3258_v37  ;;  %v2189_v47 = vrot.slane %v2183_v44, 7 }
 0x325   :  { %v2191_v6 = vrot.slane %v2184_v45, 7 }
 0x326   :  { %v1024_v50 = vrot.slane %v1018_v0, 7  ;;  %v1026_v51 = vrot.slane %v1019_v1, 7  ;;  %v3279_v52 = vsel %vm119_vm2, %v2189_v47, %v2181_v46 }
 0x327   :  { %1639 = vrot.lane.b32.xlu0 %v3261_v42, %s3026_s3  ;;  %5725 = vst [vmem:[#allocation22_spill] sm:$0xff] %v3279_v52  ;;  %v3282_v53 = vsel %vm119_vm2, %v2191_v6, %v2182_v5  ;;  %v3549_v6 = vsel %vm119_vm2, %v3256_v36, %v3250_v4 }
 0x328   :  { %1641 = vrot.lane.b32.xlu1 %v3264_v43, %s3026_s3  ;;  %5726 = vst [vmem:[#allocation23_spill] sm:$0xff] %v3282_v53  ;;  %v3285_v54 = vsel %vm119_vm2, %v1024_v50, %v1016_v48  ;;  %v3288_v55 = vsel %vm119_vm2, %v1026_v51, %v1017_v49  ;;  %v3554_v49 = vsel %vm119_vm2, %v3258_v37, %v3252_v33  ;;  %vm671_vm2 = vcmp.lt.s32.totalorder %v3182_v22, 32 }
 0x329   :  { %5727 = vst [vmem:[#allocation24_spill] sm:$0xff] %v3285_v54  ;;  %5728 = vst [vmem:[#allocation25_spill] sm:$0xff] %v3288_v55  ;;  %v3847_v55 = vld [vmem:[#allocation6 + $0x72] ss:$8 sm:$0x3] }
 0x32b   :  { %1662 = vrot.lane.b32.xlu0 %v3261_v42, %s3027_s4 }
 0x32c   :  { %1664 = vrot.lane.b32.xlu1 %v3264_v43, %s3027_s4 }
 0x32f   :  { %1685 = vrot.lane.b32.xlu0 %v3261_v42, %s3028_s13 }
 0x330   :  { %1687 = vrot.lane.b32.xlu1 %v3264_v43, %s3028_s13 }
 0x333   :  { %1708 = vrot.lane.b32.xlu0 %v3261_v42, %s3029_s14 }
 0x334   :  { %1710 = vrot.lane.b32.xlu1 %v3264_v43, %s3029_s14 }
 0x337   :  { %1731 = vrot.lane.b32.xlu0 %v3261_v42, %s3030_s15 }
 0x338   :  { %1733 = vrot.lane.b32.xlu1 %v3264_v43, %s3030_s15 }
 0x33b   :  { %1754 = vrot.lane.b32.xlu0 %v3261_v42, %s3031_s16 }
 0x33c   :  { %1756 = vrot.lane.b32.xlu1 %v3264_v43, %s3031_s16 }
 0x33f   :  { %1777 = vrot.lane.b32.xlu0 %v3261_v42, %s3032_s17 }
 0x340   :  { %1779 = vrot.lane.b32.xlu1 %v3264_v43, %s3032_s17 }
 0x343   :  { %1800 = vrot.lane.b32.xlu0 %v3261_v42, %s3033_s18 }
 0x344   :  { %1802 = vrot.lane.b32.xlu1 %v3264_v43, %s3033_s18 }
 0x347   :  { %1823 = vrot.lane.b32.xlu0 %v3261_v42, %s3034_s19 }
 0x348   :  { %1825 = vrot.lane.b32.xlu1 %v3264_v43, %s3034_s19 }
 0x34b   :  { %1846 = vrot.lane.b32.xlu0 %v3261_v42, %s3035_s20 }
 0x34c   :  { %1848 = vrot.lane.b32.xlu1 %v3264_v43, %s3035_s20 }
 0x34f   :  { %1938 = vrot.lane.b32.xlu0 %v3261_v42, %s3036_s21 }
 0x350   :  { %1940 = vrot.lane.b32.xlu1 %v3264_v43, %s3036_s21 }
 0x353   :  { %1961 = vrot.lane.b32.xlu0 %v3261_v42, %s3037_s22 }
 0x354   :  { %1963 = vrot.lane.b32.xlu1 %v3264_v43, %s3037_s22 }
 0x357   :  { %1984 = vrot.lane.b32.xlu0 %v3261_v42, %s3038_s23 }
 0x358   :  { %1986 = vrot.lane.b32.xlu1 %v3264_v43, %s3038_s23 }
 0x35b   :  { %2007 = vrot.lane.b32.xlu0 %v3261_v42, %s3020_s12 }
 0x35c   :  { %2009 = vrot.lane.b32.xlu1 %v3264_v43, %s3020_s12 }
 0x35f   :  { %1869 = vrot.lane.b32.xlu0 %v3261_v42, %s3039_s24 }
 0x360   :  { %1871 = vrot.lane.b32.xlu1 %v3264_v43, %s3039_s24 }
 0x363   :  { %2030 = vrot.lane.b32.xlu0 %v3261_v42, %s3040_s0 }
 0x364   :  { %2032 = vrot.lane.b32.xlu1 %v3264_v43, %s3040_s0 }
 0x367   :  { %1892 = vrot.lane.b32.xlu0 %v3261_v42, %s3041_s25 }
 0x368   :  { %1894 = vrot.lane.b32.xlu1 %v3264_v43, %s3041_s25 }
 0x36b   :  { %2053 = vrot.lane.b32.xlu0 %v3261_v42, %s3042_s5 }
 0x36c   :  { %2055 = vrot.lane.b32.xlu1 %v3264_v43, %s3042_s5 }
 0x36f   :  { %1915 = vrot.lane.b32.xlu0 %v3261_v42, %s3043_s26 }
 0x370   :  { %1917 = vrot.lane.b32.xlu1 %v3264_v43, %s3043_s26 }
 0x373   :  { %2076 = vrot.lane.b32.xlu0 %v3261_v42, %s3044_s27 }
 0x374   :  { %2078 = vrot.lane.b32.xlu1 %v3264_v43, %s3044_s27 }
 0x377   :  { %2099 = vrot.lane.b32.xlu0 %v3261_v42, %s3045_s28 }
 0x378   :  { %2101 = vrot.lane.b32.xlu1 %v3264_v43, %s3045_s28 }
 0x37b   :  { %2266 = vrot.lane.b32.xlu0 %v3261_v42, %s5561_s1 }
 0x37c   :  { %2268 = vrot.lane.b32.xlu1 %v3264_v43, %s5561_s1  ;;  %s5567_s1 = smov 109  }
 0x37f   :  { %2122 = vrot.lane.b32.xlu0 %v3261_v42, %s3047_s29 }
 0x380   :  { %2124 = vrot.lane.b32.xlu1 %v3264_v43, %s3047_s29 }
 0x383   :  { %2289 = vrot.lane.b32.xlu0 %v3261_v42, %s5553_s30 }
 0x384   :  { %2291 = vrot.lane.b32.xlu1 %v3264_v43, %s5553_s30  ;;  %s5559_s30 = smov 111  }
 0x387   :  { %2145 = vrot.lane.b32.xlu0 %v3261_v42, %s3049_s8 }
 0x388   :  { %2147 = vrot.lane.b32.xlu1 %v3264_v43, %s3049_s8 }
 0x38b   :  { %2312 = vrot.lane.b32.xlu0 %v3261_v42, %s5557_s9 }
 0x38c   :  { %2314 = vrot.lane.b32.xlu1 %v3264_v43, %s5557_s9  ;;  %s5563_s9 = smov 110  }
 0x38f   :  { %2335 = vrot.lane.b32.xlu0 %v3261_v42, %s5555_s10 }
 0x390   :  { %2337 = vrot.lane.b32.xlu1 %v3264_v43, %s5555_s10  ;;  %s3054_s10 = smov 126  }
 0x393   :  { %2197 = vrot.lane.b32.xlu0 %v3261_v42, %s3052_s11 }
 0x394   :  { %2199 = vrot.lane.b32.xlu1 %v3264_v43, %s3052_s11 }
 0x395   :  { %v3400_v57 = vpop.permute.xlu0 %1616 }
 0x396   :  { %v3398_v56 = vpop.permute.xlu1 %1618 }
 0x397   :  { %2358 = vrot.lane.b32.xlu0 %v3261_v42, %s5559_s30 }
 0x398   :  { %2360 = vrot.lane.b32.xlu1 %v3264_v43, %s5559_s30  ;;  %s5565_s30 = smov 125  }
 0x399   :  { %v3408_v59 = vpop.permute.xlu0 %1639 }
 0x39a   :  { %v3406_v58 = vpop.permute.xlu1 %1641 }
 0x39b   :  { %2220 = vrot.lane.b32.xlu0 %v3261_v42, %s3054_s10 }
 0x39c   :  { %2222 = vrot.lane.b32.xlu1 %v3264_v43, %s3054_s10 }
 0x39d   :  { %v3416_v61 = vpop.permute.xlu0 %1662 }
 0x39e   :  { %v3414_v60 = vpop.permute.xlu1 %1664 }
 0x39f   :  { %2381 = vrot.lane.b32.xlu0 %v3261_v42, %s5563_s9 }
 0x3a0   :  { %2383 = vrot.lane.b32.xlu1 %v3264_v43, %s5563_s9  ;;  %s5569_s9 = smov 99  }
 0x3a1   :  { %v3424_v63 = vpop.permute.xlu0 %1685 }
 0x3a2   :  { %v3422_v62 = vpop.permute.xlu1 %1687 }
 0x3a3   :  { %2243 = vrot.lane.b32.xlu0 %v3261_v42, %s5565_s30 }
 0x3a4   :  { %2245 = vrot.lane.b32.xlu1 %v3264_v43, %s5565_s30  ;;  %s5571_s30 = smov 83  }
 0x3a5   :  { %v3432_v7 = vpop.permute.xlu0 %1708 }
 0x3a6   :  { %v3430_v3 = vpop.permute.xlu1 %1710 }
 0x3a7   :  { %2404 = vrot.lane.b32.xlu0 %v3261_v42, %s5567_s1 }
 0x3a8   :  { %2406 = vrot.lane.b32.xlu1 %v3264_v43, %s5567_s1  ;;  %s5573_s1 = smov 98  }
 0x3a9   :  { %v3440_v11 = vpop.permute.xlu0 %1731 }
 0x3aa   :  { %v3438_v10 = vpop.permute.xlu1 %1733 }
 0x3ab   :  { %2427 = vrot.lane.b32.xlu0 %v3261_v42, %s5569_s9 }
 0x3ac   :  { %2429 = vrot.lane.b32.xlu1 %v3264_v43, %s5569_s9  ;;  %s5575_s9 = smov 82  }
 0x3ad   :  { %v3448_v14 = vpop.permute.xlu0 %1754 }
 0x3ae   :  { %v3446_v12 = vpop.permute.xlu1 %1756 }
 0x3af   :  { %2588 = vrot.lane.b32.xlu0 %v3261_v42, %s5571_s30 }
 0x3b0   :  { %2590 = vrot.lane.b32.xlu1 %v3264_v43, %s5571_s30  ;;  %s5577_s30 = smov 97  }
 0x3b1   :  { %v3456_v17 = vpop.permute.xlu0 %1777 }
 0x3b2   :  { %v3454_v16 = vpop.permute.xlu1 %1779 }
 0x3b3   :  { %2450 = vrot.lane.b32.xlu0 %v3261_v42, %s5573_s1 }
 0x3b4   :  { %2452 = vrot.lane.b32.xlu1 %v3264_v43, %s5573_s1  ;;  %s5579_s1 = smov 81  }
 0x3b5   :  { %v3464_v19 = vpop.permute.xlu0 %1800 }
 0x3b6   :  { %v3462_v18 = vpop.permute.xlu1 %1802 }
 0x3b7   :  { %2611 = vrot.lane.b32.xlu0 %v3261_v42, %s5575_s9 }
 0x3b8   :  { %2613 = vrot.lane.b32.xlu1 %v3264_v43, %s5575_s9  ;;  %s5581_s9 = smov 96  }
 0x3b9   :  { %v3472_v27 = vpop.permute.xlu0 %1823 }
 0x3ba   :  { %v3470_v25 = vpop.permute.xlu1 %1825 }
 0x3bb   :  { %2473 = vrot.lane.b32.xlu0 %v3261_v42, %s5577_s30 }
 0x3bc   :  { %2475 = vrot.lane.b32.xlu1 %v3264_v43, %s5577_s30  ;;  %s5583_s30 = smov 80  }
 0x3bd   :  { %v3480_v8 = vpop.permute.xlu0 %1846 }
 0x3be   :  { %v3478_v28 = vpop.permute.xlu1 %1848 }
 0x3bf   :  { %2634 = vrot.lane.b32.xlu0 %v3261_v42, %s5579_s1 }
 0x3c0   :  { %2636 = vrot.lane.b32.xlu1 %v3264_v43, %s5579_s1  ;;  %s5585_s1 = smov 95  }
 0x3c1   :  { %v3488_v29 = vpop.permute.xlu0 %1938 }
 0x3c2   :  { %v3486_v9 = vpop.permute.xlu1 %1940 }
 0x3c3   :  { %2496 = vrot.lane.b32.xlu0 %v3261_v42, %s5581_s9 }
 0x3c4   :  { %2498 = vrot.lane.b32.xlu1 %v3264_v43, %s5581_s9  ;;  %s5587_s9 = smov 79  }
 0x3c5   :  { %v3496_v2 = vpop.permute.xlu0 %1961 }
 0x3c6   :  { %v3494_v30 = vpop.permute.xlu1 %1963  ;;  %5730 = vst [vmem:[#allocation27_spill] sm:$0xff] %v3496_v2 }
 0x3c7   :  { %5729 = vst [vmem:[#allocation26_spill] sm:$0xff] %v3494_v30  ;;  %2657 = vrot.lane.b32.xlu0 %v3261_v42, %s5583_s30  ;;  %v3913_v30 = vld [vmem:[#allocation6 + $0x75] ss:$8 sm:$0x3] }
 0x3c8   :  { %2659 = vrot.lane.b32.xlu1 %v3264_v43, %s5583_s30  ;;  %s3068_s30 = smov 94   ;;  %5811 = vst [vmem:[#allocation102_spill] sm:$0xff] %v3913_v30 }
 0x3c9   :  { %v3504_v32 = vpop.permute.xlu0 %1984 }
 0x3ca   :  { %v3502_v31 = vpop.permute.xlu1 %1986  ;;  %5732 = vst [vmem:[#allocation29_spill] sm:$0xff] %v3504_v32  ;;  %v3888_v32 = vld [vmem:[#allocation6 + $0x82] ss:$8 sm:$0x3] }
 0x3cb   :  { %5731 = vst [vmem:[#allocation28_spill] sm:$0xff] %v3502_v31  ;;  %2519 = vrot.lane.b32.xlu0 %v3261_v42, %s5585_s1  ;;  %5807 = vst [vmem:[#allocation99_spill] sm:$0xff] %v3888_v32 }
 0x3cc   :  { %2521 = vrot.lane.b32.xlu1 %v3264_v43, %s5585_s1  ;;  %s3069_s1 = smov 78  }
 0x3cd   :  { %v3512_v35 = vpop.permute.xlu0 %2007 }
 0x3ce   :  { %v3510_v34 = vpop.permute.xlu1 %2009  ;;  %5734 = vst [vmem:[#allocation31_spill] sm:$0xff] %v3512_v35 }
 0x3cf   :  { %5733 = vst [vmem:[#allocation30_spill] sm:$0xff] %v3510_v34  ;;  %2680 = vrot.lane.b32.xlu0 %v3261_v42, %s5587_s9 }
 0x3d0   :  { %2682 = vrot.lane.b32.xlu1 %v3264_v43, %s5587_s9  ;;  %s3070_s9 = smov 93  }
 0x3d1   :  { %v3520_v45 = vpop.permute.xlu0 %1869 }
 0x3d2   :  { %v3518_v44 = vpop.permute.xlu1 %1871  ;;  %5736 = vst [vmem:[#allocation33_spill] sm:$0xff] %v3520_v45 }
 0x3d3   :  { %5735 = vst [vmem:[#allocation32_spill] sm:$0xff] %v3518_v44  ;;  %2542 = vrot.lane.b32.xlu0 %v3261_v42, %s3068_s30 }
 0x3d4   :  { %2544 = vrot.lane.b32.xlu1 %v3264_v43, %s3068_s30 }
 0x3d5   :  { %v3528_v1 = vpop.permute.xlu0 %2030 }
 0x3d6   :  { %v3526_v0 = vpop.permute.xlu1 %2032  ;;  %5738 = vst [vmem:[#allocation35_spill] sm:$0xff] %v3528_v1 }
 0x3d7   :  { %5737 = vst [vmem:[#allocation34_spill] sm:$0xff] %v3526_v0  ;;  %2703 = vrot.lane.b32.xlu0 %v3261_v42, %s3069_s1  ;;  %v3850_v0 = vld [vmem:[#allocation6 + $0x73] ss:$8 sm:$0x3] }
 0x3d8   :  { %2705 = vrot.lane.b32.xlu1 %v3264_v43, %s3069_s1 }
 0x3d9   :  { %v3536_v5 = vpop.permute.xlu0 %1892 }
 0x3da   :  { %v3534_v46 = vpop.permute.xlu1 %1894  ;;  %5740 = vst [vmem:[#allocation37_spill] sm:$0xff] %v3536_v5 }
 0x3db   :  { %5739 = vst [vmem:[#allocation36_spill] sm:$0xff] %v3534_v46  ;;  %2565 = vrot.lane.b32.xlu0 %v3261_v42, %s3070_s9  ;;  %v3845_v46 = vld [vmem:[#allocation6 + $0x71] ss:$8 sm:$0x3] }
 0x3dc   :  { %2567 = vrot.lane.b32.xlu1 %v3264_v43, %s3070_s9 }
 0x3dd   :  { %v3544_v48 = vpop.permute.xlu0 %2053 }
 0x3de   :  { %v3542_v47 = vpop.permute.xlu1 %2055  ;;  %5742 = vst [vmem:[#allocation39_spill] sm:$0xff] %v3544_v48 }
 0x3df   :  { %5741 = vst [vmem:[#allocation38_spill] sm:$0xff] %v3542_v47  ;;  %428 = vrot.lane.b32.xlu0 %v3549_v6, %s3025_s2  ;;  %v3816_v47 = vld [vmem:[#allocation6 + $0x70] ss:$8 sm:$0x3] }
 0x3e0   :  { %430 = vrot.lane.b32.xlu1 %v3554_v49, %s3025_s2  ;;  %s5795_s2 = smov 125  }
 0x3e1   :  { %v3562_v51 = vpop.permute.xlu0 %1915 }
 0x3e2   :  { %v3560_v50 = vpop.permute.xlu1 %1917  ;;  %5744 = vst [vmem:[#allocation41_spill] sm:$0xff] %v3562_v51 }
 0x3e3   :  { %5743 = vst [vmem:[#allocation40_spill] sm:$0xff] %v3560_v50  ;;  %451 = vrot.lane.b32.xlu0 %v3549_v6, %s3026_s3 }
 0x3e4   :  { %453 = vrot.lane.b32.xlu1 %v3554_v49, %s3026_s3  ;;  %s5801_s3 = smov 114  }
 0x3e5   :  { %v3570_v33 = vpop.permute.xlu0 %2076 }
 0x3e6   :  { %v3568_v4 = vpop.permute.xlu1 %2078  ;;  %5746 = vst [vmem:[#allocation43_spill] sm:$0xff] %v3570_v33 }
 0x3e7   :  { %5745 = vst [vmem:[#allocation42_spill] sm:$0xff] %v3568_v4  ;;  %475 = vrot.lane.b32.xlu0 %v3549_v6, %s3027_s4 }
 0x3e8   :  { %477 = vrot.lane.b32.xlu1 %v3554_v49, %s3027_s4  ;;  %s5802_s4 = smov 113  }
 0x3e9   :  { %v3578_v37 = vpop.permute.xlu0 %2099 }
 0x3ea   :  { %v3576_v36 = vpop.permute.xlu1 %2101  ;;  %5748 = vst [vmem:[#allocation45_spill] sm:$0xff] %v3578_v37  ;;  %v3810_v37 = vld [vmem:[#allocation6 + $0x66] ss:$8 sm:$0x3] }
 0x3eb   :  { %5747 = vst [vmem:[#allocation44_spill] sm:$0xff] %v3576_v36  ;;  %499 = vrot.lane.b32.xlu0 %v3549_v6, %s3028_s13 }
 0x3ec   :  { %501 = vrot.lane.b32.xlu1 %v3554_v49, %s3028_s13  ;;  %s5803_s13 = smov 112  }
 0x3ed   :  { %v3586_v40 = vpop.permute.xlu0 %2266 }
 0x3ee   :  { %v3584_v41 = vpop.permute.xlu1 %2268  ;;  %5750 = vst [vmem:[#allocation47_spill] sm:$0xff] %v3586_v40  ;;  %v3786_v40 = vld [vmem:[#allocation6 + $0x64] ss:$8 sm:$0x3] }
 0x3ef   :  { %5749 = vst [vmem:[#allocation46_spill] sm:$0xff] %v3584_v41  ;;  %523 = vrot.lane.b32.xlu0 %v3549_v6, %s3029_s14  ;;  %v3800_v41 = vld [vmem:[#allocation6 + $0x65] ss:$8 sm:$0x3] }
 0x3f0   :  { %525 = vrot.lane.b32.xlu1 %v3554_v49, %s3029_s14  ;;  %s5808_s14 = smov 111  }
 0x3f1   :  { %v3594_v38 = vpop.permute.xlu0 %2122 }
 0x3f2   :  { %v3592_v39 = vpop.permute.xlu1 %2124  ;;  %5752 = vst [vmem:[#allocation49_spill] sm:$0xff] %v3594_v38  ;;  %v459_v38 = vld [vmem:[#allocation6 + $0x1] ss:$8 sm:$0x3] }
 0x3f3   :  { %5751 = vst [vmem:[#allocation48_spill] sm:$0xff] %v3592_v39  ;;  %547 = vrot.lane.b32.xlu0 %v3549_v6, %s3030_s15  ;;  %v464_v48 = vrot.slane %v459_v38, %v3201_v13  ;;  %v468_v50 = vrot.slane %v459_v38, %v3204_v15 }
 0x3f4   :  { %549 = vrot.lane.b32.xlu1 %v3554_v49, %s3030_s15  ;;  %s5812_s15 = smov 110  }
 0x3f5   :  { %v3602_v20 = vpop.permute.xlu0 %2289 }
 0x3f6   :  { %v3600_v21 = vpop.permute.xlu1 %2291  ;;  %5754 = vst [vmem:[#allocation51_spill] sm:$0xff] %v3602_v20 }
 0x3f7   :  { %5753 = vst [vmem:[#allocation50_spill] sm:$0xff] %v3600_v21  ;;  %571 = vrot.lane.b32.xlu0 %v3549_v6, %s3031_s16 }
 0x3f8   :  { %573 = vrot.lane.b32.xlu1 %v3554_v49, %s3031_s16  ;;  %s5817_s16 = smov 109  }
 0x3f9   :  { %v3610_v23 = vpop.permute.xlu0 %2145 }
 0x3fa   :  { %v3608_v24 = vpop.permute.xlu1 %2147  ;;  %5756 = vst [vmem:[#allocation53_spill] sm:$0xff] %v3610_v23 }
 0x3fb   :  { %5755 = vst [vmem:[#allocation52_spill] sm:$0xff] %v3608_v24  ;;  %595 = vrot.lane.b32.xlu0 %v3549_v6, %s3032_s17  ;;  %v3784_v24 = vld [vmem:[#allocation6 + $0x63] ss:$8 sm:$0x3] }
 0x3fc   :  { %597 = vrot.lane.b32.xlu1 %v3554_v49, %s3032_s17  ;;  %s5822_s17 = smov 99  }
 0x3fd   :  { %v3618_v53 = vpop.permute.xlu0 %2312 }
 0x3fe   :  { %v3616_v26 = vpop.permute.xlu1 %2314  ;;  %5758 = vst [vmem:[#allocation55_spill] sm:$0xff] %v3618_v53 }
 0x3ff   :  { %5757 = vst [vmem:[#allocation54_spill] sm:$0xff] %v3616_v26  ;;  %619 = vrot.lane.b32.xlu0 %v3549_v6, %s3033_s18 }
 0x400   :  { %621 = vrot.lane.b32.xlu1 %v3554_v49, %s3033_s18  ;;  %s5827_s18 = smov 98  }
 0x401   :  { %v3626_v20 = vpop.permute.xlu0 %2335 }
 0x402   :  { %v3624_v52 = vpop.permute.xlu1 %2337  ;;  %5760 = vst [vmem:[#allocation57_spill] sm:$0xff] %v3626_v20 }
 0x403   :  { %5759 = vst [vmem:[#allocation56_spill] sm:$0xff] %v3624_v52  ;;  %643 = vrot.lane.b32.xlu0 %v3549_v6, %s3034_s19 }
 0x404   :  { %645 = vrot.lane.b32.xlu1 %v3554_v49, %s3034_s19  ;;  %s5829_s19 = smov 97  }
 0x405   :  { %v3634_v26 = vpop.permute.xlu0 %2197 }
 0x406   :  { %v3632_v21 = vpop.permute.xlu1 %2199  ;;  %5762 = vst [vmem:[#allocation59_spill] sm:$0xff] %v3634_v26 }
 0x407   :  { %5761 = vst [vmem:[#allocation58_spill] sm:$0xff] %v3632_v21  ;;  %667 = vrot.lane.b32.xlu0 %v3549_v6, %s3035_s20 }
 0x408   :  { %669 = vrot.lane.b32.xlu1 %v3554_v49, %s3035_s20  ;;  %s5830_s20 = smov 96  }
 0x409   :  { %v3642_v52 = vpop.permute.xlu0 %2358 }
 0x40a   :  { %v3640_v53 = vpop.permute.xlu1 %2360  ;;  %5764 = vst [vmem:[#allocation61_spill] sm:$0xff] %v3642_v52 }
 0x40b   :  { %5763 = vst [vmem:[#allocation60_spill] sm:$0xff] %v3640_v53  ;;  %691 = vrot.lane.b32.xlu0 %v3549_v6, %s3039_s24 }
 0x40c   :  { %693 = vrot.lane.b32.xlu1 %v3554_v49, %s3039_s24  ;;  %s5846_s24 = smov 81  }
 0x40d   :  { %v3650_v21 = vpop.permute.xlu0 %2220 }
 0x40e   :  { %v3648_v20 = vpop.permute.xlu1 %2222  ;;  %5766 = vst [vmem:[#allocation63_spill] sm:$0xff] %v3650_v21 }
 0x40f   :  { %5765 = vst [vmem:[#allocation62_spill] sm:$0xff] %v3648_v20  ;;  %715 = vrot.lane.b32.xlu0 %v3549_v6, %s3041_s25 }
 0x410   :  { %717 = vrot.lane.b32.xlu1 %v3554_v49, %s3041_s25  ;;  %s5850_s25 = smov 79  }
 0x411   :  { %v3658_v53 = vpop.permute.xlu0 %2381 }
 0x412   :  { %v3656_v26 = vpop.permute.xlu1 %2383  ;;  %5768 = vst [vmem:[#allocation65_spill] sm:$0xff] %v3658_v53 }
 0x413   :  { %5767 = vst [vmem:[#allocation64_spill] sm:$0xff] %v3656_v26  ;;  %739 = vrot.lane.b32.xlu0 %v3549_v6, %s3043_s26 }
 0x414   :  { %741 = vrot.lane.b32.xlu1 %v3554_v49, %s3043_s26 }
 0x415   :  { %v3666_v20 = vpop.permute.xlu0 %2243 }
 0x416   :  { %v3664_v52 = vpop.permute.xlu1 %2245  ;;  %5770 = vst [vmem:[#allocation67_spill] sm:$0xff] %v3666_v20 }
 0x417   :  { %5769 = vst [vmem:[#allocation66_spill] sm:$0xff] %v3664_v52  ;;  %763 = vrot.lane.b32.xlu0 %v3549_v6, %s3036_s21 }
 0x418   :  { %765 = vrot.lane.b32.xlu1 %v3554_v49, %s3036_s21  ;;  %s5833_s21 = smov 95  }
 0x419   :  { %v3674_v26 = vpop.permute.xlu0 %2404 }
 0x41a   :  { %v3672_v21 = vpop.permute.xlu1 %2406  ;;  %5772 = vst [vmem:[#allocation69_spill] sm:$0xff] %v3674_v26 }
 0x41b   :  { %5771 = vst [vmem:[#allocation68_spill] sm:$0xff] %v3672_v21  ;;  %787 = vrot.lane.b32.xlu0 %v3549_v6, %s3037_s22 }
 0x41c   :  { %789 = vrot.lane.b32.xlu1 %v3554_v49, %s3037_s22  ;;  %s5840_s22 = smov 83  }
 0x41d   :  { %v3682_v52 = vpop.permute.xlu0 %2427 }
 0x41e   :  { %v3680_v53 = vpop.permute.xlu1 %2429  ;;  %5774 = vst [vmem:[#allocation71_spill] sm:$0xff] %v3682_v52 }
 0x41f   :  { %5773 = vst [vmem:[#allocation70_spill] sm:$0xff] %v3680_v53  ;;  %811 = vrot.lane.b32.xlu0 %v3549_v6, %s3038_s23 }
 0x420   :  { %813 = vrot.lane.b32.xlu1 %v3554_v49, %s3038_s23  ;;  %s5843_s23 = smov 82  }
 0x421   :  { %v3690_v21 = vpop.permute.xlu0 %2588 }
 0x422   :  { %v3688_v20 = vpop.permute.xlu1 %2590  ;;  %5776 = vst [vmem:[#allocation73_spill] sm:$0xff] %v3690_v21 }
 0x423   :  { %5775 = vst [vmem:[#allocation72_spill] sm:$0xff] %v3688_v20  ;;  %835 = vrot.lane.b32.xlu0 %v3549_v6, %s3020_s12 }
 0x424   :  { %837 = vrot.lane.b32.xlu1 %v3554_v49, %s3020_s12 }
 0x425   :  { %v3698_v53 = vpop.permute.xlu0 %2450 }
 0x426   :  { %v3696_v26 = vpop.permute.xlu1 %2452  ;;  %5778 = vst [vmem:[#allocation75_spill] sm:$0xff] %v3698_v53 }
 0x427   :  { %5777 = vst [vmem:[#allocation74_spill] sm:$0xff] %v3696_v26  ;;  %859 = vrot.lane.b32.xlu0 %v3549_v6, %s3040_s0 }
 0x428   :  { %861 = vrot.lane.b32.xlu1 %v3554_v49, %s3040_s0  ;;  %s5849_s0 = smov 80  }
 0x429   :  { %v3706_v20 = vpop.permute.xlu0 %2611 }
 0x42a   :  { %v3704_v52 = vpop.permute.xlu1 %2613  ;;  %5780 = vst [vmem:[#allocation77_spill] sm:$0xff] %v3706_v20 }
 0x42b   :  { %5779 = vst [vmem:[#allocation76_spill] sm:$0xff] %v3704_v52  ;;  %883 = vrot.lane.b32.xlu0 %v3549_v6, %s3042_s5 }
 0x42c   :  { %885 = vrot.lane.b32.xlu1 %v3554_v49, %s3042_s5  ;;  %s3071_s5 = smov 77  }
 0x42d   :  { %v3714_v26 = vpop.permute.xlu0 %2473 }
 0x42e   :  { %v3712_v21 = vpop.permute.xlu1 %2475  ;;  %5782 = vst [vmem:[#allocation79_spill] sm:$0xff] %v3714_v26 }
 0x42f   :  { %5781 = vst [vmem:[#allocation78_spill] sm:$0xff] %v3712_v21  ;;  %907 = vrot.lane.b32.xlu0 %v3549_v6, %s3044_s27 }
 0x430   :  { %909 = vrot.lane.b32.xlu1 %v3554_v49, %s3044_s27 }
 0x431   :  { %v3722_v52 = vpop.permute.xlu0 %2634 }
 0x432   :  { %v3720_v53 = vpop.permute.xlu1 %2636  ;;  %5784 = vst [vmem:[#allocation81_spill] sm:$0xff] %v3722_v52 }
 0x433   :  { %5783 = vst [vmem:[#allocation80_spill] sm:$0xff] %v3720_v53  ;;  %931 = vrot.lane.b32.xlu0 %v3549_v6, %s3045_s28 }
 0x434   :  { %933 = vrot.lane.b32.xlu1 %v3554_v49, %s3045_s28 }
 0x435   :  { %v3730_v21 = vpop.permute.xlu0 %2496 }
 0x436   :  { %v3728_v20 = vpop.permute.xlu1 %2498  ;;  %5786 = vst [vmem:[#allocation83_spill] sm:$0xff] %v3730_v21 }
 0x437   :  { %5785 = vst [vmem:[#allocation82_spill] sm:$0xff] %v3728_v20  ;;  %955 = vrot.lane.b32.xlu0 %v3549_v6, %s3047_s29 }
 0x438   :  { %957 = vrot.lane.b32.xlu1 %v3554_v49, %s3047_s29 }
 0x439   :  { %v3738_v53 = vpop.permute.xlu0 %2657 }
 0x43a   :  { %v3736_v26 = vpop.permute.xlu1 %2659  ;;  %5788 = vst [vmem:[#allocation85_spill] sm:$0xff] %v3738_v53 }
 0x43b   :  { %5787 = vst [vmem:[#allocation84_spill] sm:$0xff] %v3736_v26  ;;  %979 = vrot.lane.b32.xlu0 %v3549_v6, %s3049_s8 }
 0x43c   :  { %981 = vrot.lane.b32.xlu1 %v3554_v49, %s3049_s8 }
 0x43d   :  { %v3746_v20 = vpop.permute.xlu0 %2519 }
 0x43e   :  { %v3744_v52 = vpop.permute.xlu1 %2521  ;;  %5790 = vst [vmem:[#allocation87_spill] sm:$0xff] %v3746_v20 }
 0x43f   :  { %5789 = vst [vmem:[#allocation86_spill] sm:$0xff] %v3744_v52  ;;  %1032 = vrot.lane.b32.xlu0 %v3549_v6, %s3052_s11 }
 0x440   :  { %1034 = vrot.lane.b32.xlu1 %v3554_v49, %s3052_s11  ;;  %s5798_s11 = smov 115  }
 0x441   :  { %v3754_v26 = vpop.permute.xlu0 %2680 }
 0x442   :  { %v3752_v21 = vpop.permute.xlu1 %2682  ;;  %5792 = vst [vmem:[#allocation89_spill] sm:$0xff] %v3754_v26  ;;  %v3776_v26 = vld [vmem:[#allocation6 + $0x61] ss:$8 sm:$0x3] }
 0x443   :  { %5791 = vst [vmem:[#allocation88_spill] sm:$0xff] %v3752_v21  ;;  %1056 = vrot.lane.b32.xlu0 %v3549_v6, %s3054_s10 }
 0x444   :  { %1058 = vrot.lane.b32.xlu1 %v3554_v49, %s3054_s10 }
 0x445   :  { %v3762_v52 = vpop.permute.xlu0 %2542 }
 0x446   :  { %v3760_v53 = vpop.permute.xlu1 %2544  ;;  %5794 = vst [vmem:[#allocation91_spill] sm:$0xff] %v3762_v52 }
 0x447   :  { %5793 = vst [vmem:[#allocation90_spill] sm:$0xff] %v3760_v53  ;;  %1080 = vrot.lane.b32.xlu0 %v3549_v6, %s5795_s2  ;;  %v3778_v53 = vld [vmem:[#allocation6 + $0x62] ss:$8 sm:$0x3] }
 0x448   :  { %1082 = vrot.lane.b32.xlu1 %v3554_v49, %s5795_s2 }
 0x449   :  { %v3770_v21 = vpop.permute.xlu0 %2703 }
 0x44a   :  { %v3768_v20 = vpop.permute.xlu1 %2705  ;;  %5797 = vst [vmem:[#allocation93_spill] sm:$0xff] %v3770_v21  ;;  %v435_v21 = vld [vmem:[#allocation6] ss:$8 sm:$0x3] }
 0x44b   :  { %5796 = vst [vmem:[#allocation92_spill] sm:$0xff] %v3768_v20  ;;  %1104 = vrot.lane.b32.xlu0 %v3549_v6, %s5798_s11  ;;  %v440_v39 = vrot.slane %v435_v21, %v3201_v13  ;;  %v444_v51 = vrot.slane %v435_v21, %v3204_v15 }
 0x44c   :  { %1106 = vrot.lane.b32.xlu1 %v3554_v49, %s5798_s11 }
 0x44d   :  { %v3782_v23 = vpop.permute.xlu0 %2565 }
 0x44e   :  { %v3780_v52 = vpop.permute.xlu1 %2567  ;;  %5800 = vst [vmem:[#allocation95_spill] sm:$0xff] %v3782_v23  ;;  %v3812_v23 = vld [vmem:[#allocation6 + $0x67] ss:$8 sm:$0x3] }
 0x44f   :  { %5799 = vst [vmem:[#allocation94_spill] sm:$0xff] %v3780_v52  ;;  %1128 = vrot.lane.b32.xlu0 %v3549_v6, %s5801_s3  ;;  %v483_v52 = vld [vmem:[#allocation6 + $0x2] ss:$8 sm:$0x3] }
 0x450   :  { %1130 = vrot.lane.b32.xlu1 %v3554_v49, %s5801_s3  ;;  %v492_v45 = vrot.slane %v483_v52, %v3204_v15 }
 0x451   :  { %v429_v36 = vpop.permute.xlu0 %428 }
 0x452   :  { %v431_v20 = vpop.permute.xlu1 %430 }
 0x453   :  { %v433_v33 = vsel %vm432_vm8, %v429_v36, %v431_v20  ;;  %v434_v4 = vsel %vm432_vm8, %v431_v20, %v429_v36  ;;  %1152 = vrot.lane.b32.xlu0 %v3549_v6, %s5802_s4  ;;  %v488_v36 = vrot.slane %v483_v52, %v3201_v13 }
 0x454   :  { %1154 = vrot.lane.b32.xlu1 %v3554_v49, %s5802_s4  ;;  %v447_v21 = vmul.f32 %v440_v39, %v434_v4  ;;  %v448_v38 = vmul.f32 %v444_v51, %v433_v33  ;;  %v507_v39 = vld [vmem:[#allocation6 + $0x3] ss:$8 sm:$0x3]  ;;  %v3877_v51 = vld [vmem:[#allocation6 + $0x80] ss:$8 sm:$0x3] }
 0x455   :  { %v452_v1 = vpop.permute.xlu0 %451  ;;  %5805 = vst [vmem:[#allocation97_spill] sm:$0xff] %v3877_v51 }
 0x456   :  { %v454_v20 = vpop.permute.xlu1 %453 }
 0x457   :  { %v456_v54 = vsel %vm455_vm9, %v452_v1, %v454_v20  ;;  %v457_v5 = vsel %vm455_vm9, %v454_v20, %v452_v1  ;;  %1176 = vrot.lane.b32.xlu0 %v3549_v6, %s5803_s13 }
 0x458   :  { %v471_v44 = vmul.f32 %v464_v48, %v457_v5  ;;  %v472_v35 = vmul.f32 %v468_v50, %v456_v54  ;;  %1178 = vrot.lane.b32.xlu1 %v3554_v49, %s5803_s13  ;;  %v3875_v50 = vld [vmem:[#allocation6 + $0x77] ss:$8 sm:$0x3]  ;;  %v3881_v5 = vld [vmem:[#allocation6 + $0x81] ss:$8 sm:$0x3]  ;;  %v512_v48 = vrot.slane %v507_v39, %v3201_v13 }
 0x459   :  { %5804 = vst [vmem:[#allocation96_spill] sm:$0xff] %v3875_v50  ;;  %v476_v1 = vpop.permute.xlu0 %475  ;;  %5806 = vst [vmem:[#allocation98_spill] sm:$0xff] %v3881_v5 }
 0x45a   :  { %v473_v33 = vadd.f32 %v471_v44, %v447_v21  ;;  %v474_v20 = vadd.f32 %v472_v35, %v448_v38  ;;  %v478_v4 = vpop.permute.xlu1 %477  ;;  %v516_v35 = vrot.slane %v507_v39, %v3204_v15  ;;  %v531_v21 = vld [vmem:[#allocation6 + $0x4] ss:$8 sm:$0x3]  ;;  %v3907_v39 = vld [vmem:[#allocation6 + $0x74] ss:$8 sm:$0x3] }
 0x45b   :  { %v480_v34 = vsel %vm479_vm10, %v476_v1, %v478_v4  ;;  %v481_v54 = vsel %vm479_vm10, %v478_v4, %v476_v1  ;;  %1200 = vrot.lane.b32.xlu0 %v3549_v6, %s5808_s14  ;;  %5809 = vst [vmem:[#allocation100_spill] sm:$0xff] %v3907_v39 }
 0x45c   :  { %v495_v31 = vmul.f32 %v488_v36, %v481_v54  ;;  %v496_v44 = vmul.f32 %v492_v45, %v480_v34  ;;  %1202 = vrot.lane.b32.xlu1 %v3554_v49, %s5808_s14  ;;  %v3909_v54 = vld [vmem:[#allocation6 + $0x83] ss:$8 sm:$0x3]  ;;  %v536_v36 = vrot.slane %v531_v21, %v3201_v13 }
 0x45d   :  { %5810 = vst [vmem:[#allocation101_spill] sm:$0xff] %v3909_v54  ;;  %v500_v4 = vpop.permute.xlu0 %499  ;;  %v3952_v54 = vld [vmem:[#allocation6 + $0x86] ss:$8 sm:$0x3] }
 0x45e   :  { %v497_v38 = vadd.f32 %v495_v31, %v473_v33  ;;  %v498_v52 = vadd.f32 %v496_v44, %v474_v20  ;;  %v502_v2 = vpop.permute.xlu1 %501  ;;  %v540_v33 = vrot.slane %v531_v21, %v3204_v15  ;;  %v555_v20 = vld [vmem:[#allocation6 + $0x5] ss:$8 sm:$0x3]  ;;  %5816 = vst [vmem:[#allocation106_spill] sm:$0xff] %v3952_v54 }
 0x45f   :  { %v504_v34 = vsel %vm503_vm11, %v500_v4, %v502_v2  ;;  %v505_v45 = vsel %vm503_vm11, %v502_v2, %v500_v4  ;;  %1224 = vrot.lane.b32.xlu0 %v3549_v6, %s5812_s15  ;;  %v560_v21 = vrot.slane %v555_v20, %v3201_v13 }
 0x460   :  { %v519_v5 = vmul.f32 %v512_v48, %v505_v45  ;;  %v520_v31 = vmul.f32 %v516_v35, %v504_v34  ;;  %1226 = vrot.lane.b32.xlu1 %v3554_v49, %s5812_s15  ;;  %v3939_v34 = vld [vmem:[#allocation6 + $0x84] ss:$8 sm:$0x3]  ;;  %v3941_v45 = vld [vmem:[#allocation6 + $0x76] ss:$8 sm:$0x3] }
 0x461   :  { %5813 = vst [vmem:[#allocation103_spill] sm:$0xff] %v3939_v34  ;;  %5814 = vst [vmem:[#allocation104_spill] sm:$0xff] %v3941_v45  ;;  %v524_v32 = vpop.permute.xlu0 %523  ;;  %v3945_v48 = vld [vmem:[#allocation6 + $0x85] ss:$8 sm:$0x3] }
 0x462   :  { %v521_v44 = vadd.f32 %v519_v5, %v497_v38  ;;  %v522_v2 = vadd.f32 %v520_v31, %v498_v52  ;;  %v526_v1 = vpop.permute.xlu1 %525  ;;  %5815 = vst [vmem:[#allocation105_spill] sm:$0xff] %v3945_v48  ;;  %v564_v52 = vrot.slane %v555_v20, %v3204_v15  ;;  %v579_v38 = vld [vmem:[#allocation6 + $0x6] ss:$8 sm:$0x3] }
 0x463   :  { %v528_v39 = vsel %vm527_vm12, %v524_v32, %v526_v1  ;;  %v529_v35 = vsel %vm527_vm12, %v526_v1, %v524_v32  ;;  %1248 = vrot.lane.b32.xlu0 %v3549_v6, %s5817_s16  ;;  %v3971_v20 = vld [vmem:[#allocation6 + $0x95] ss:$8 sm:$0x3]  ;;  %v3977_v34 = vld [vmem:[#allocation6 + $0x96] ss:$8 sm:$0x3] }
 0x464   :  { %v543_v51 = vmul.f32 %v536_v36, %v529_v35  ;;  %v544_v5 = vmul.f32 %v540_v33, %v528_v39  ;;  %1250 = vrot.lane.b32.xlu1 %v3554_v49, %s5817_s16  ;;  %5818 = vst [vmem:[#allocation107_spill] sm:$0xff] %v3971_v20  ;;  %v3973_v35 = vld [vmem:[#allocation6 + $0x87] ss:$8 sm:$0x3]  ;;  %5820 = vst [vmem:[#allocation109_spill] sm:$0xff] %v3977_v34  ;;  %v584_v33 = vrot.slane %v579_v38, %v3201_v13 }
 0x465   :  { %5819 = vst [vmem:[#allocation108_spill] sm:$0xff] %v3973_v35  ;;  %v548_v32 = vpop.permute.xlu0 %547  ;;  %v3985_v48 = vld [vmem:[#allocation6 + $0x90] ss:$8 sm:$0x3] }
 0x466   :  { %v545_v31 = vadd.f32 %v543_v51, %v521_v44  ;;  %v546_v4 = vadd.f32 %v544_v5, %v522_v2  ;;  %v550_v30 = vpop.permute.xlu1 %549  ;;  %5821 = vst [vmem:[#allocation110_spill] sm:$0xff] %v3985_v48  ;;  %v588_v2 = vrot.slane %v579_v38, %v3204_v15  ;;  %v4006_v38 = vld [vmem:[#allocation6 + $0xa0] ss:$8 sm:$0x3] }
 0x467   :  { %v552_v36 = vsel %vm551_vm13, %v548_v32, %v550_v30  ;;  %v553_v39 = vsel %vm551_vm13, %v550_v30, %v548_v32  ;;  %1272 = vrot.lane.b32.xlu0 %v3549_v6, %s5822_s17  ;;  %5824 = vst [vmem:[#allocation112_spill] sm:$0xff] %v4006_v38  ;;  %v4012_v20 = vld [vmem:[#allocation6 + $0x92] ss:$8 sm:$0x3] }
 0x468   :  { %v567_v51 = vmul.f32 %v560_v21, %v553_v39  ;;  %v568_v44 = vmul.f32 %v564_v52, %v552_v36  ;;  %1274 = vrot.lane.b32.xlu1 %v3554_v49, %s5822_s17  ;;  %v4004_v39 = vld [vmem:[#allocation6 + $0x97] ss:$8 sm:$0x3]  ;;  %5825 = vst [vmem:[#allocation113_spill] sm:$0xff] %v4012_v20 }
 0x469   :  { %5823 = vst [vmem:[#allocation111_spill] sm:$0xff] %v4004_v39  ;;  %v572_v30 = vpop.permute.xlu0 %571  ;;  %v603_v32 = vld [vmem:[#allocation6 + $0x7] ss:$8 sm:$0x3] }
 0x46a   :  { %v569_v5 = vadd.f32 %v567_v51, %v545_v31  ;;  %v570_v1 = vadd.f32 %v568_v44, %v546_v4  ;;  %v574_v54 = vpop.permute.xlu1 %573  ;;  %v4020_v4 = vld [vmem:[#allocation6 + $0xa1] ss:$8 sm:$0x3]  ;;  %v4038_v31 = vld [vmem:[#allocation6 + $0x93] ss:$8 sm:$0x3]  ;;  %v608_v38 = vrot.slane %v603_v32, %v3201_v13 }
 0x46b   :  { %v576_v52 = vsel %vm575_vm14, %v572_v30, %v574_v54  ;;  %v577_v36 = vsel %vm575_vm14, %v574_v54, %v572_v30  ;;  %5826 = vst [vmem:[#allocation114_spill] sm:$0xff] %v4020_v4  ;;  %1296 = vrot.lane.b32.xlu0 %v3549_v6, %s5827_s18  ;;  %5828 = vst [vmem:[#allocation115_spill] sm:$0xff] %v4038_v31  ;;  %v4040_v34 = vld [vmem:[#allocation6 + $0xa2] ss:$8 sm:$0x3] }
 0x46c   :  { %v591_v51 = vmul.f32 %v584_v33, %v577_v36  ;;  %v592_v44 = vmul.f32 %v588_v2, %v576_v52  ;;  %1298 = vrot.lane.b32.xlu1 %v3554_v49, %s5827_s18  ;;  %v627_v2 = vld [vmem:[#allocation6 + $0x10] ss:$8 sm:$0x3]  ;;  %v651_v20 = vld [vmem:[#allocation6 + $0x11] ss:$8 sm:$0x3]  ;;  %v1621_v33 = vsel %vm432_vm8, %v3398_v56, %v3400_v57 }
 0x46d   :  { %v596_v30 = vpop.permute.xlu0 %595  ;;  %v656_v31 = vrot.slane %v651_v20, %v3201_v13  ;;  %v660_v45 = vrot.slane %v651_v20, %v3204_v15  ;;  %v5831_v20 = vrot.slane %v3776_v26, %v3201_v13 }
 0x46e   :  { %v4042_v21 = vadd.f32 %v591_v51, %v569_v5  ;;  %v4044_v54 = vadd.f32 %v592_v44, %v570_v1  ;;  %v598_v39 = vpop.permute.xlu1 %597  ;;  %v612_v5 = vrot.slane %v603_v32, %v3204_v15  ;;  %v632_v1 = vrot.slane %v627_v2, %v3201_v13 }
 0x46f   :  { %v600_v52 = vsel %vm599_vm15, %v596_v30, %v598_v39  ;;  %v601_v36 = vsel %vm599_vm15, %v598_v39, %v596_v30  ;;  %1320 = vrot.lane.b32.xlu0 %v3549_v6, %s5829_s19  ;;  %v636_v51 = vrot.slane %v627_v2, %v3204_v15  ;;  %v1644_v2 = vsel %vm455_vm9, %v3406_v58, %v3408_v59  ;;  %v4079_v39 = vld [vmem:[#allocation6 + $0x94] ss:$8 sm:$0x3] }
 0x470   :  { %1322 = vrot.lane.b32.xlu1 %v3554_v49, %s5829_s19  ;;  %v615_v32 = vmul.f32 %v608_v38, %v601_v36  ;;  %v616_v50 = vmul.f32 %v612_v5, %v600_v52  ;;  %v675_v38 = vld [vmem:[#allocation6 + $0x12] ss:$8 sm:$0x3]  ;;  %v1620_v36 = vsel %vm432_vm8, %v3400_v57, %v3398_v56  ;;  %v1643_v52 = vsel %vm455_vm9, %v3408_v59, %v3406_v58  ;;  %v4110_v56 = vld [vmem:[#allocation6 + $0xa3] ss:$8 sm:$0x3] }
 0x471   :  { %v620_v30 = vpop.permute.xlu0 %619  ;;  %v5832_v5 = vrot.slane %v3778_v53, %v3201_v13  ;;  %v680_v59 = vrot.slane %v675_v38, %v3201_v13  ;;  %vm815_vm8 = vcmp.lt.s32.totalorder %v3182_v22, 17  ;;  %vm839_vm9 = vcmp.lt.s32.totalorder %v3182_v22, 16 }
 0x472   :  { %v622_v4 = vpop.permute.xlu1 %621 }
 0x473   :  { %v624_v48 = vsel %vm623_vm0, %v620_v30, %v622_v4  ;;  %v625_v35 = vsel %vm623_vm0, %v622_v4, %v620_v30  ;;  %1344 = vrot.lane.b32.xlu0 %v3549_v6, %s5830_s20  ;;  %v1635_v4 = vmul.f32 %v5831_v20, %v1621_v33  ;;  %v1667_v20 = vsel %vm479_vm10, %v3414_v60, %v3416_v61 }
 0x474   :  { %v639_v42 = vmul.f32 %v632_v1, %v625_v35  ;;  %v640_v44 = vmul.f32 %v636_v51, %v624_v48  ;;  %1346 = vrot.lane.b32.xlu1 %v3554_v49, %s5830_s20  ;;  %v1658_v1 = vmul.f32 %v5832_v5, %v1644_v2 }
 0x475   :  { %v644_v30 = vpop.permute.xlu0 %643 }
 0x476   :  { %v641_v57 = vadd.f32 %v639_v42, %v615_v32  ;;  %v642_v51 = vadd.f32 %v640_v44, %v616_v50  ;;  %v646_v33 = vpop.permute.xlu1 %645  ;;  %v684_v50 = vrot.slane %v675_v38, %v3204_v15  ;;  %v699_v44 = vld [vmem:[#allocation6 + $0x13] ss:$8 sm:$0x3]  ;;  %v5834_v32 = vrot.slane %v3776_v26, %v3204_v15 }
 0x477   :  { %v648_v48 = vsel %vm647_vm1, %v644_v30, %v646_v33  ;;  %v649_v58 = vsel %vm647_vm1, %v646_v33, %v644_v30  ;;  %1368 = vrot.lane.b32.xlu0 %v3549_v6, %s5833_s21  ;;  %v5835_v33 = vrot.slane %v3778_v53, %v3204_v15  ;;  %v1666_v38 = vsel %vm479_vm10, %v3416_v61, %v3414_v60 }
 0x478   :  { %v663_v2 = vmul.f32 %v656_v31, %v649_v58  ;;  %v664_v42 = vmul.f32 %v660_v45, %v648_v48  ;;  %1370 = vrot.lane.b32.xlu1 %v3554_v49, %s5833_s21  ;;  %v1636_v5 = vmul.f32 %v5834_v32, %v1620_v36  ;;  %v2416_v45 = vrot.slane %v4110_v56, %v3201_v13  ;;  %v4141_v58 = vld [vmem:[#allocation6 + $0xa4] ss:$8 sm:$0x3] }
 0x479   :  { %v1659_v30 = vmul.f32 %v5835_v33, %v1643_v52  ;;  %v2420_v31 = vrot.slane %v4110_v56, %v3204_v15  ;;  %v1660_v48 = vadd.f32 %v1658_v1, %v1635_v4  ;;  %v668_v35 = vpop.permute.xlu0 %667  ;;  %v5836_v53 = vrot.slane %v3784_v24, %v3201_v13 }
 0x47a   :  { %v665_v26 = vadd.f32 %v663_v2, %v641_v57  ;;  %v666_v36 = vadd.f32 %v664_v42, %v642_v51  ;;  %v670_v32 = vpop.permute.xlu1 %669  ;;  %v704_v1 = vrot.slane %v699_v44, %v3201_v13  ;;  %v708_v57 = vrot.slane %v699_v44, %v3204_v15  ;;  %v723_v51 = vld [vmem:[#allocation6 + $0x14] ss:$8 sm:$0x3] }
 0x47b   :  { %v1681_v52 = vmul.f32 %v5836_v53, %v1667_v20  ;;  %v672_v33 = vsel %vm671_vm2, %v668_v35, %v670_v32  ;;  %v673_v4 = vsel %vm671_vm2, %v670_v32, %v668_v35  ;;  %1392 = vrot.lane.b32.xlu0 %v3549_v6, %s3068_s30  ;;  %v1661_v20 = vadd.f32 %v1659_v30, %v1636_v5  ;;  %v4172_v5 = vld [vmem:[#allocation6 + $0xb3] ss:$8 sm:$0x3] }
 0x47c   :  { %v687_v60 = vmul.f32 %v680_v59, %v673_v4  ;;  %v688_v61 = vmul.f32 %v684_v50, %v672_v33  ;;  %1394 = vrot.lane.b32.xlu1 %v3554_v49, %s3068_s30  ;;  %v5837_v2 = vrot.slane %v3784_v24, %v3204_v15  ;;  %v1689_v50 = vsel %vm503_vm11, %v3424_v63, %v3422_v62 }
 0x47d   :  { %v1690_v44 = vsel %vm503_vm11, %v3422_v62, %v3424_v63  ;;  %v692_v32 = vpop.permute.xlu0 %691  ;;  %v1683_v53 = vadd.f32 %v1681_v52, %v1660_v48  ;;  %v732_v62 = vrot.slane %v723_v51, %v3204_v15  ;;  %v747_v63 = vld [vmem:[#allocation6 + $0x15] ss:$8 sm:$0x3]  ;;  %v5839_v52 = vrot.slane %v3786_v40, %v3204_v15 }
 0x47e   :  { %v1682_v35 = vmul.f32 %v5837_v2, %v1666_v38  ;;  %v689_v24 = vadd.f32 %v687_v60, %v665_v26  ;;  %v690_v30 = vadd.f32 %v688_v61, %v666_v36  ;;  %v694_v38 = vpop.permute.xlu1 %693  ;;  %v728_v2 = vrot.slane %v723_v51, %v3201_v13  ;;  %v4200_v51 = vld [vmem:[#allocation6 + $0xa5] ss:$8 sm:$0x3] }
 0x47f   :  { %v696_v33 = vsel %vm695_vm3, %v692_v32, %v694_v38  ;;  %v697_v4 = vsel %vm695_vm3, %v694_v38, %v692_v32  ;;  %1416 = vrot.lane.b32.xlu0 %v3549_v6, %s3070_s9  ;;  %v5838_v26 = vrot.slane %v3786_v40, %v3201_v13  ;;  %v1705_v60 = vmul.f32 %v5839_v52, %v1689_v50 }
 0x480   :  { %v711_v59 = vmul.f32 %v704_v1, %v697_v4  ;;  %v712_v42 = vmul.f32 %v708_v57, %v696_v33  ;;  %1418 = vrot.lane.b32.xlu1 %v3554_v49, %s3070_s9  ;;  %v1684_v48 = vadd.f32 %v1682_v35, %v1661_v20  ;;  %v2600_v1 = vrot.slane %v4172_v5, %v3201_v13 }
 0x481   :  { %v1704_v36 = vmul.f32 %v5838_v26, %v1690_v44  ;;  %v1713_v61 = vsel %vm527_vm12, %v3430_v3, %v3432_v7  ;;  %v2604_v57 = vrot.slane %v4172_v5, %v3204_v15  ;;  %v716_v40 = vpop.permute.xlu0 %715  ;;  %v1712_v50 = vsel %vm527_vm12, %v3432_v7, %v3430_v3  ;;  %v771_v7 = vld [vmem:[#allocation6 + $0x16] ss:$8 sm:$0x3] }
 0x482   :  { %v713_v20 = vadd.f32 %v711_v59, %v689_v24  ;;  %v714_v35 = vadd.f32 %v712_v42, %v690_v30  ;;  %v718_v44 = vpop.permute.xlu1 %717  ;;  %v752_v33 = vrot.slane %v747_v63, %v3201_v13  ;;  %v756_v3 = vrot.slane %v747_v63, %v3204_v15 }
 0x483   :  { %v720_v38 = vsel %vm719_vm4, %v716_v40, %v718_v44  ;;  %v721_v32 = vsel %vm719_vm4, %v718_v44, %v716_v40  ;;  %1440 = vrot.lane.b32.xlu0 %v3549_v6, %s5840_s22  ;;  %v1706_v42 = vadd.f32 %v1704_v36, %v1683_v53  ;;  %v1707_v24 = vadd.f32 %v1705_v60, %v1684_v48 }
 0x484   :  { %v735_v4 = vmul.f32 %v728_v2, %v721_v32  ;;  %v736_v59 = vmul.f32 %v732_v62, %v720_v38  ;;  %1442 = vrot.lane.b32.xlu1 %v3554_v49, %s5840_s22  ;;  %v5841_v30 = vrot.slane %v3800_v41, %v3201_v13  ;;  %v2462_v52 = vrot.slane %v4200_v51, %v3201_v13 }
 0x485   :  { %v1735_v2 = vsel %vm551_vm13, %v3440_v11, %v3438_v10  ;;  %v1736_v62 = vsel %vm551_vm13, %v3438_v10, %v3440_v11  ;;  %v740_v36 = vpop.permute.xlu0 %739  ;;  %v5842_v60 = vrot.slane %v3800_v41, %v3204_v15  ;;  %v776_v38 = vrot.slane %v771_v7, %v3201_v13  ;;  %v795_v11 = vld [vmem:[#allocation6 + $0x17] ss:$8 sm:$0x3] }
 0x486   :  { %v1727_v26 = vmul.f32 %v5841_v30, %v1713_v61  ;;  %v737_v63 = vadd.f32 %v735_v4, %v713_v20  ;;  %v738_v53 = vadd.f32 %v736_v59, %v714_v35  ;;  %v742_v48 = vpop.permute.xlu1 %741  ;;  %v780_v41 = vrot.slane %v771_v7, %v3204_v15 }
 0x487   :  { %v1728_v61 = vmul.f32 %v5842_v60, %v1712_v50  ;;  %v744_v44 = vsel %vm743_vm6, %v740_v36, %v742_v48  ;;  %v745_v40 = vsel %vm743_vm6, %v742_v48, %v740_v36  ;;  %1464 = vrot.lane.b32.xlu0 %v3549_v6, %s5843_s23  ;;  %v5844_v35 = vrot.slane %v3810_v37, %v3201_v13 }
 0x488   :  { %v759_v32 = vmul.f32 %v752_v33, %v745_v40  ;;  %v760_v10 = vmul.f32 %v756_v3, %v744_v44  ;;  %1466 = vrot.lane.b32.xlu1 %v3554_v49, %s5843_s23  ;;  %v1729_v20 = vadd.f32 %v1727_v26, %v1706_v42  ;;  %v5845_v4 = vrot.slane %v3810_v37, %v3204_v15  ;;  %v4261_v42 = vld [vmem:[#allocation6 + $0xb4] ss:$8 sm:$0x3] }
 0x489   :  { %v1750_v50 = vmul.f32 %v5844_v35, %v1736_v62  ;;  %v2466_v33 = vrot.slane %v4200_v51, %v3204_v15  ;;  %v1758_v3 = vsel %vm575_vm14, %v3448_v14, %v3446_v12  ;;  %v1759_v7 = vsel %vm575_vm14, %v3446_v12, %v3448_v14  ;;  %v4272_v12 = vld [vmem:[#allocation6 + $0xa6] ss:$8 sm:$0x3] }
 0x48a   :  { %v1751_v59 = vmul.f32 %v5845_v4, %v1735_v2  ;;  %v4263_v30 = vadd.f32 %v759_v32, %v737_v63  ;;  %v4265_v37 = vadd.f32 %v760_v10, %v738_v53  ;;  %v766_v26 = vpop.permute.xlu1 %765  ;;  %v764_v2 = vpop.permute.xlu0 %763  ;;  %v1730_v62 = vadd.f32 %v1728_v61, %v1707_v24  ;;  %v819_v63 = vld [vmem:[#allocation6 + $0x20] ss:$8 sm:$0x3]  ;;  %v5959_v10 = vld [vmem:[#allocation64_spill] sm:$0xff] }
 0x48b   :  { %v768_v48 = vsel %vm767_vm5, %v764_v2, %v766_v26  ;;  %v769_v36 = vsel %vm767_vm5, %v766_v26, %v764_v2  ;;  %v800_v60 = vrot.slane %v795_v11, %v3201_v13  ;;  %1488 = vrot.lane.b32.xlu0 %v3549_v6, %s5846_s24  ;;  %v804_v24 = vrot.slane %v795_v11, %v3204_v15  ;;  %v5984_v51 = vld [vmem:[#allocation78_spill] sm:$0xff] }
 0x48c   :  { %v783_v14 = vmul.f32 %v776_v38, %v769_v36  ;;  %v784_v44 = vmul.f32 %v780_v41, %v768_v48  ;;  %1490 = vrot.lane.b32.xlu1 %v3554_v49, %s5846_s24  ;;  %v5847_v53 = vrot.slane %v3812_v23, %v3201_v13  ;;  %v5848_v40 = vrot.slane %v3812_v23, %v3204_v15  ;;  %v5960_v38 = vld [vmem:[#allocation65_spill] sm:$0xff] }
 0x48d   :  { %v1752_v41 = vadd.f32 %v1750_v50, %v1729_v20  ;;  %v1753_v35 = vadd.f32 %v1751_v59, %v1730_v62  ;;  %v824_v48 = vrot.slane %v819_v63, %v3201_v13  ;;  %v1781_v36 = vsel %vm599_vm15, %v3456_v17, %v3454_v16 }
 0x48e   :  { %v1773_v61 = vmul.f32 %v5847_v53, %v1759_v7  ;;  %v1774_v32 = vmul.f32 %v5848_v40, %v1758_v3  ;;  %v785_v4 = vadd.f32 %v783_v14, %v4042_v21  ;;  %v786_v11 = vadd.f32 %v784_v44, %v4044_v54  ;;  %v790_v26 = vpop.permute.xlu1 %789  ;;  %v788_v2 = vpop.permute.xlu0 %787  ;;  %v843_v54 = vld [vmem:[#allocation6 + $0x21] ss:$8 sm:$0x3] }
 0x48f   :  { %v792_v23 = vsel %vm791_vm7, %v788_v2, %v790_v26  ;;  %v793_v3 = vsel %vm791_vm7, %v790_v26, %v788_v2  ;;  %1512 = vrot.lane.b32.xlu0 %v3549_v6, %s5849_s0  ;;  %v828_v21 = vrot.slane %v819_v63, %v3204_v15  ;;  %v1804_v14 = vsel %vm623_vm0, %v3464_v19, %v3462_v18 }
 0x490   :  { %v807_v20 = vmul.f32 %v800_v60, %v793_v3  ;;  %v808_v50 = vmul.f32 %v804_v24, %v792_v23  ;;  %1514 = vrot.lane.b32.xlu1 %v3554_v49, %s5849_s0  ;;  %v4304_v59 = vadd.f32 %v1773_v61, %v1752_v41  ;;  %v4306_v62 = vadd.f32 %v1774_v32, %v1753_v35  ;;  %v4323_v24 = vld [vmem:[#allocation6 + $0xb5] ss:$8 sm:$0x3] }
 0x491   :  { %v1805_v44 = vsel %vm623_vm0, %v3462_v18, %v3464_v19  ;;  %vm863_vm10 = vcmp.lt.s32.totalorder %v3182_v22, 15  ;;  %v1782_v32 = vsel %vm599_vm15, %v3454_v16, %v3456_v17  ;;  %v848_v18 = vrot.slane %v843_v54, %v3201_v13  ;;  %v4334_v19 = vld [vmem:[#allocation6 + $0xa7] ss:$8 sm:$0x3] }
 0x492   :  { %v809_v63 = vadd.f32 %v807_v20, %v785_v4  ;;  %v810_v53 = vadd.f32 %v808_v50, %v786_v11  ;;  %v814_v61 = vpop.permute.xlu1 %813  ;;  %v812_v40 = vpop.permute.xlu0 %811  ;;  %v852_v16 = vrot.slane %v843_v54, %v3204_v15  ;;  %v867_v17 = vld [vmem:[#allocation6 + $0x22] ss:$8 sm:$0x3]  ;;  %v5851_v11 = vrot.slane %v3845_v46, %v3201_v13 }
 0x493   :  { %v816_v41 = vsel %vm815_vm8, %v812_v40, %v814_v61  ;;  %v817_v35 = vsel %vm815_vm8, %v814_v61, %v812_v40  ;;  %1536 = vrot.lane.b32.xlu0 %v3549_v6, %s5850_s25  ;;  %v5852_v23 = vrot.slane %v3845_v46, %v3204_v15  ;;  %v5853_v50 = vrot.slane %v3816_v47, %v3201_v13  ;;  %v5954_v20 = vld [vmem:[#allocation22_spill] sm:$0xff] }
 0x494   :  { %v831_v26 = vmul.f32 %v824_v48, %v817_v35  ;;  %v832_v4 = vmul.f32 %v828_v21, %v816_v41  ;;  %1538 = vrot.lane.b32.xlu1 %v3554_v49, %s5850_s25  ;;  %v1819_v2 = vmul.f32 %v5851_v11, %v1805_v44  ;;  %v5854_v54 = vrot.slane %v3816_v47, %v3204_v15 }
 0x495   :  { %v1820_v3 = vmul.f32 %v5852_v23, %v1804_v14  ;;  %v1796_v21 = vmul.f32 %v5853_v50, %v1782_v32  ;;  %v872_v23 = vrot.slane %v867_v17, %v3201_v13  ;;  %vm887_vm11 = vcmp.lt.s32.totalorder %v3182_v22, 14 }
 0x496   :  { %v1797_v61 = vmul.f32 %v5854_v54, %v1781_v36  ;;  %v833_v40 = vadd.f32 %v831_v26, %v809_v63  ;;  %v834_v44 = vadd.f32 %v832_v4, %v810_v53  ;;  %v838_v41 = vpop.permute.xlu1 %837  ;;  %v836_v35 = vpop.permute.xlu0 %835  ;;  %v876_v36 = vrot.slane %v867_v17, %v3204_v15  ;;  %v891_v63 = vld [vmem:[#allocation6 + $0x23] ss:$8 sm:$0x3] }
 0x497   :  { %v840_v14 = vsel %vm839_vm9, %v836_v35, %v838_v41  ;;  %v841_v11 = vsel %vm839_vm9, %v838_v41, %v836_v35  ;;  %1560 = vrot.lane.b32.xlu0 %v3549_v6, %s3069_s1  ;;  %v1821_v53 = vadd.f32 %v1819_v2, %v1796_v21  ;;  %v1827_v4 = vsel %vm647_vm1, %v3472_v27, %v3470_v25  ;;  %v4384_v2 = vld [vmem:[#allocation6 + $0xb6] ss:$8 sm:$0x3] }
 0x498   :  { %v855_v32 = vmul.f32 %v848_v18, %v841_v11  ;;  %v856_v47 = vmul.f32 %v852_v16, %v840_v14  ;;  %1562 = vrot.lane.b32.xlu1 %v3554_v49, %s3069_s1  ;;  %v1822_v26 = vadd.f32 %v1820_v3, %v1797_v61  ;;  %v1828_v16 = vsel %vm647_vm1, %v3470_v25, %v3472_v27 }
 0x499   :  { %v1851_v17 = vsel %vm671_vm2, %v3478_v28, %v3480_v8  ;;  %v1850_v61 = vsel %vm671_vm2, %v3480_v8, %v3478_v28  ;;  %v896_v27 = vrot.slane %v891_v63, %v3201_v13  ;;  %vm911_vm12 = vcmp.lt.s32.totalorder %v3182_v22, 13  ;;  %v915_v28 = vld [vmem:[#allocation6 + $0x24] ss:$8 sm:$0x3] }
 0x49a   :  { %v857_v3 = vadd.f32 %v855_v32, %v833_v40  ;;  %v858_v50 = vadd.f32 %v856_v47, %v834_v44  ;;  %v862_v21 = vpop.permute.xlu1 %861  ;;  %v860_v54 = vpop.permute.xlu0 %859  ;;  %v900_v44 = vrot.slane %v891_v63, %v3204_v15  ;;  %v5855_v8 = vrot.slane %v3847_v55, %v3201_v13 }
 0x49b   :  { %v864_v41 = vsel %vm863_vm10, %v860_v54, %v862_v21  ;;  %v865_v25 = vsel %vm863_vm10, %v862_v21, %v860_v54  ;;  %1584 = vrot.lane.b32.xlu0 %v3549_v6, %s3071_s5  ;;  %v5856_v11 = vrot.slane %v3847_v55, %v3204_v15  ;;  %v1942_v6 = vsel %vm767_vm5, %v3488_v29, %v3486_v9 }
 0x49c   :  { %v879_v35 = vmul.f32 %v872_v23, %v865_v25  ;;  %v880_v40 = vmul.f32 %v876_v36, %v864_v41  ;;  %1586 = vrot.lane.b32.xlu1 %v3554_v49, %s3071_s5  ;;  %v1842_v14 = vmul.f32 %v5855_v8, %v1828_v16  ;;  %v5857_v23 = vrot.slane %v3850_v0, %v3201_v13  ;;  %v5928_v49 = vld [vmem:[#allocation51_spill] sm:$0xff] }
 0x49d   :  { %v1843_v32 = vmul.f32 %v5856_v11, %v1827_v4  ;;  %v1943_v36 = vsel %vm767_vm5, %v3486_v9, %v3488_v29  ;;  %v920_v25 = vrot.slane %v915_v28, %v3201_v13  ;;  %vm935_vm13 = vcmp.lt.s32.totalorder %v3182_v22, 3  ;;  %v5859_v29 = vld [vmem:[#allocation21_spill] sm:$0xff] }
 0x49e   :  { %v1865_v47 = vmul.f32 %v5857_v23, %v1851_v17  ;;  %v881_v63 = vadd.f32 %v879_v35, %v857_v3  ;;  %v882_v55 = vadd.f32 %v880_v40, %v858_v50  ;;  %v886_v4 = vpop.permute.xlu1 %885  ;;  %v884_v16 = vpop.permute.xlu0 %883  ;;  %v5858_v17 = vrot.slane %v3850_v0, %v3204_v15 }
 0x49f   :  { %v888_v54 = vsel %vm887_vm11, %v884_v16, %v886_v4  ;;  %v889_v41 = vsel %vm887_vm11, %v886_v4, %v884_v16  ;;  %2726 = vrot.lane.b32.xlu0 %v5859_v29, %s3071_s5  ;;  %v924_v3 = vrot.slane %v915_v28, %v3204_v15  ;;  %v1844_v0 = vadd.f32 %v1842_v14, %v1821_v53  ;;  %v939_v4 = vld [vmem:[#allocation6 + $0x25] ss:$8 sm:$0x3] }
 0x4a0   :  { %v1866_v21 = vmul.f32 %v5858_v17, %v1850_v61  ;;  %v903_v8 = vmul.f32 %v896_v27, %v889_v41  ;;  %v904_v9 = vmul.f32 %v900_v44, %v888_v54  ;;  %2728 = vrot.lane.b32.xlu1 %v3264_v43, %s3071_s5  ;;  %v1845_v50 = vadd.f32 %v1843_v32, %v1822_v26  ;;  %v5860_v61 = vld [vmem:[#allocation96_spill] sm:$0xff]  ;;  %v5863_v16 = vld [vmem:[#allocation26_spill] sm:$0xff]  ;;  %v5864_v27 = vld [vmem:[#allocation27_spill] sm:$0xff] }
 0x4a1   :  { %v5861_v35 = vrot.slane %v5860_v61, %v3201_v13  ;;  %v5862_v11 = vrot.slane %v5860_v61, %v3204_v15  ;;  %v1965_v43 = vsel %vm791_vm7, %v5864_v27, %v5863_v16  ;;  %v1966_v53 = vsel %vm791_vm7, %v5863_v16, %v5864_v27  ;;  %v5871_v16 = vld [vmem:[#allocation31_spill] sm:$0xff] }
 0x4a2   :  { %vm959_vm14 = vcmp.lt.s32.totalorder %v3182_v22, 2  ;;  %v905_v26 = vadd.f32 %v903_v8, %v881_v63  ;;  %v906_v44 = vadd.f32 %v904_v9, %v882_v55  ;;  %v910_v28 = vpop.permute.xlu1 %909  ;;  %v908_v14 = vpop.permute.xlu0 %907  ;;  %v4445_v32 = vadd.f32 %v1865_v47, %v1844_v0  ;;  %v5865_v47 = vld [vmem:[#allocation97_spill] sm:$0xff] }
 0x4a3   :  { %v1957_v40 = vmul.f32 %v5861_v35, %v1943_v36  ;;  %v1958_v23 = vmul.f32 %v5862_v11, %v1942_v6  ;;  %v4447_v6 = vadd.f32 %v1866_v21, %v1845_v50  ;;  %v912_v36 = vsel %vm911_vm12, %v908_v14, %v910_v28  ;;  %v963_v50 = vld [vmem:[#allocation6 + $0x26] ss:$8 sm:$0x3]  ;;  %v5868_v35 = vld [vmem:[#allocation28_spill] sm:$0xff] }
 0x4a4   :  { %v913_v17 = vsel %vm911_vm12, %v910_v28, %v908_v14  ;;  %v928_v41 = vmul.f32 %v924_v3, %v912_v36  ;;  %v944_v29 = vrot.slane %v939_v4, %v3201_v13  ;;  %v948_v61 = vrot.slane %v939_v4, %v3204_v15  ;;  %v5870_v4 = vld [vmem:[#allocation30_spill] sm:$0xff] }
 0x4a5   :  { %v927_v54 = vmul.f32 %v920_v25, %v913_v17  ;;  %v1959_v63 = vadd.f32 %v1957_v40, %v4304_v59  ;;  %v1960_v55 = vadd.f32 %v1958_v23, %v4306_v62  ;;  %v5866_v21 = vrot.slane %v5865_v47, %v3201_v13  ;;  %v5869_v25 = vld [vmem:[#allocation29_spill] sm:$0xff] }
 0x4a6   :  { %v5867_v9 = vrot.slane %v5865_v47, %v3204_v15  ;;  %v1988_v3 = vsel %vm815_vm8, %v5869_v25, %v5868_v35  ;;  %v1989_v59 = vsel %vm815_vm8, %v5868_v35, %v5869_v25  ;;  %vm983_vm15 = vcmp.lt.s32.totalorder %v3182_v22, 1  ;;  %v934_v11 = vpop.permute.xlu1 %933  ;;  %v932_v23 = vpop.permute.xlu0 %931  ;;  %v987_v25 = vld [vmem:[#allocation6 + $0x27] ss:$8 sm:$0x3] }
 0x4a7   :  { %v1980_v8 = vmul.f32 %v5866_v21, %v1966_v53  ;;  %v4472_v62 = vadd.f32 %v927_v54, %v905_v26  ;;  %v4474_v40 = vadd.f32 %v928_v41, %v906_v44  ;;  %v2011_v27 = vsel %vm839_vm9, %v5871_v16, %v5870_v4  ;;  %v5872_v41 = vld [vmem:[#allocation98_spill] sm:$0xff] }
 0x4a8   :  { %v1981_v0 = vmul.f32 %v5867_v9, %v1965_v43  ;;  %v2012_v43 = vsel %vm839_vm9, %v5870_v4, %v5871_v16  ;;  %v936_v53 = vsel %vm935_vm13, %v932_v23, %v934_v11  ;;  %v937_v26 = vsel %vm935_vm13, %v934_v11, %v932_v23  ;;  %v5875_v4 = vld [vmem:[#allocation32_spill] sm:$0xff]  ;;  %v5876_v16 = vld [vmem:[#allocation33_spill] sm:$0xff] }
 0x4a9   :  { %v951_v44 = vmul.f32 %v944_v29, %v937_v26  ;;  %v952_v28 = vmul.f32 %v948_v61, %v936_v53  ;;  %v968_v14 = vrot.slane %v963_v50, %v3201_v13  ;;  %v972_v36 = vrot.slane %v963_v50, %v3204_v15  ;;  %v5877_v50 = vld [vmem:[#allocation99_spill] sm:$0xff] }
 0x4aa   :  { %v1982_v17 = vadd.f32 %v1980_v8, %v1959_v63  ;;  %v1983_v54 = vadd.f32 %v1981_v0, %v1960_v55  ;;  %v5873_v47 = vrot.slane %v5872_v41, %v3201_v13  ;;  %v5874_v9 = vrot.slane %v5872_v41, %v3204_v15  ;;  %v958_v8 = vpop.permute.xlu1 %957  ;;  %v956_v0 = vpop.permute.xlu0 %955 }
 0x4ab   :  { %v1873_v29 = vsel %vm695_vm3, %v5876_v16, %v5875_v4  ;;  %v1874_v61 = vsel %vm695_vm3, %v5875_v4, %v5876_v16  ;;  %vm1036_vm0 = vcmp.lt.s32.totalorder %v3182_v22, 127  ;;  %v953_v63 = vadd.f32 %v951_v44, %v4263_v30 }
 0x4ac   :  { %v2003_v21 = vmul.f32 %v5873_v47, %v1989_v59  ;;  %v2004_v35 = vmul.f32 %v5874_v9, %v1988_v3  ;;  %v954_v55 = vadd.f32 %v952_v28, %v4265_v37  ;;  %v5878_v3 = vrot.slane %v5877_v50, %v3201_v13  ;;  %v5880_v9 = vld [vmem:[#allocation100_spill] sm:$0xff] }
 0x4ad   :  { %v5879_v11 = vrot.slane %v5877_v50, %v3204_v15  ;;  %v960_v53 = vsel %vm959_vm14, %v956_v0, %v958_v8  ;;  %v961_v26 = vsel %vm959_vm14, %v958_v8, %v956_v0  ;;  %v992_v37 = vrot.slane %v987_v25, %v3201_v13  ;;  %v1040_v50 = vld [vmem:[#allocation6 + $0x31] ss:$8 sm:$0x3] }
 0x4ae   :  { %v2026_v59 = vmul.f32 %v5878_v3, %v2012_v43  ;;  %v975_v41 = vmul.f32 %v968_v14, %v961_v26  ;;  %v976_v30 = vmul.f32 %v972_v36, %v960_v53  ;;  %v996_v44 = vrot.slane %v987_v25, %v3204_v15  ;;  %v5883_v3 = vld [vmem:[#allocation34_spill] sm:$0xff] }
 0x4af   :  { %v2027_v23 = vmul.f32 %v5879_v11, %v2011_v27  ;;  %v2005_v28 = vadd.f32 %v2003_v21, %v1982_v17  ;;  %v2006_v47 = vadd.f32 %v2004_v35, %v1983_v54  ;;  %v5881_v43 = vrot.slane %v5880_v9, %v3201_v13  ;;  %v5884_v11 = vld [vmem:[#allocation35_spill] sm:$0xff]  ;;  %v982_v21 = vpop.permute.xlu1 %981  ;;  %v980_v35 = vpop.permute.xlu0 %979 }
 0x4b0   :  { %v5882_v27 = vrot.slane %v5880_v9, %v3204_v15  ;;  %v2034_v14 = vsel %vm863_vm10, %v5884_v11, %v5883_v3  ;;  %v2035_v36 = vsel %vm863_vm10, %v5883_v3, %v5884_v11  ;;  %vm1060_vm1 = vcmp.lt.s32.totalorder %v3182_v22, 126 }
 0x4b1   :  { %v1888_v4 = vmul.f32 %v5881_v43, %v1874_v61  ;;  %v977_v17 = vadd.f32 %v975_v41, %v953_v63  ;;  %v978_v54 = vadd.f32 %v976_v30, %v954_v55  ;;  %v2028_v25 = vadd.f32 %v2026_v59, %v2005_v28  ;;  %v1064_v43 = vld [vmem:[#allocation6 + $0x32] ss:$8 sm:$0x3] }
 0x4b2   :  { %v1889_v16 = vmul.f32 %v5882_v27, %v1873_v29  ;;  %v2029_v61 = vadd.f32 %v2027_v23, %v2006_v47  ;;  %v984_v29 = vsel %vm983_vm15, %v980_v35, %v982_v21  ;;  %v985_v8 = vsel %vm983_vm15, %v982_v21, %v980_v35  ;;  %v5885_v41 = vld [vmem:[#allocation101_spill] sm:$0xff]  ;;  %v5888_v47 = vld [vmem:[#allocation36_spill] sm:$0xff] }
 0x4b3   :  { %v999_v0 = vmul.f32 %v992_v37, %v985_v8  ;;  %v1000_v53 = vmul.f32 %v996_v44, %v984_v29  ;;  %v1045_v26 = vrot.slane %v1040_v50, %v3201_v13  ;;  %v1049_v9 = vrot.slane %v1040_v50, %v3204_v15  ;;  %v5889_v37 = vld [vmem:[#allocation37_spill] sm:$0xff]  ;;  %v1035_v27 = vpop.permute.xlu1 %1034 }
 0x4b4   :  { %v1890_v63 = vadd.f32 %v1888_v4, %v4445_v32  ;;  %v1891_v55 = vadd.f32 %v1889_v16, %v4447_v6  ;;  %v5886_v59 = vrot.slane %v5885_v41, %v3201_v13  ;;  %v5887_v30 = vrot.slane %v5885_v41, %v3204_v15  ;;  %v1033_v16 = vpop.permute.xlu0 %1032  ;;  %v5891_v35 = vld [vmem:[#allocation25_spill] sm:$0xff] }
 0x4b5   :  { %v1896_v44 = vsel %vm719_vm4, %v5889_v37, %v5888_v47  ;;  %v1897_v32 = vsel %vm719_vm4, %v5888_v47, %v5889_v37  ;;  %vm1084_vm2 = vcmp.lt.s32.totalorder %v3182_v22, 125  ;;  %v1001_v6 = vadd.f32 %v999_v0, %v977_v17  ;;  %v1088_v37 = vld [vmem:[#allocation6 + $0x33] ss:$8 sm:$0x3] }
 0x4b6   :  { %v2049_v23 = vmul.f32 %v5886_v59, %v2035_v36  ;;  %v2050_v28 = vmul.f32 %v5887_v30, %v2034_v14  ;;  %v1002_v4 = vadd.f32 %v1000_v53, %v978_v54  ;;  %v1037_v50 = vsel %vm1036_vm0, %v1033_v16, %v1035_v27  ;;  %v5890_v36 = vld [vmem:[#allocation24_spill] sm:$0xff]  ;;  %v5892_v53 = vld [vmem:[#allocation102_spill] sm:$0xff] }
 0x4b7   :  { %v1038_v3 = vsel %vm1036_vm0, %v1035_v27, %v1033_v16  ;;  %v1069_v11 = vrot.slane %v1064_v43, %v3201_v13  ;;  %v1073_v14 = vrot.slane %v1064_v43, %v3204_v15  ;;  %vm1108_vm3 = vcmp.lt.s32.totalorder %v3182_v22, 115  ;;  %v5895_v43 = vld [vmem:[#allocation40_spill] sm:$0xff]  ;;  %v5896_v27 = vld [vmem:[#allocation41_spill] sm:$0xff] }
 0x4b8   :  { %v1030_v21 = vadd.f32 %v5890_v36, %v1001_v6  ;;  %v1031_v29 = vadd.f32 %v5891_v35, %v1002_v4  ;;  %v1052_v17 = vmul.f32 %v1045_v26, %v1037_v50  ;;  %v1053_v54 = vmul.f32 %v1049_v9, %v1038_v3  ;;  %v1059_v9 = vpop.permute.xlu1 %1058 }
 0x4b9   :  { %v2051_v8 = vadd.f32 %v2049_v23, %v2028_v25  ;;  %v2052_v0 = vadd.f32 %v2050_v28, %v2029_v61  ;;  %v5893_v41 = vrot.slane %v5892_v53, %v3201_v13  ;;  %v5894_v30 = vrot.slane %v5892_v53, %v3204_v15  ;;  %v1057_v23 = vpop.permute.xlu0 %1056  ;;  %v5897_v28 = vld [vmem:[#allocation38_spill] sm:$0xff] }
 0x4ba   :  { %v1919_v6 = vsel %vm743_vm6, %v5896_v27, %v5895_v43  ;;  %v1920_v25 = vsel %vm743_vm6, %v5895_v43, %v5896_v27  ;;  %v1054_v61 = vadd.f32 %v1052_v17, %v1030_v21  ;;  %v1055_v26 = vadd.f32 %v1053_v54, %v1031_v29  ;;  %v5899_v54 = vld [vmem:[#allocation104_spill] sm:$0xff] }
 0x4bb   :  { %v1911_v59 = vmul.f32 %v5893_v41, %v1897_v32  ;;  %v1912_v47 = vmul.f32 %v5894_v30, %v1896_v44  ;;  %v5898_v32 = vld [vmem:[#allocation39_spill] sm:$0xff]  ;;  %vm1132_vm4 = vcmp.lt.s32.totalorder %v3182_v22, 114  ;;  %v1061_v16 = vsel %vm1060_vm1, %v1057_v23, %v1059_v9  ;;  %v5902_v27 = vld [vmem:[#allocation44_spill] sm:$0xff] }
 0x4bc   :  { %v2057_v44 = vsel %vm887_vm11, %v5898_v32, %v5897_v28  ;;  %v2058_v4 = vsel %vm887_vm11, %v5897_v28, %v5898_v32  ;;  %v1062_v50 = vsel %vm1060_vm1, %v1059_v9, %v1057_v23  ;;  %v1076_v3 = vmul.f32 %v1069_v11, %v1061_v16  ;;  %v5903_v28 = vld [vmem:[#allocation45_spill] sm:$0xff] }
 0x4bd   :  { %v1077_v36 = vmul.f32 %v1073_v14, %v1062_v50  ;;  %v1093_v21 = vrot.slane %v1088_v37, %v3201_v13  ;;  %v1097_v35 = vrot.slane %v1088_v37, %v3204_v15  ;;  %v1913_v29 = vadd.f32 %v1911_v59, %v1890_v63  ;;  %v1083_v59 = vpop.permute.xlu1 %1082  ;;  %v5904_v37 = vld [vmem:[#allocation103_spill] sm:$0xff]  ;;  %v5907_v50 = vld [vmem:[#allocation42_spill] sm:$0xff] }
 0x4be   :  { %v1914_v17 = vadd.f32 %v1912_v47, %v1891_v55  ;;  %v5900_v53 = vrot.slane %v5899_v54, %v3201_v13  ;;  %v5901_v30 = vrot.slane %v5899_v54, %v3204_v15  ;;  %v2103_v11 = vsel %vm935_vm13, %v5903_v28, %v5902_v27  ;;  %v1081_v47 = vpop.permute.xlu0 %1080  ;;  %v5908_v54 = vld [vmem:[#allocation43_spill] sm:$0xff] }
 0x4bf   :  { %v2104_v14 = vsel %vm935_vm13, %v5902_v27, %v5903_v28  ;;  %vm1156_vm5 = vcmp.lt.s32.totalorder %v3182_v22, 113  ;;  %v1078_v63 = vadd.f32 %v1076_v3, %v1054_v61  ;;  %v1079_v55 = vadd.f32 %v1077_v36, %v1055_v26  ;;  %v5909_v3 = vld [vmem:[#allocation106_spill] sm:$0xff]  ;;  %v5912_v28 = vld [vmem:[#allocation48_spill] sm:$0xff] }
 0x4c0   :  { %v1934_v41 = vmul.f32 %v5900_v53, %v1920_v25  ;;  %v1935_v43 = vmul.f32 %v5901_v30, %v1919_v6  ;;  %v5905_v25 = vrot.slane %v5904_v37, %v3201_v13  ;;  %v5906_v9 = vrot.slane %v5904_v37, %v3204_v15 }
 0x4c1   :  { %v1085_v32 = vsel %vm1084_vm2, %v1081_v47, %v1083_v59  ;;  %v1086_v16 = vsel %vm1084_vm2, %v1083_v59, %v1081_v47  ;;  %v2080_v61 = vsel %vm911_vm12, %v5908_v54, %v5907_v50  ;;  %v2081_v26 = vsel %vm911_vm12, %v5907_v50, %v5908_v54  ;;  %v5913_v59 = vld [vmem:[#allocation49_spill] sm:$0xff] }
 0x4c2   :  { %v2072_v6 = vmul.f32 %v5905_v25, %v2058_v4  ;;  %v2073_v23 = vmul.f32 %v5906_v9, %v2057_v44  ;;  %vm1180_vm6 = vcmp.lt.s32.totalorder %v3182_v22, 112  ;;  %v1100_v4 = vmul.f32 %v1093_v21, %v1085_v32  ;;  %v4649_v32 = vpop.permute.xlu0 %1104 }
 0x4c3   :  { %v1101_v44 = vmul.f32 %v1097_v35, %v1086_v16  ;;  %v5910_v36 = vrot.slane %v5909_v3, %v3201_v13  ;;  %v5911_v30 = vrot.slane %v5909_v3, %v3204_v15  ;;  %v2126_v47 = vsel %vm959_vm14, %v5913_v59, %v5912_v28 }
 0x4c4   :  { %v2127_v37 = vsel %vm959_vm14, %v5912_v28, %v5913_v59  ;;  %v1936_v21 = vadd.f32 %v1934_v41, %v1913_v29  ;;  %v1937_v35 = vadd.f32 %v1935_v43, %v1914_v17  ;;  %v4643_v25 = vadd.f32 %v1100_v4, %v1078_v63  ;;  %v5919_v41 = vld [vmem:[#allocation108_spill] sm:$0xff]  ;;  %v5923_v4 = vld [vmem:[#allocation53_spill] sm:$0xff] }
 0x4c5   :  { %v2118_v53 = vmul.f32 %v5910_v36, %v2104_v14  ;;  %v2119_v27 = vmul.f32 %v5911_v30, %v2103_v11  ;;  %v4645_v9 = vadd.f32 %v1101_v44, %v1079_v55  ;;  %v4647_v14 = vpop.permute.xlu1 %1106  ;;  %v5914_v11 = vld [vmem:[#allocation105_spill] sm:$0xff]  ;;  %v5917_v36 = vld [vmem:[#allocation46_spill] sm:$0xff]  ;;  %v5918_v30 = vld [vmem:[#allocation47_spill] sm:$0xff]  ;;  %vm1204_vm7 = vcmp.lt.s32.totalorder %v3182_v22, 111 }
 0x4c6   :  { %v5915_v16 = vrot.slane %v5914_v11, %v3201_v13  ;;  %v5916_v54 = vrot.slane %v5914_v11, %v3204_v15  ;;  %v2270_v29 = vsel %vm1108_vm3, %v5918_v30, %v5917_v36  ;;  %v2271_v17 = vsel %vm1108_vm3, %v5917_v36, %v5918_v30  ;;  %v4680_v59 = vld [vmem:[#allocation6 + $0xb0] ss:$8 sm:$0x3]  ;;  %v5924_v36 = vld [vmem:[#allocation107_spill] sm:$0xff] }
 0x4c7   :  { %v5920_v43 = vrot.slane %v5919_v41, %v3201_v13  ;;  %v5921_v55 = vrot.slane %v5919_v41, %v3204_v15  ;;  %v2074_v11 = vadd.f32 %v2072_v6, %v2051_v8  ;;  %v5925_v30 = vrot.slane %v5924_v36, %v3201_v13  ;;  %v4699_v6 = vpop.permute.xlu0 %1128 }
 0x4c8   :  { %v2095_v50 = vmul.f32 %v5915_v16, %v2081_v26  ;;  %v2096_v3 = vmul.f32 %v5916_v54, %v2080_v61  ;;  %v5922_v26 = vld [vmem:[#allocation52_spill] sm:$0xff]  ;;  %v2075_v16 = vadd.f32 %v2073_v23, %v2052_v0  ;;  %v2120_v54 = vadd.f32 %v2118_v53, %v1936_v21  ;;  %v5929_v23 = vld [vmem:[#allocation110_spill] sm:$0xff] }
 0x4c9   :  { %v2141_v63 = vmul.f32 %v5920_v43, %v2127_v37  ;;  %v2142_v61 = vmul.f32 %v5921_v55, %v2126_v47  ;;  %v2149_v44 = vsel %vm983_vm15, %v5923_v4, %v5922_v26  ;;  %v2150_v28 = vsel %vm983_vm15, %v5922_v26, %v5923_v4  ;;  %v5927_v55 = vld [vmem:[#allocation50_spill] sm:$0xff]  ;;  %v4697_v0 = vpop.permute.xlu1 %1130 }
 0x4ca   :  { %v2121_v37 = vadd.f32 %v2119_v27, %v1937_v35  ;;  %v2285_v47 = vmul.f32 %v5925_v30, %v2270_v29  ;;  %v5926_v41 = vrot.slane %v5924_v36, %v3204_v15  ;;  %v2293_v18 = vsel %vm1132_vm4, %v5928_v49, %v5927_v55 }
 0x4cb   :  { %v2294_v8 = vsel %vm1132_vm4, %v5927_v55, %v5928_v49  ;;  %vm1228_vm8 = vcmp.lt.s32.totalorder %v3182_v22, 110  ;;  %v5930_v53 = vrot.slane %v5929_v23, %v3201_v13  ;;  %v5931_v21 = vrot.slane %v5929_v23, %v3204_v15 }
 0x4cc   :  { %v2286_v43 = vmul.f32 %v5926_v41, %v2271_v17  ;;  %v4711_v17 = vld [vmem:[#allocation6 + $0xb7] ss:$8 sm:$0x3]  ;;  %v2097_v26 = vadd.f32 %v2095_v50, %v2074_v11  ;;  %v2098_v4 = vadd.f32 %v2096_v3, %v2075_v16  ;;  %v2143_v36 = vadd.f32 %v2141_v63, %v2120_v54  ;;  %v4733_v11 = vld [vmem:[#allocation6 + $0xb1] ss:$8 sm:$0x3]  ;;  %v4737_v54 = vpop.permute.xlu0 %1152 }
 0x4cd   :  { %v2164_v27 = vmul.f32 %v5930_v53, %v2150_v28  ;;  %v2165_v35 = vmul.f32 %v5931_v21, %v2149_v44  ;;  %v2144_v30 = vadd.f32 %v2142_v61, %v2121_v37  ;;  %v5932_v41 = vld [vmem:[#allocation109_spill] sm:$0xff]  ;;  %v5935_v53 = vld [vmem:[#allocation54_spill] sm:$0xff]  ;;  %v5936_v21 = vld [vmem:[#allocation55_spill] sm:$0xff]  ;;  %vm5711_vm9 = vcmp.lt.s32.totalorder %v3182_v22, 109  ;;  %v4735_v16 = vpop.permute.xlu1 %1154 }
 0x4ce   :  { %v5933_v55 = vrot.slane %v5932_v41, %v3201_v13  ;;  %v5934_v23 = vrot.slane %v5932_v41, %v3204_v15  ;;  %v2316_v29 = vsel %vm1156_vm5, %v5936_v21, %v5935_v53  ;;  %v2317_v50 = vsel %vm1156_vm5, %v5935_v53, %v5936_v21  ;;  %v5937_v41 = vld [vmem:[#allocation56_spill] sm:$0xff] }
 0x4cf   :  { %v2287_v3 = vadd.f32 %v2285_v47, %v2097_v26  ;;  %v2288_v63 = vadd.f32 %v2286_v43, %v2098_v4  ;;  %vm1276_vm10 = vcmp.lt.s32.totalorder %v3182_v22, 99  ;;  %v2166_v37 = vadd.f32 %v2164_v27, %v2143_v36  ;;  %v5939_v26 = vld [vmem:[#allocation111_spill] sm:$0xff]  ;;  %v5942_v27 = vld [vmem:[#allocation58_spill] sm:$0xff] }
 0x4d0   :  { %v2308_v28 = vmul.f32 %v5933_v55, %v2293_v18  ;;  %v2309_v44 = vmul.f32 %v5934_v23, %v2294_v8  ;;  %v2167_v8 = vadd.f32 %v2165_v35, %v2144_v30  ;;  %v5938_v55 = vld [vmem:[#allocation57_spill] sm:$0xff]  ;;  %v5940_v4 = vrot.slane %v5939_v26, %v3201_v13  ;;  %v5943_v35 = vld [vmem:[#allocation59_spill] sm:$0xff] }
 0x4d1   :  { %v2339_v47 = vsel %vm1180_vm6, %v5938_v55, %v5937_v41  ;;  %v2340_v43 = vsel %vm1180_vm6, %v5937_v41, %v5938_v55  ;;  %v5941_v53 = vrot.slane %v5939_v26, %v3204_v15  ;;  %v2201_v36 = vsel %vm1036_vm0, %v5943_v35, %v5942_v27  ;;  %v5944_v26 = vld [vmem:[#allocation112_spill] sm:$0xff]  ;;  %v5948_v18 = vld [vmem:[#allocation61_spill] sm:$0xff] }
 0x4d2   :  { %v2331_v23 = vmul.f32 %v5940_v4, %v2316_v29  ;;  %v2202_v30 = vsel %vm1036_vm0, %v5942_v27, %v5943_v35  ;;  %vm5709_vm11 = vcmp.lt.s32.totalorder %v3182_v22, 83  ;;  %v2310_v41 = vadd.f32 %v2308_v28, %v2287_v3  ;;  %v5947_v35 = vld [vmem:[#allocation60_spill] sm:$0xff]  ;;  %v4781_v3 = vpop.permute.xlu1 %1178  ;;  %v5953_v29 = vld [vmem:[#allocation63_spill] sm:$0xff] }
 0x4d3   :  { %v2332_v21 = vmul.f32 %v5941_v53, %v2317_v50  ;;  %v2311_v55 = vadd.f32 %v2309_v44, %v2288_v63  ;;  %vm1300_vm12 = vcmp.lt.s32.totalorder %v3182_v22, 98  ;;  %v5945_v4 = vrot.slane %v5944_v26, %v3201_v13  ;;  %v4783_v63 = vpop.permute.xlu0 %1176  ;;  %v5949_v50 = vld [vmem:[#allocation113_spill] sm:$0xff] }
 0x4d4   :  { %v5946_v61 = vrot.slane %v5944_v26, %v3204_v15  ;;  %v2362_v28 = vsel %vm1204_vm7, %v5948_v18, %v5947_v35  ;;  %v2363_v44 = vsel %vm1204_vm7, %v5947_v35, %v5948_v18  ;;  %v5952_v26 = vld [vmem:[#allocation62_spill] sm:$0xff]  ;;  %vm5710_vm13 = vcmp.lt.s32.totalorder %v3182_v22, 82 }
 0x4d5   :  { %v2354_v53 = vmul.f32 %v5945_v4, %v2339_v47  ;;  %v5950_v47 = vrot.slane %v5949_v50, %v3201_v13  ;;  %v2224_v49 = vsel %vm1060_vm1, %v5953_v29, %v5952_v26  ;;  %v2225_v18 = vsel %vm1060_vm1, %v5952_v26, %v5953_v29 }
 0x4d6   :  { %v2355_v27 = vmul.f32 %v5946_v61, %v2340_v43  ;;  %v5951_v61 = vrot.slane %v5949_v50, %v3204_v15  ;;  %v2333_v35 = vadd.f32 %v2331_v23, %v2310_v41  ;;  %v2334_v46 = vadd.f32 %v2332_v21, %v2311_v55  ;;  %v5956_v50 = vld [vmem:[#allocation114_spill] sm:$0xff] }
 0x4d7   :  { %v2216_v4 = vmul.f32 %v5950_v47, %v2201_v36  ;;  %v2195_v36 = vadd.f32 %v5954_v20, %v2166_v37  ;;  %v5955_v47 = vld [vmem:[#allocation23_spill] sm:$0xff]  ;;  %v5958_v60 = vrot.slane %v5956_v50, %v3204_v15  ;;  %v2385_v29 = vsel %vm1228_vm8, %v5960_v38, %v5959_v10  ;;  %v5964_v55 = vld [vmem:[#allocation66_spill] sm:$0xff] }
 0x4d8   :  { %v2217_v43 = vmul.f32 %v5951_v61, %v2202_v30  ;;  %v2196_v48 = vadd.f32 %v5955_v47, %v2167_v8  ;;  %v5957_v30 = vrot.slane %v5956_v50, %v3201_v13  ;;  %v2386_v20 = vsel %vm1228_vm8, %v5959_v10, %v5960_v38  ;;  %v5961_v37 = vld [vmem:[#allocation115_spill] sm:$0xff]  ;;  %v4831_v38 = vpop.permute.xlu1 %1202  ;;  %v4833_v10 = vpop.permute.xlu0 %1200 }
 0x4d9   :  { %v2378_v7 = vmul.f32 %v5958_v60, %v2363_v44  ;;  %v5962_v8 = vrot.slane %v5961_v37, %v3201_v13  ;;  %v5963_v21 = vrot.slane %v5961_v37, %v3204_v15  ;;  %v5965_v60 = vld [vmem:[#allocation67_spill] sm:$0xff]  ;;  %vm1324_vm14 = vcmp.lt.s32.totalorder %v3182_v22, 97 }
 0x4da   :  { %v2377_v61 = vmul.f32 %v5957_v30, %v2362_v28  ;;  %v2247_v28 = vsel %vm1084_vm2, %v5965_v60, %v5964_v55  ;;  %v2248_v44 = vsel %vm1084_vm2, %v5964_v55, %v5965_v60  ;;  %v2357_v26 = vadd.f32 %v2355_v27, %v2334_v46  ;;  %v5969_v55 = vld [vmem:[#allocation69_spill] sm:$0xff] }
 0x4db   :  { %v2239_v23 = vmul.f32 %v5962_v8, %v2224_v49  ;;  %v2240_v41 = vmul.f32 %v5963_v21, %v2225_v18  ;;  %v2356_v49 = vadd.f32 %v2354_v53, %v2333_v35  ;;  %v2218_v47 = vadd.f32 %v2216_v4, %v2195_v36  ;;  %v5968_v21 = vld [vmem:[#allocation68_spill] sm:$0xff]  ;;  %v5972_v4 = vld [vmem:[#allocation70_spill] sm:$0xff] }
 0x4dc   :  { %v2219_v18 = vadd.f32 %v2217_v43, %v2196_v48  ;;  %vm1492_vm15 = vcmp.lt.s32.totalorder %v3182_v22, 81  ;;  %v5966_v50 = vrot.slane %v4040_v34, %v3201_v13  ;;  %v5967_v37 = vrot.slane %v4040_v34, %v3204_v15  ;;  %v5973_v43 = vld [vmem:[#allocation71_spill] sm:$0xff] }
 0x4dd   :  { %v2408_v60 = vsel %vm5711_vm9, %v5969_v55, %v5968_v21  ;;  %v2409_v48 = vsel %vm5711_vm9, %v5968_v21, %v5969_v55  ;;  %vm1348_vm0 = vcmp.lt.s32.totalorder %v3182_v22, 96  ;;  %v5970_v46 = vrot.slane %v4079_v39, %v3201_v13  ;;  %v5974_v55 = vld [vmem:[#allocation72_spill] sm:$0xff] }
 0x4de   :  { %v2400_v30 = vmul.f32 %v5966_v50, %v2385_v29  ;;  %v2401_v8 = vmul.f32 %v5967_v37, %v2386_v20  ;;  %v5971_v34 = vrot.slane %v4079_v39, %v3204_v15  ;;  %v2431_v35 = vsel %vm1276_vm10, %v5973_v43, %v5972_v4  ;;  %v4866_v37 = vpop.permute.xlu1 %1226  ;;  %v4868_v39 = vpop.permute.xlu0 %1224 }
 0x4df   :  { %v2262_v53 = vmul.f32 %v5970_v46, %v2247_v28  ;;  %v2432_v36 = vsel %vm1276_vm10, %v5972_v4, %v5973_v43  ;;  %vm5712_vm1 = vcmp.lt.s32.totalorder %v3182_v22, 80  ;;  %v2379_v29 = vadd.f32 %v2377_v61, %v2356_v49  ;;  %v5975_v46 = vld [vmem:[#allocation73_spill] sm:$0xff]  ;;  %v5979_v49 = vld [vmem:[#allocation75_spill] sm:$0xff] }
 0x4e0   :  { %v2263_v27 = vmul.f32 %v5971_v34, %v2248_v44  ;;  %v2380_v20 = vadd.f32 %v2378_v7, %v2357_v26  ;;  %v2241_v50 = vadd.f32 %v2239_v23, %v2218_v47  ;;  %v2242_v28 = vadd.f32 %v2240_v41, %v2219_v18  ;;  %v5978_v41 = vld [vmem:[#allocation74_spill] sm:$0xff] }
 0x4e1   :  { %v2423_v44 = vmul.f32 %v2416_v45, %v2408_v60  ;;  %v2424_v21 = vmul.f32 %v2420_v31, %v2409_v48  ;;  %v2592_v61 = vsel %vm5709_vm11, %v5975_v46, %v5974_v55  ;;  %v2593_v7 = vsel %vm5709_vm11, %v5974_v55, %v5975_v46  ;;  %v4900_v18 = vld [vmem:[#allocation6 + $0xc0] ss:$8 sm:$0x3] }
 0x4e2   :  { %vm1372_vm2 = vcmp.lt.s32.totalorder %v3182_v22, 95  ;;  %v5976_v23 = vrot.slane %v4141_v58, %v3201_v13  ;;  %v5977_v56 = vrot.slane %v4141_v58, %v3204_v15  ;;  %v2454_v26 = vsel %vm1300_vm12, %v5979_v49, %v5978_v41 }
 0x4e3   :  { %v2455_v47 = vsel %vm1300_vm12, %v5978_v41, %v5979_v49  ;;  %vm1540_vm11 = vcmp.lt.s32.totalorder %v3182_v22, 79  ;;  %v2402_v60 = vadd.f32 %v2400_v30, %v2379_v29  ;;  %v2403_v48 = vadd.f32 %v2401_v8, %v2380_v20  ;;  %v4916_v8 = vpop.permute.xlu1 %1250 }
 0x4e4   :  { %v2446_v45 = vmul.f32 %v5976_v23, %v2431_v35  ;;  %v2447_v31 = vmul.f32 %v5977_v56, %v2432_v36  ;;  %v2264_v34 = vadd.f32 %v2262_v53, %v2241_v50  ;;  %v2265_v4 = vadd.f32 %v2263_v27, %v2242_v28  ;;  %v5980_v35 = vld [vmem:[#allocation76_spill] sm:$0xff]  ;;  %v5981_v36 = vld [vmem:[#allocation77_spill] sm:$0xff]  ;;  %v4918_v53 = vpop.permute.xlu0 %1248 }
 0x4e5   :  { %v2607_v58 = vmul.f32 %v2600_v1, %v2592_v61  ;;  %v2608_v43 = vmul.f32 %v2604_v57, %v2593_v7  ;;  %v2615_v55 = vsel %vm5710_vm13, %v5981_v36, %v5980_v35  ;;  %v2616_v30 = vsel %vm5710_vm13, %v5980_v35, %v5981_v36  ;;  %v5986_v56 = vld [vmem:[#allocation80_spill] sm:$0xff] }
 0x4e6   :  { %v2469_v1 = vmul.f32 %v2462_v52, %v2454_v26  ;;  %v2470_v5 = vmul.f32 %v2466_v33, %v2455_v47  ;;  %v2558_v57 = vrot.slane %v4733_v11, %v3204_v15  ;;  %v2715_v27 = vrot.slane %v4900_v18, %v3201_v13  ;;  %v5985_v33 = vld [vmem:[#allocation79_spill] sm:$0xff] }
 0x4e7   :  { %v2425_v29 = vadd.f32 %v2423_v44, %v2402_v60  ;;  %v2426_v20 = vadd.f32 %v2424_v21, %v2403_v48  ;;  %v2448_v50 = vadd.f32 %v2446_v45, %v2264_v34  ;;  %v2449_v28 = vadd.f32 %v2447_v31, %v2265_v4  ;;  %v5987_v31 = vld [vmem:[#allocation81_spill] sm:$0xff]  ;;  %v4954_v49 = vpop.permute.xlu1 %1274  ;;  %v5988_v48 = vld [vmem:[#allocation82_spill] sm:$0xff]  ;;  %v5989_v34 = vld [vmem:[#allocation83_spill] sm:$0xff] }
 0x4e8   :  { %v5982_v46 = vrot.slane %v4261_v42, %v3201_v13  ;;  %v5983_v52 = vrot.slane %v4261_v42, %v3204_v15  ;;  %v2477_v23 = vsel %vm1324_vm14, %v5985_v33, %v5984_v51  ;;  %v2478_v44 = vsel %vm1324_vm14, %v5984_v51, %v5985_v33  ;;  %v4956_v26 = vpop.permute.xlu0 %1272 }
 0x4e9   :  { %vm1396_vm13 = vcmp.lt.s32.totalorder %v3182_v22, 94  ;;  %v2609_v21 = vadd.f32 %v2607_v58, %v2425_v29  ;;  %v2610_v45 = vadd.f32 %v2608_v43, %v2426_v20  ;;  %v2638_v42 = vsel %vm1492_vm15, %v5987_v31, %v5986_v56 }
 0x4ea   :  { %v2630_v61 = vmul.f32 %v5982_v46, %v2615_v55  ;;  %v2631_v7 = vmul.f32 %v5983_v52, %v2616_v30  ;;  %v2639_v41 = vsel %vm1492_vm15, %v5986_v56, %v5987_v31  ;;  %vm1564_vm9 = vcmp.lt.s32.totalorder %v3182_v22, 78  ;;  %v5992_v30 = vld [vmem:[#allocation84_spill] sm:$0xff]  ;;  %v5998_v56 = vld [vmem:[#allocation86_spill] sm:$0xff]  ;;  %v5999_v31 = vld [vmem:[#allocation87_spill] sm:$0xff] }
 0x4eb   :  { %v2471_v47 = vadd.f32 %v2469_v1, %v2448_v50  ;;  %v2472_v60 = vadd.f32 %v2470_v5, %v2449_v28  ;;  %v2500_v4 = vsel %vm1348_vm0, %v5989_v34, %v5988_v48  ;;  %v2501_v58 = vsel %vm1348_vm0, %v5988_v48, %v5989_v34  ;;  %v5993_v1 = vld [vmem:[#allocation85_spill] sm:$0xff]  ;;  %v6002_v48 = vld [vmem:[#allocation88_spill] sm:$0xff] }
 0x4ec   :  { %v5990_v43 = vrot.slane %v4272_v12, %v3201_v13  ;;  %v5991_v36 = vrot.slane %v4272_v12, %v3204_v15  ;;  %v2661_v5 = vsel %vm5712_vm1, %v5993_v1, %v5992_v30  ;;  %v2662_v29 = vsel %vm5712_vm1, %v5992_v30, %v5993_v1  ;;  %v6003_v34 = vld [vmem:[#allocation89_spill] sm:$0xff] }
 0x4ed   :  { %v2632_v20 = vadd.f32 %v2630_v61, %v2609_v21  ;;  %v2633_v50 = vadd.f32 %v2631_v7, %v2610_v45  ;;  %v5994_v28 = vrot.slane %v4323_v24, %v3201_v13  ;;  %v5995_v12 = vrot.slane %v4323_v24, %v3204_v15  ;;  %v5000_v24 = vpop.permute.xlu1 %1298  ;;  %v5002_v21 = vpop.permute.xlu0 %1296 }
 0x4ee   :  { %v2492_v35 = vmul.f32 %v5990_v43, %v2477_v23  ;;  %v2493_v55 = vmul.f32 %v5991_v36, %v2478_v44  ;;  %v5996_v51 = vrot.slane %v4334_v19, %v3201_v13  ;;  %v5997_v23 = vrot.slane %v4334_v19, %v3204_v15  ;;  %v5018_v43 = vld [vmem:[#allocation6 + $0xb2] ss:$8 sm:$0x3] }
 0x4ef   :  { %v2653_v46 = vmul.f32 %v5994_v28, %v2638_v42  ;;  %v2654_v52 = vmul.f32 %v5995_v12, %v2639_v41  ;;  %v2523_v61 = vsel %vm1372_vm2, %v5999_v31, %v5998_v56  ;;  %v2524_v7 = vsel %vm1372_vm2, %v5998_v56, %v5999_v31  ;;  %6004 = vst [vmem:[#allocation21_spill] sm:$0xff] %v5018_v43  ;;  %v5220_v43 = vld [vmem:[#allocation6 + $0x54] ss:$8 sm:$0x3] }
 0x4f0   :  { %v2515_v33 = vmul.f32 %v5996_v51, %v2500_v4  ;;  %v2516_v44 = vmul.f32 %v5997_v23, %v2501_v58  ;;  %v6000_v45 = vrot.slane %v4384_v2, %v3201_v13  ;;  %v6001_v19 = vrot.slane %v4384_v2, %v3204_v15  ;;  %v5029_v23 = vld [vmem:[#allocation6 + $0x34] ss:$8 sm:$0x3] }
 0x4f1   :  { %v2684_v4 = vsel %vm1540_vm11, %v6003_v34, %v6002_v48  ;;  %v2685_v58 = vsel %vm1540_vm11, %v6002_v48, %v6003_v34  ;;  %v2494_v36 = vadd.f32 %v2492_v35, %v2471_v47  ;;  %v2495_v30 = vadd.f32 %v2493_v55, %v2472_v60 }
 0x4f2   :  { %v2676_v42 = vmul.f32 %v6000_v45, %v2661_v5  ;;  %v2677_v41 = vmul.f32 %v6001_v19, %v2662_v29  ;;  %v2719_v1 = vrot.slane %v4900_v18, %v3204_v15  ;;  %vm1420_vm1 = vcmp.lt.s32.totalorder %v3182_v22, 93  ;;  %v6009_v45 = vld [vmem:[#allocation90_spill] sm:$0xff]  ;;  %v6010_v19 = vld [vmem:[#allocation91_spill] sm:$0xff] }
 0x4f3   :  { %v2655_v2 = vadd.f32 %v2653_v46, %v2632_v20  ;;  %v2656_v5 = vadd.f32 %v2654_v52, %v2633_v50  ;;  %v6005_v29 = vrot.slane %v4680_v59, %v3201_v13  ;;  %v6006_v12 = vrot.slane %v4680_v59, %v3204_v15  ;;  %v5041_v46 = vpop.permute.xlu1 %1322  ;;  %v5043_v59 = vpop.permute.xlu0 %1320 }
 0x4f4   :  { %v6007_v47 = vrot.slane %v4711_v17, %v3201_v13  ;;  %v6008_v35 = vrot.slane %v4711_v17, %v3204_v15  ;;  %v2517_v52 = vadd.f32 %v2515_v33, %v2494_v36  ;;  %v2518_v56 = vadd.f32 %v2516_v44, %v2495_v30  ;;  %v5059_v44 = vld [vmem:[#allocation6 + $0x36] ss:$8 sm:$0x3] }
 0x4f5   :  { %v2538_v28 = vmul.f32 %v6005_v29, %v2523_v61  ;;  %v2539_v51 = vmul.f32 %v6006_v12, %v2524_v7  ;;  %v2678_v31 = vadd.f32 %v2676_v42, %v2655_v2  ;;  %v2679_v61 = vadd.f32 %v2677_v41, %v2656_v5  ;;  %v5045_v7 = vld [vmem:[#allocation6 + $0x35] ss:$8 sm:$0x3]  ;;  %v5073_v2 = vld [vmem:[#allocation6 + $0x37] ss:$8 sm:$0x3] }
 0x4f6   :  { %v2699_v60 = vmul.f32 %v6007_v47, %v2684_v4  ;;  %v2700_v55 = vmul.f32 %v6008_v35, %v2685_v58  ;;  %v2546_v17 = vsel %vm1396_vm13, %v6010_v19, %v6009_v45  ;;  %v2547_v48 = vsel %vm1396_vm13, %v6009_v45, %v6010_v19  ;;  %v6011_v4 = vld [vmem:[#allocation92_spill] sm:$0xff]  ;;  %v6012_v58 = vld [vmem:[#allocation93_spill] sm:$0xff]  ;;  %v5118_v19 = vld [vmem:[#allocation6 + $0x43] ss:$8 sm:$0x3] }
 0x4f7   :  { %v1117_v34 = vrot.slane %v5029_v23, %v3201_v13  ;;  %v1121_v33 = vrot.slane %v5029_v23, %v3204_v15  ;;  %v5061_v42 = vadd.f32 %v2538_v28, %v2517_v52  ;;  %v5063_v41 = vadd.f32 %v2539_v51, %v2518_v56  ;;  %v5083_v51 = vld [vmem:[#allocation6 + $0x40] ss:$8 sm:$0x3]  ;;  %v5085_v23 = vpop.permute.xlu1 %1346  ;;  %v5087_v47 = vpop.permute.xlu0 %1344 }
 0x4f8   :  { %v2707_v36 = vsel %vm1564_vm9, %v6012_v58, %v6011_v4  ;;  %v2708_v30 = vsel %vm1564_vm9, %v6011_v4, %v6012_v58  ;;  %v5075_v5 = vadd.f32 %v2699_v60, %v2678_v31  ;;  %v5077_v29 = vadd.f32 %v2700_v55, %v2679_v61  ;;  %v5103_v31 = vld [vmem:[#allocation6 + $0x41] ss:$8 sm:$0x3]  ;;  %v5105_v61 = vld [vmem:[#allocation6 + $0x42] ss:$8 sm:$0x3] }
 0x4f9   :  { %v1141_v28 = vrot.slane %v5045_v7, %v3201_v13  ;;  %v1145_v12 = vrot.slane %v5045_v7, %v3204_v15  ;;  %v6015_v35 = vrot.slane %v4733_v11, %v3201_v13  ;;  %v5097_v60 = vmul.f32 %v2558_v57, %v2547_v48  ;;  %v6020_v48 = vld [vmem:[#allocation95_spill] sm:$0xff]  ;;  %v5218_v57 = vld [vmem:[#allocation6 + $0x53] ss:$8 sm:$0x3] }
 0x4fa   :  { %6013 = vst [vmem:[#allocation96_spill] sm:$0xff] %v5075_v5  ;;  %6014 = vst [vmem:[#allocation26_spill] sm:$0xff] %v5077_v29  ;;  %v1165_v55 = vrot.slane %v5059_v44, %v3201_v13  ;;  %v1169_v56 = vrot.slane %v5059_v44, %v3204_v15  ;;  %v5110_v7 = vmul.f32 %v2715_v27, %v2707_v36  ;;  %v5136_v4 = vld [vmem:[#allocation6 + $0x44] ss:$8 sm:$0x3] }
 0x4fb   :  { %v5092_v52 = vmul.f32 %v6015_v35, %v2546_v17  ;;  %6016 = vst [vmem:[#allocation27_spill] sm:$0xff] %v5097_v60  ;;  %v5112_v45 = vmul.f32 %v2719_v1, %v2708_v30  ;;  %v6019_v17 = vld [vmem:[#allocation94_spill] sm:$0xff]  ;;  %v5150_v50 = vpop.permute.xlu1 %1370  ;;  %v5152_v20 = vpop.permute.xlu0 %1368  ;;  %v1109_v36 = vsel %vm1108_vm3, %v4649_v32, %v4647_v14  ;;  %v1110_v30 = vsel %vm1108_vm3, %v4647_v14, %v4649_v32  ;;  %v5176_v32 = vld [vmem:[#allocation6 + $0x50] ss:$8 sm:$0x3] }
 0x4fc   :  { %6017 = vst [vmem:[#allocation97_spill] sm:$0xff] %v5110_v7  ;;  %v5124_v44 = vsel %vm1420_vm1, %v6020_v48, %v6019_v17  ;;  %v5130_v18 = vsel %vm1420_vm1, %v6019_v17, %v6020_v48  ;;  %v5138_v58 = vld [vmem:[#allocation6 + $0x45] ss:$8 sm:$0x3]  ;;  %v1133_v17 = vsel %vm1132_vm4, %v4699_v6, %v4697_v0  ;;  %v1134_v27 = vsel %vm1132_vm4, %v4697_v0, %v4699_v6 }
 0x4fd   :  { %6018 = vst [vmem:[#allocation28_spill] sm:$0xff] %v5112_v45  ;;  %6021 = vst [vmem:[#allocation29_spill] sm:$0xff] %v5124_v44  ;;  %v5148_v48 = vld [vmem:[#allocation6 + $0x46] ss:$8 sm:$0x3]  ;;  %v1124_v14 = vmul.f32 %v1117_v34, %v1109_v36  ;;  %v1125_v45 = vmul.f32 %v1121_v33, %v1110_v30  ;;  %v1157_v6 = vsel %vm1156_vm5, %v4737_v54, %v4735_v16  ;;  %vm6027_vm3 = vcmp.lt.s32.totalorder %v3182_v22, 109 }
 0x4fe   :  { %6022 = vst [vmem:[#allocation30_spill] sm:$0xff] %v5130_v18  ;;  %v5166_v1 = vld [vmem:[#allocation6 + $0x47] ss:$8 sm:$0x3]  ;;  %v1158_v34 = vsel %vm1156_vm5, %v4735_v16, %v4737_v54  ;;  %v1148_v30 = vmul.f32 %v1141_v28, %v1133_v17  ;;  %v1149_v7 = vmul.f32 %v1145_v12, %v1134_v27  ;;  %v1181_v16 = vsel %vm1180_vm6, %v4783_v63, %v4781_v3  ;;  %vm6028_vm4 = vmmov %vm6027_vm3 }
 0x4ff   :  { %v5190_v35 = vld [vmem:[#allocation6 + $0x51] ss:$8 sm:$0x3]  ;;  %v5196_v5 = vpop.permute.xlu1 %1394  ;;  %v5198_v18 = vpop.permute.xlu0 %1392  ;;  %v5200_v0 = vld [vmem:[#allocation6 + $0x52] ss:$8 sm:$0x3]  ;;  %v1182_v54 = vsel %vm1180_vm6, %v4781_v3, %v4783_v63  ;;  %v1126_v27 = vadd.f32 %v1124_v14, %v4472_v62  ;;  %v1127_v17 = vadd.f32 %v1125_v45, %v4474_v40  ;;  %v1172_v11 = vmul.f32 %v1165_v55, %v1157_v6 }
 0x500   :  { %v1453_v28 = vrot.slane %v5200_v0, %v3201_v13  ;;  %v1457_v12 = vrot.slane %v5200_v0, %v3204_v15  ;;  %v1173_v29 = vmul.f32 %v1169_v56, %v1158_v34  ;;  %v5240_v44 = vld [vmem:[#allocation6 + $0x55] ss:$8 sm:$0x3]  ;;  %v5242_v60 = vld [vmem:[#allocation6 + $0x56] ss:$8 sm:$0x3]  ;;  %v1505_v40 = vrot.slane %v5220_v43, %v3204_v15 }
 0x501   :  { %v1150_v55 = vadd.f32 %v1148_v30, %v1126_v27  ;;  %v1151_v56 = vadd.f32 %v1149_v7, %v1127_v17  ;;  %v6023_v45 = vrot.slane %v5073_v2, %v3201_v13  ;;  %v6024_v6 = vrot.slane %v5073_v2, %v3204_v15  ;;  %v5258_v3 = vld [vmem:[#allocation6 + $0x57] ss:$8 sm:$0x3] }
 0x502   :  { %v1525_v63 = vrot.slane %v5240_v44, %v3201_v13  ;;  %v1205_v2 = vsel %vm1204_vm7, %v4833_v10, %v4831_v38  ;;  %v1230_v7 = vsel %vm1228_vm8, %v4866_v37, %v4868_v39  ;;  %v6032_v30 = vrot.slane %v5103_v31, %v3204_v15 }
 0x503   :  { %v5236_v36 = vpop.permute.xlu1 %1418  ;;  %v5238_v33 = vpop.permute.xlu0 %1416  ;;  %v1196_v14 = vmul.f32 %v6023_v45, %v1181_v16  ;;  %v1197_v34 = vmul.f32 %v6024_v6, %v1182_v54  ;;  %v1174_v27 = vadd.f32 %v1172_v11, %v1150_v55  ;;  %v1175_v16 = vadd.f32 %v1173_v29, %v1151_v56 }
 0x504   :  { %v1206_v54 = vsel %vm1204_vm7, %v4831_v38, %v4833_v10  ;;  %v1277_v6 = vsel %vm1276_vm10, %v4956_v26, %v4954_v49  ;;  %v1278_v29 = vsel %vm1276_vm10, %v4954_v49, %v4956_v26  ;;  %v1229_v10 = vsel %vm1228_vm8, %v4868_v39, %v4866_v37 }
 0x505   :  { %v1198_v56 = vadd.f32 %v1196_v14, %v1174_v27  ;;  %v1199_v38 = vadd.f32 %v1197_v34, %v1175_v16  ;;  %v6025_v49 = vrot.slane %v5083_v51, %v3201_v13  ;;  %v6026_v11 = vrot.slane %v5083_v51, %v3204_v15  ;;  %v5310_v27 = vld [vmem:[#allocation6 + $0x60] ss:$8 sm:$0x3] }
 0x506   :  { %v1301_v14 = vsel %vm1300_vm12, %v5002_v21, %v5000_v24  ;;  %v1302_v34 = vsel %vm1300_vm12, %v5000_v24, %v5002_v21  ;;  %v1253_v37 = vsel %vm6027_vm3, %v4918_v53, %v4916_v8  ;;  %v1254_v39 = vsel %vm6028_vm4, %v4916_v8, %v4918_v53 }
 0x507   :  { %v1443_v17 = vpop.permute.xlu1 %1442  ;;  %v1441_v45 = vpop.permute.xlu0 %1440  ;;  %v1220_v26 = vmul.f32 %v6025_v49, %v1205_v2  ;;  %v1221_v55 = vmul.f32 %v6026_v11, %v1206_v54  ;;  %v6029_v51 = vrot.slane %v5118_v19, %v3201_v13  ;;  %v6030_v2 = vrot.slane %v5118_v19, %v3204_v15 }
 0x508   :  { %v6031_v11 = vrot.slane %v5103_v31, %v3201_v13  ;;  %v1245_v62 = vmul.f32 %v6032_v30, %v1230_v7  ;;  %v1325_v8 = vsel %vm1324_vm14, %v5043_v59, %v5041_v46  ;;  %v1326_v53 = vsel %vm1324_vm14, %v5041_v46, %v5043_v59 }
 0x509   :  { %v1292_v16 = vmul.f32 %v6029_v51, %v1277_v6  ;;  %v1293_v24 = vmul.f32 %v6030_v2, %v1278_v29  ;;  %v6033_v19 = vrot.slane %v5136_v4, %v3201_v13  ;;  %v6034_v29 = vrot.slane %v5136_v4, %v3204_v15 }
 0x50a   :  { %v1244_v49 = vmul.f32 %v6031_v11, %v1229_v10  ;;  %v1597_v31 = vrot.slane %v5310_v27, %v3201_v13  ;;  %v1601_v30 = vrot.slane %v5310_v27, %v3204_v15  ;;  %v1222_v7 = vadd.f32 %v1220_v26, %v1198_v56 }
 0x50b   :  { %v1467_v21 = vpop.permute.xlu1 %1466  ;;  %v1465_v54 = vpop.permute.xlu0 %1464  ;;  %v1316_v6 = vmul.f32 %v6033_v19, %v1301_v14  ;;  %v1317_v10 = vmul.f32 %v6034_v29, %v1302_v34  ;;  %v1223_v51 = vadd.f32 %v1221_v55, %v1199_v38  ;;  %v6035_v2 = vrot.slane %v5105_v61, %v3201_v13 }
 0x50c   :  { %v6036_v59 = vrot.slane %v5105_v61, %v3204_v15  ;;  %v1294_v11 = vadd.f32 %v1292_v16, %v4643_v25  ;;  %v1295_v4 = vadd.f32 %v1293_v24, %v4645_v9  ;;  %v6037_v34 = vrot.slane %v5138_v58, %v3201_v13 }
 0x50d   :  { %v1268_v46 = vmul.f32 %v6035_v2, %v1253_v37  ;;  %v6038_v56 = vrot.slane %v5138_v58, %v3204_v15  ;;  %v1246_v29 = vadd.f32 %v1244_v49, %v1222_v7  ;;  %v1247_v37 = vadd.f32 %v1245_v62, %v1223_v51 }
 0x50e   :  { %v1269_v14 = vmul.f32 %v6036_v59, %v1254_v39  ;;  %v1340_v19 = vmul.f32 %v6037_v34, %v1325_v8  ;;  %vm6039_vm5 = vcmp.lt.s32.totalorder %v3182_v22, 83  ;;  %v1318_v39 = vadd.f32 %v1316_v6, %v1294_v11 }
 0x50f   :  { %v1341_v55 = vmul.f32 %v6038_v56, %v1326_v53  ;;  %v1491_v38 = vpop.permute.xlu1 %1490  ;;  %v1489_v26 = vpop.permute.xlu0 %1488  ;;  %v1445_v61 = vsel %vm6039_vm5, %v1441_v45, %v1443_v17  ;;  %vm6040_vm6 = vmmov %vm6039_vm5  ;;  %v1319_v9 = vadd.f32 %v1317_v10, %v1295_v4  ;;  %v1349_v16 = vsel %vm1348_vm0, %v5087_v47, %v5085_v23 }
 0x510   :  { %v1446_v25 = vsel %vm6040_vm6, %v1443_v17, %v1441_v45  ;;  %v1350_v58 = vsel %vm1348_vm0, %v5085_v23, %v5087_v47  ;;  %v1270_v24 = vadd.f32 %v1268_v46, %v1246_v29  ;;  %v1271_v62 = vadd.f32 %v1269_v14, %v1247_v37 }
 0x511   :  { %vm6041_vm7 = vcmp.lt.s32.totalorder %v3182_v22, 82  ;;  %v1342_v45 = vadd.f32 %v1340_v19, %v1318_v39  ;;  %v1343_v8 = vadd.f32 %v1341_v55, %v1319_v9  ;;  %v1460_v53 = vmul.f32 %v1453_v28, %v1445_v61 }
 0x512   :  { %v1469_v49 = vsel %vm6041_vm7, %v1465_v54, %v1467_v21  ;;  %vm6042_vm8 = vmmov %vm6041_vm7  ;;  %v1461_v6 = vmul.f32 %v1457_v12, %v1446_v25  ;;  %v6043_v47 = vrot.slane %v5148_v48, %v3201_v13  ;;  %v6044_v51 = vrot.slane %v5148_v48, %v3204_v15 }
 0x513   :  { %v1470_v17 = vsel %vm6042_vm8, %v1467_v21, %v1465_v54  ;;  %v1515_v10 = vpop.permute.xlu1 %1514  ;;  %v1513_v23 = vpop.permute.xlu0 %1512  ;;  %v1493_v54 = vsel %vm1492_vm15, %v1489_v26, %v1491_v38  ;;  %v1494_v28 = vsel %vm1492_vm15, %v1491_v38, %v1489_v26  ;;  %v1373_v0 = vsel %vm1372_vm2, %v5152_v20, %v5150_v50 }
 0x514   :  { %v1364_v7 = vmul.f32 %v6043_v47, %v1349_v16  ;;  %v1365_v21 = vmul.f32 %v6044_v51, %v1350_v58  ;;  %v1374_v12 = vsel %vm1372_vm2, %v5150_v50, %v5152_v20  ;;  %v6045_v48 = vrot.slane %v5218_v57, %v3201_v13 }
 0x515   :  { %v6046_v46 = vrot.slane %v5218_v57, %v3204_v15  ;;  %vm1588_vm10 = vcmp.lt.s32.totalorder %v3182_v22, 77  ;;  %v1397_v14 = vsel %vm1396_vm13, %v5198_v18, %v5196_v5  ;;  %v1398_v20 = vsel %vm1396_vm13, %v5196_v5, %v5198_v18 }
 0x516   :  { %v1484_v2 = vmul.f32 %v6045_v48, %v1469_v49  ;;  %vm6047_vm12 = vcmp.lt.s32.totalorder %v3182_v22, 80  ;;  %v1462_v57 = vadd.f32 %v1460_v53, %v1270_v24  ;;  %v1463_v4 = vadd.f32 %v1461_v6, %v1271_v62 }
 0x517   :  { %v1485_v59 = vmul.f32 %v6046_v46, %v1470_v17  ;;  %v1517_v50 = vsel %vm6047_vm12, %v1513_v23, %v1515_v10  ;;  %vm6048_vm14 = vmmov %vm6047_vm12  ;;  %v6049_v34 = vrot.slane %v5220_v43, %v3201_v13  ;;  %v1509_v56 = vmul.f32 %v1505_v40, %v1494_v28  ;;  %v1539_v55 = vpop.permute.xlu1 %1538  ;;  %v1537_v38 = vpop.permute.xlu0 %1536 }
 0x518   :  { %v1518_v11 = vsel %vm6048_vm14, %v1515_v10, %v1513_v23  ;;  %v1366_v26 = vadd.f32 %v1364_v7, %v1342_v45  ;;  %v1367_v5 = vadd.f32 %v1365_v21, %v1343_v8  ;;  %v1541_v18 = vsel %vm1540_vm11, %v1537_v38, %v1539_v55  ;;  %v2733_v23 = vld [vmem:[#allocation6 + $0xc1] ss:$8 sm:$0x3] }
 0x519   :  { %v1508_v19 = vmul.f32 %v6049_v34, %v1493_v54  ;;  %v1542_v29 = vsel %vm1540_vm11, %v1539_v55, %v1537_v38  ;;  %v1486_v37 = vadd.f32 %v1484_v2, %v1462_v57  ;;  %v1487_v61 = vadd.f32 %v1485_v59, %v1463_v4 }
 0x51a   :  { %v1532_v25 = vmul.f32 %v1525_v63, %v1517_v50  ;;  %v6050_v43 = vrot.slane %v5240_v44, %v3204_v15  ;;  %v6051_v39 = vrot.slane %v5166_v1, %v3201_v13  ;;  %v6052_v16 = vrot.slane %v5166_v1, %v3204_v15 }
 0x51b   :  { %v6053_v24 = vrot.slane %v5176_v32, %v3201_v13  ;;  %v6054_v49 = vrot.slane %v5176_v32, %v3204_v15  ;;  %v1510_v17 = vadd.f32 %v1508_v19, %v1486_v37  ;;  %v1511_v45 = vadd.f32 %v1509_v56, %v1487_v61  ;;  %v1563_v1 = vpop.permute.xlu1 %1562  ;;  %v1561_v10 = vpop.permute.xlu0 %1560  ;;  %v6062_v37 = vld [vmem:[#allocation29_spill] sm:$0xff] }
 0x51c   :  { %v1533_v40 = vmul.f32 %v6050_v43, %v1518_v11  ;;  %v1388_v9 = vmul.f32 %v6051_v39, %v1373_v0  ;;  %v1389_v58 = vmul.f32 %v6052_v16, %v1374_v12  ;;  %v6055_v44 = vrot.slane %v5242_v60, %v3201_v13  ;;  %v6063_v61 = vld [vmem:[#allocation21_spill] sm:$0xff] }
 0x51d   :  { %v1412_v62 = vmul.f32 %v6053_v24, %v1397_v14  ;;  %v1413_v63 = vmul.f32 %v6054_v49, %v1398_v20  ;;  %v6056_v53 = vrot.slane %v5242_v60, %v3204_v15  ;;  %v1421_v47 = vsel %vm1420_vm1, %v5238_v33, %v5236_v36  ;;  %v6070_v49 = vld [vmem:[#allocation28_spill] sm:$0xff] }
 0x51e   :  { %v1556_v8 = vmul.f32 %v6055_v44, %v1541_v18  ;;  %v1422_v32 = vsel %vm1420_vm1, %v5236_v36, %v5238_v33  ;;  %v1565_v7 = vsel %vm1564_vm9, %v1561_v10, %v1563_v1  ;;  %v1566_v60 = vsel %vm1564_vm9, %v1563_v1, %v1561_v10  ;;  %v6061_v18 = vld [vmem:[#allocation27_spill] sm:$0xff] }
 0x51f   :  { %v1557_v6 = vmul.f32 %v6056_v53, %v1542_v29  ;;  %v1534_v51 = vadd.f32 %v1532_v25, %v1510_v17  ;;  %v1535_v21 = vadd.f32 %v1533_v40, %v1511_v45  ;;  %v6057_v54 = vrot.slane %v5258_v3, %v3201_v13  ;;  %v1587_v57 = vpop.permute.xlu1 %1586  ;;  %v1585_v4 = vpop.permute.xlu0 %1584  ;;  %v6065_v40 = vld [vmem:[#allocation30_spill] sm:$0xff] }
 0x520   :  { %v6058_v0 = vrot.slane %v5258_v3, %v3204_v15  ;;  %v1390_v48 = vadd.f32 %v1388_v9, %v1366_v26  ;;  %v1391_v2 = vadd.f32 %v1389_v58, %v1367_v5  ;;  %v2738_v33 = vrot.slane %v2733_v23, %v3201_v13 }
 0x521   :  { %v1580_v28 = vmul.f32 %v6057_v54, %v1565_v7  ;;  %v2742_v36 = vrot.slane %v2733_v23, %v3204_v15  ;;  %v6059_v46 = vrot.slane %v5190_v35, %v3201_v13  ;;  %v6060_v14 = vrot.slane %v5190_v35, %v3204_v15 }
 0x522   :  { %v1581_v12 = vmul.f32 %v6058_v0, %v1566_v60  ;;  %v1558_v50 = vadd.f32 %v1556_v8, %v1534_v51  ;;  %v1559_v11 = vadd.f32 %v1557_v6, %v1535_v21  ;;  %v1414_v3 = vadd.f32 %v1412_v62, %v1390_v48 }
 0x523   :  { %v1436_v59 = vmul.f32 %v6059_v46, %v1421_v47  ;;  %v1437_v20 = vmul.f32 %v6060_v14, %v1422_v32  ;;  %v1415_v34 = vadd.f32 %v1413_v63, %v1391_v2  ;;  %v1589_v19 = vsel %vm1588_vm10, %v1585_v4, %v1587_v57  ;;  %v2729_v58 = vpop.permute.xlu1 %2728  ;;  %v2727_v24 = vpop.permute.xlu0 %2726 }
 0x524   :  { %v1590_v56 = vsel %vm1588_vm10, %v1587_v57, %v1585_v4  ;;  %v1582_v55 = vadd.f32 %v1580_v28, %v1558_v50  ;;  %v1583_v38 = vadd.f32 %v1581_v12, %v1559_v11  ;;  %v1604_v26 = vmul.f32 %v1597_v31, %v1589_v19 }
 0x525   :  { %v1605_v35 = vmul.f32 %v1601_v30, %v1590_v56  ;;  %v2563_v5 = vadd.f32 %v5092_v52, %v5061_v42  ;;  %v2564_v29 = vadd.f32 %v6061_v18, %v5063_v41  ;;  %v6064_v25 = vrot.slane %v6063_v61, %v3201_v13  ;;  %v6067_v42 = vld [vmem:[#allocation96_spill] sm:$0xff]  ;;  %v6068_v52 = vld [vmem:[#allocation97_spill] sm:$0xff]  ;;  %v6069_v41 = vld [vmem:[#allocation26_spill] sm:$0xff] }
 0x526   :  { %v6066_v39 = vrot.slane %v6063_v61, %v3204_v15  ;;  %v1438_v9 = vadd.f32 %v1436_v59, %v1414_v3  ;;  %v1439_v16 = vadd.f32 %v1437_v20, %v1415_v34  ;;  %v1606_v27 = vadd.f32 %v1604_v26, %v1582_v55  ;;  %v6071_v20 = vld [vmem:[#allocation12_spill] sm:$0xff] }
 0x527   :  { %v2584_v43 = vmul.f32 %v6064_v25, %v6062_v37  ;;  %v1607_v30 = vadd.f32 %v1605_v35, %v1583_v38  ;;  %v2724_v62 = vadd.f32 %v6068_v52, %v6067_v42  ;;  %v2725_v63 = vadd.f32 %v6070_v49, %v6069_v41  ;;  %v6072_v35 = vld [vmem:[#allocation15_spill] sm:$0xff]  ;;  %v6073_v18 = vld [vmem:[#allocation16_spill] sm:$0xff]  ;;  %v6074_v37 = vld [vmem:[#allocation13_spill] sm:$0xff] }
 0x528   :  { %v2585_v31 = vmul.f32 %v6066_v39, %v6065_v40  ;;  %v2730_v17 = vsel %vm1588_vm10, %v2727_v24, %v2729_v58  ;;  %v2731_v45 = vsel %vm1588_vm10, %v2729_v58, %v2727_v24  ;;  %v2749_v44 = vadd.f32 %v1606_v27, %v1438_v9  ;;  %v6075_v25 = vld [vmem:[#allocation14_spill] sm:$0xff]  ;;  %v6076_v40 = vld [vmem:[#allocation17_spill] sm:$0xff] }
 0x529   :  { %v2750_v8 = vadd.f32 %v1607_v30, %v1439_v16  ;;  %v2745_v53 = vmul.f32 %v2738_v33, %v2730_v17  ;;  %v2746_v6 = vmul.f32 %v2742_v36, %v2731_v45  ;;  %v2586_v1 = vadd.f32 %v2584_v43, %v2563_v5  ;;  %v6078_v16 = vld [vmem:[#allocation19_spill] sm:$0xff]  ;;  %v6079_v30 = vld [vmem:[#allocation20_spill] sm:$0xff] }
 0x52a   :  { %v2587_v10 = vadd.f32 %v2585_v31, %v2564_v29  ;;  %v2756_v60 = vstv %s5550_s6  ;;  %v3072_v36 = vmov 1966171168   ;;  %s3073_s6 = smov [#allocation8]   ;;  %v6077_v31 = vld [vmem:[#allocation18_spill] sm:$0xff] }
 0x52b   :  { %v2747_v23 = vadd.f32 %v2745_v53, %v2724_v62  ;;  %v2748_v47 = vadd.f32 %v2746_v6, %v2725_v63  ;;  %v2775_v46 = vunpack.c.l.s4 %v3072_v36  ;;  %s2837_s28 = sshll.u32 %s3073_s6, 4  ;;  %s2838_s28 = int_to_ptr.vmem [resolvable:$true] %s2837_s28 }
 0x52c   :  { %s2990_s1 = scalar_lea.vmem %s2838_s28, 1024  ;;  %p2995_p3 = scmp.lt.s32.totalorder %s2838_s28, %s2838_s28 }
 0x52d   :  { %v2751_v32 = vadd.f32 %v2747_v23, %v2586_v1  ;;  %v2752_v7 = vadd.f32 %v2748_v47, %v2587_v10  ;;  %v2776_v59 = vunpack.c.0.s8 %v2775_v46  ;;  %p2991_p2 = scmp.ne.s32.totalorder %s2838_s28, %s2990_s1  ;;  %p2996_p4 = scmp.lt.s32.totalorder %s2990_s1, %s2990_s1 }
 0x52f   :  { %v2753_v51 = vadd.f32 %v2751_v32, %v2749_v44  ;;  %v2754_v21 = vadd.f32 %v2752_v7, %v2750_v8  ;;  %v2779_v50 = vsub.s32 %v2776_v59, %v6071_v20  ;;  %p2997_p5 = por %p2996_p4, %p2995_p3 }
 0x531   :  { %v2757_v54 = vadd.f32 %v2756_v60, %v2753_v51  ;;  %v2758_v28 = vadd.f32 %v2756_v60, %v2754_v21  ;;  %p2998_p6 = pnand %p2997_p5, %p2991_p2 }
 0x533   :  { %v2856_v22 = vmul.f32 -1.442695, %v2757_v54  ;;  %v2857_v0 = vmul.f32 -1.442695, %v2758_v28 }
 0x535   :  { %2938 = vpow2.f32 %v2856_v22 }
 0x536   :  { %2940 = vpow2.f32 %v2857_v0 }
 0x53f   :  { %v2939_v12 = vpop.eup %2938 }
 0x540   :  { %v2941_v48 = vpop.eup %2940  ;;  %v2765_v2 = vadd.f32 1.0, %v2939_v12 }
 0x541   :  { %v2766_v33 = vadd.f32 1.0, %v2941_v48 }
 0x542   :  { %2942 = vrcp.f32 %v2765_v2 }
 0x543   :  { %2944 = vrcp.f32 %v2766_v33 }
 0x54c   :  { %v2943_v14 = vpop.eup %2942 }
 0x54d   :  { %v2945_v11 = vpop.eup %2944 }
 0x54e   :  { %v2773_v57 = vcombine.low %v2943_v14, %v2945_v11 }
 0x550   :  { %v2780_v4 = vrot.slane %v2773_v57, %v2779_v50 }
 0x552   :  { %v2781_v3 = vcombine.high %v2780_v4, %v2780_v4  ;;  %v2788_v34 = vrot.slane %v2780_v4, %v2779_v50 }
 0x554   :  { %v2795_v19 = vrot.slane %v2781_v3, %v2779_v50  ;;  %v2799_v56 = vrot.slane %v2788_v34, %v3201_v13  ;;  %v2803_v55 = vrot.slane %v2788_v34, %v3204_v15 }
 0x556   :  { %v2807_v38 = vrot.slane %v2795_v19, %v3201_v13  ;;  %v2811_v26 = vrot.slane %v2795_v19, %v3204_v15  ;;  %v2816_v5 = vmul.f32 %v2799_v56, %v6072_v35  ;;  %v2817_v29 = vmul.f32 %v2803_v55, %v6073_v18 }
 0x557   :  { %v2818_v61 = vmul.f32 %v2799_v56, %v6074_v37  ;;  %v2819_v43 = vmul.f32 %v2803_v55, %v6075_v25 }
 0x558   :  { %v2820_v39 = vmul.f32 %v2807_v38, %v6076_v40  ;;  %v2821_v9 = vmul.f32 %v2811_v26, %v6077_v31  ;;  %v2822_v27 = vmul.f32 %v2807_v38, %v6078_v16  ;;  %v2823_v58 = vmul.f32 %v2811_v26, %v6079_v30  ;;  %2824 = vst [vmem:[#allocation8] sm:$0xff] %v2816_v5 }
 0x559   :  { %2825 = vst [vmem:[#allocation8 + $0x8] sm:$0xff] %v2817_v29  ;;  %2826 = vst [vmem:[#allocation8 + $0x10] sm:$0xff] %v2818_v61 }
 0x55a   :  { %2827 = vst [vmem:[#allocation8 + $0x18] sm:$0xff] %v2819_v43  ;;  %2828 = vst [vmem:[#allocation8 + $0x20] sm:$0xff] %v2820_v39 }
 0x55b   :  { %2829 = vst [vmem:[#allocation8 + $0x28] sm:$0xff] %v2821_v9  ;;  %2830 = vst [vmem:[#allocation8 + $0x30] sm:$0xff] %v2822_v27 }
 0x55c   :  { %2831 = vst [vmem:[#allocation8 + $0x38] sm:$0xff] %v2823_v58 }
 0x55d   :  { %3001 = shalt.err (!%p2998_p6)
}
 0x55e   :  { %s3002_s8 = scalar_lea.hbm %s5551_s7, 1024 }
 0x55f   :  { %p3003_p7 = scmp.ne.s32.totalorder %s5551_s7, %s3002_s8  ;;  %p3006_p8 = scmp.lt.u32.totalorder %s3002_s8, %s5551_s7 }
 0x561   :  { %p3008_p9 = pnand %p3006_p8, %p3003_p7 }
 0x563   :  { %3011 = shalt.err (!%p3008_p9)
}
 0x564   :  { %s6080_s3 = smov 256  }
 0x565   :  { %2843 = dma.vmem_to_hbm [thread:$0]  %s2838_s28, 1024, %s5551_s7, [#allocation5], %s6080_s3, %s6080_s3, %s3020_s12  }
 0x566   :  { %3016 = dma.done.wait [#allocation5], 1024  }
 0x567   :  { %3017 = vsyncadd [#allocation5], 4294966272 }
 0x568   :  { %2847 = vsyncpa [#allocation4], 1 }
 0x569   :  { %2848 = vsyncpa [#allocation7], 1 }
 0x56a   :  { %2849 = vsyncpa [#allocation5], 1 }

</bundles_post_ra>
